<compile_context>
chip_gen: v7x
topology: tpu7x:2x2x1
jax: 0.10.0
libtpu: 0.0.40
codegen_flags: <defaults>
</compile_context>

<pallas_src>
import functools
import math

import jax
import jax.numpy as jnp
from jax.experimental import pallas as pl
from jax.experimental.pallas import tpu as pltpu


# ============================================================================
# Pallas kernel 1: fused bidirectional LSTM recurrence.
#   grid = (N,) independent sequences (e.g. the 3 modality encoders), time loop inside.
# ============================================================================
def _bilstm_kernel(gx_ref, whh_ref, mask_ref, out_ref, h_scr, c_scr, *, hidden, seq_len):
    """One grid step = one full bidirectional LSTM pass.

    gx_ref:   (L, B, 8H) precomputed x @ W_ih + bias.  Column layout (directions
              interleaved, gates reordered so all sigmoid gates are contiguous):
                  [i_f, i_b, f_f, f_b, o_f, o_b, g_f, g_b]
              Row t holds the forward projection of x[t] and the *backward* projection
              of x[L-1-t], so both directions advance in lockstep.
    whh_ref:  (2H, 8H) block recurrent weights for h_cat = [h_fwd | h_bwd].
    mask_ref: (L, B, 2H) 1.0 where (direction, timestep) is inside the sequence length.
    out_ref:  (L, B, 2H) row t = [fwd hidden at time t | bwd hidden at time L-1-t].
    """
    H = hidden
    h_scr[...] = jnp.zeros_like(h_scr)
    c_scr[...] = jnp.zeros_like(c_scr)
    whh = whh_ref[...]                                     # (2H, 8H) stays resident

    def step(t, carry):
        gx = gx_ref[t]                                     # (B, 8H)
        m = mask_ref[t]                                    # (B, 2H)
        h = h_scr[...]                                     # (B, 2H)
        c = c_scr[...]                                     # (B, 2H)

        gates = gx + jnp.dot(h, whh, preferred_element_type=jnp.float32)   # (B, 8H)
        sig = jax.nn.sigmoid(gates[:, : 6 * H])            # [i_f,i_b | f_f,f_b | o_f,o_b]
        g_g = jnp.tanh(gates[:, 6 * H:])                   # [g_f, g_b]
        i_g = sig[:, : 2 * H]
        f_g = sig[:, 2 * H: 4 * H]
        o_g = sig[:, 4 * H: 6 * H]

        c_new = f_g * c + i_g * g_g
        h_new = o_g * jnp.tanh(c_new)

        # Packed-sequence semantics: freeze state and zero outputs past each length.
        valid = m > 0.5
        h_scr[...] = jnp.where(valid, h_new, h)
        c_scr[...] = jnp.where(valid, c_new, c)
        out_ref[t] = jnp.where(valid, h_new, 0.0).astype(out_ref.dtype)
        return carry

    jax.lax.fori_loop(0, seq_len, step, 0, unroll=(seq_len <= 32))


def bilstm_batched(gx, whh, mask):
    """gx: (N, L, B, 8H), whh: (N, 2H, 8H), mask: (L, B, 2H) -> (N, L, B, 2H)."""
    N, L, B, G = gx.shape
    H = G // 8
    kernel = functools.partial(_bilstm_kernel, hidden=H, seq_len=L)
    return pl.pallas_call(
        kernel,
        out_shape=jax.ShapeDtypeStruct((N, L, B, 2 * H), jnp.float32),
        grid_spec=pltpu.PrefetchScalarGridSpec(
            num_scalar_prefetch=0,
            grid=(N,),
            in_specs=[
                pl.BlockSpec((None, L, B, G), lambda n: (n, 0, 0, 0)),
                pl.BlockSpec((None, 2 * H, G), lambda n: (n, 0, 0)),
                pl.BlockSpec((L, B, 2 * H), lambda n: (0, 0, 0)),
            ],
            out_specs=pl.BlockSpec((None, L, B, 2 * H), lambda n: (n, 0, 0, 0)),
            scratch_shapes=[
                pltpu.VMEM((B, 2 * H), jnp.float32),
                pltpu.VMEM((B, 2 * H), jnp.float32),
            ],
        ),
        compiler_params=pltpu.CompilerParams(dimension_semantics=("parallel",)),
    )(gx, whh, mask)


# ============================================================================
# Pallas kernel 2: batched self-attention with fused K/Q/V projection.
#   grid = (N,) attention heads (e.g. the 3 encoder self-attentions).
# ============================================================================
def _self_attn_kernel(x_ref, w_ref, bias_ref, out_ref, *, att_size, scale):
    x = x_ref[...]                                          # (B, L, D) — DMA'd once
    w = w_ref[...]                                          # (D, 3A) columns [K | Q | V]
    kqv = jnp.einsum("bld,da->bla", x, w, preferred_element_type=jnp.float32)
    A = att_size
    k = kqv[:, :, :A]
    q = kqv[:, :, A: 2 * A]
    v = kqv[:, :, 2 * A:]
    scores = jnp.einsum("bqa,bka->bqk", q, k, preferred_element_type=jnp.float32) * scale
    scores = scores + bias_ref[...]                         # (B, 1, L) additive key mask
    p = jax.nn.softmax(scores, axis=-1)
    out_ref[...] = jnp.einsum("bqk,bka->bqa", p, v,
                              preferred_element_type=jnp.float32).astype(out_ref.dtype)


def batched_self_attention(x, w_kqv, bias):
    """x: (N, B, L, D), w_kqv: (N, D, 3A), bias: (B, 1, L) -> (N, B, L, A)."""
    N, B, L, D = x.shape
    A = w_kqv.shape[-1] // 3
    scale = 1.0 / math.sqrt(D)                              # dk = input feature dim
    kernel = functools.partial(_self_attn_kernel, att_size=A, scale=scale)
    return pl.pallas_call(
        kernel,
        out_shape=jax.ShapeDtypeStruct((N, B, L, A), jnp.float32),
        grid_spec=pltpu.PrefetchScalarGridSpec(
            num_scalar_prefetch=0,
            grid=(N,),
            in_specs=[
                pl.BlockSpec((None, B, L, D), lambda n: (n, 0, 0, 0)),
                pl.BlockSpec((None, D, 3 * A), lambda n: (n, 0, 0)),
                pl.BlockSpec((B, 1, L), lambda n: (0, 0, 0)),
            ],
            out_specs=pl.BlockSpec((None, B, L, A), lambda n: (n, 0, 0, 0)),
        ),
        compiler_params=pltpu.CompilerParams(dimension_semantics=("parallel",)),
    )(x, w_kqv, bias)


# ============================================================================
# Pallas kernel 3: batched cross-attention over shared input banks.
#   grid = (N,) directed attentions; scalar-prefetch index tables select which bank
#   entry supplies queries / keys+values for each grid step (inputs stored once in HBM).
# ============================================================================
def _cross_attn_kernel(q_idx_ref, kv_idx_ref, xq_ref, xkv_ref, wq_ref, wkv_ref,
                       out_ref, *, att_size, scale):
    del q_idx_ref, kv_idx_ref                               # only used by the index maps
    xq = xq_ref[...]                                        # (B, Lq, Dq)
    xkv = xkv_ref[...]                                      # (B, Lk, Dk)
    q = jnp.einsum("bld,da->bla", xq, wq_ref[...], preferred_element_type=jnp.float32)
    kv = jnp.einsum("bld,da->bla", xkv, wkv_ref[...], preferred_element_type=jnp.float32)
    A = att_size
    k = kv[:, :, :A]
    v = kv[:, :, A:]
    scores = jnp.einsum("bqa,bka->bqk", q, k, preferred_element_type=jnp.float32) * scale
    p = jax.nn.softmax(scores, axis=-1)
    out_ref[...] = jnp.einsum("bqk,bka->bqa", p, v,
                              preferred_element_type=jnp.float32).astype(out_ref.dtype)


def gathered_cross_attention(xq_bank, xkv_bank, w_q, w_kv, q_idx, kv_idx):
    """N directed cross-attentions sharing input banks.

    xq_bank:  (Mq, B, Lq, Dq)   bank of query inputs
    xkv_bank: (Mk, B, Lk, Dk)   bank of key/value inputs
    w_q:      (N, Dq, A)
    w_kv:     (N, Dk, 2A)       columns [K | V]
    q_idx, kv_idx: (N,) int32 — which bank entry each attention reads.
    -> (N, B, Lq, A)
    """
    N = w_q.shape[0]
    _, B, Lq, Dq = xq_bank.shape
    _, _, Lk, Dk = xkv_bank.shape
    A = w_q.shape[-1]
    scale = 1.0 / math.sqrt(Dk)                             # dk = key input feature dim
    kernel = functools.partial(_cross_attn_kernel, att_size=A, scale=scale)
    return pl.pallas_call(
        kernel,
        out_shape=jax.ShapeDtypeStruct((N, B, Lq, A), jnp.float32),
        grid_spec=pltpu.PrefetchScalarGridSpec(
            num_scalar_prefetch=2,
            grid=(N,),
            in_specs=[
                pl.BlockSpec((None, B, Lq, Dq), lambda n, qi, ki: (qi[n], 0, 0, 0)),
                pl.BlockSpec((None, B, Lk, Dk), lambda n, qi, ki: (ki[n], 0, 0, 0)),
                pl.BlockSpec((None, Dq, A), lambda n, qi, ki: (n, 0, 0)),
                pl.BlockSpec((None, Dk, 2 * A), lambda n, qi, ki: (n, 0, 0)),
            ],
            out_specs=pl.BlockSpec((None, B, Lq, A), lambda n, qi, ki: (n, 0, 0, 0)),
        ),
        compiler_params=pltpu.CompilerParams(dimension_semantics=("parallel",)),
    )(q_idx, kv_idx, xq_bank, xkv_bank, w_q, w_kv)


# ============================================================================
# Parameter fusion helpers (cheap XLA glue, run under jit)
# ============================================================================
def _split_gates(w):
    """Split a (..., 4H) PyTorch-gate-ordered tensor into (i, f, g, o)."""
    return jnp.split(w, 4, axis=-1)


def _interleave_dirs(wf, wb):
    """Combine fwd/bwd 4H-gate tensors into the fused 8H layout
    [i_f, i_b, f_f, f_b, o_f, o_b, g_f, g_b] (sigmoid gates first, tanh gate last)."""
    i_f, f_f, g_f, o_f = _split_gates(wf)
    i_b, f_b, g_b, o_b = _split_gates(wb)
    return jnp.concatenate([i_f, i_b, f_f, f_b, o_f, o_b, g_f, g_b], axis=-1)


def _prep_bilstm(p):
    """Build the fused recurrent weight (2H, 8H) and bias (8H,) for one biLSTM."""
    f, b = p["fwd"], p["bwd"]
    zeros_h = jnp.zeros_like(f["w_hh_t"])
    whh_blk = jnp.concatenate(
        [
            _interleave_dirs(f["w_hh_t"], zeros_h),    # rows fed by h_fwd
            _interleave_dirs(zeros_h, b["w_hh_t"]),    # rows fed by h_bwd
        ],
        axis=0,
    )                                                  # (2H, 8H)
    bias8 = _interleave_dirs(f["bias"], b["bias"])     # (8H,)
    return whh_blk, bias8


def _lstm_input_gates(x_bld, p, bias8):
    """Hoisted input projection: x (B, L, D) -> (L, B, 8H) = x @ W_ih (both dirs) + bias."""
    x = jnp.transpose(x_bld, (1, 0, 2))                                # (L, B, D)
    gf = jnp.einsum("lbd,dg->lbg", x, p["fwd"]["w_ih_t"])              # (L, B, 4H)
    gb = jnp.einsum("lbd,dg->lbg", x[::-1], p["bwd"]["w_ih_t"])        # bwd sees reversed x
    return _interleave_dirs(gf, gb) + bias8


def _kqv_weight(att):
    return jnp.concatenate([att["k"], att["q"], att["v"]], axis=-1)    # (D, 3A)


def _kv_weight(k, v):
    return jnp.concatenate([k, v], axis=-1)                            # (D, 2A)


# ============================================================================
# Full module forward (feedback=False path of AudioVisualTextEncoder)
# ============================================================================
def audio_visual_text_encoder(txt, au, vi, lengths, params):
    txt = txt.astype(jnp.float32)
    au = au.astype(jnp.float32)
    vi = vi.astype(jnp.float32)

    B, L, _ = txt.shape
    H = params["text"]["fwd"]["w_hh_t"].shape[0]            # == projection size P

    # ---- shared masks (built once) ----------------------------------------
    steps = jnp.arange(L, dtype=jnp.int32)
    valid_lb = (steps[:, None] < lengths[None, :]).astype(jnp.float32)     # (L, B)
    lstm_mask = jnp.concatenate(
        [
            jnp.broadcast_to(valid_lb[:, :, None], (L, B, H)),             # fwd: time t
            jnp.broadcast_to(valid_lb[::-1][:, :, None], (L, B, H)),       # bwd: time L-1-t
        ],
        axis=-1,
    )                                                                       # (L, B, 2H)
    pad_bl = jnp.transpose(valid_lb)                                        # (B, L)
    att_bias = ((1.0 - pad_bl) * (-1e5))[:, None, :]                        # (B, 1, L)

    # ---- stage 1: the 3 modality bi-LSTMs in ONE kernel call ---------------
    mod_params = [params["text"], params["audio"], params["visual"]]
    whh_list, gx_list = [], []
    for x, p in zip((txt, au, vi), mod_params):
        whh, bias8 = _prep_bilstm(p)
        whh_list.append(whh)
        gx_list.append(_lstm_input_gates(x, p, bias8))
    gx_stack = jnp.stack(gx_list)                                           # (3, L, B, 8H)
    whh_stack = jnp.stack(whh_list)                                         # (3, 2H, 8H)
    lstm_out = bilstm_batched(gx_stack, whh_stack, lstm_mask)               # (3, L, B, 2H)

    # merge_bi='sum' (bwd half is stored time-reversed) and back to batch-major
    enc = lstm_out[:, :, :, :H] + lstm_out[:, ::-1, :, H:]                  # (3, L, B, H)
    enc = jnp.transpose(enc, (0, 2, 1, 3))                                  # (3, B, L, H)

    # ---- stage 2: the 3 encoder self-attentions in ONE kernel call ----------
    w_kqv = jnp.stack([_kqv_weight(p["att"]) for p in mod_params])          # (3, H, 3H)
    mods = batched_self_attention(enc, w_kqv, att_bias)                     # (3, B, L, H)
    txt_e, au_e, vi_e = mods[0], mods[1], mods[2]

    # ---- stage 3: AttentionFuser — 6 directed cross-attentions, batched -----
    # TODO(synk): SymmetricAttention internals inferred from the mmlatch repo; both
    # directional outputs are summed downstream so the q/k pairing convention cancels.
    fz = params["fuser"]["att_fuser"]
    ta_p, va_p, tv_p = fz["ta"], fz["va"], fz["tv"]
    TXT, AU, VI = 0, 1, 2
    #   0: q=txt (ta.qx), kv=au (ta.ky/vy)    1: q=au (ta.qy), kv=txt (ta.kx/vx)
    #   2: q=vi  (va.qx), kv=au (va.ky/vy)    3: q=au (va.qy), kv=vi  (va.kx/vx)
    #   4: q=txt (tv.qx), kv=vi (tv.ky/vy)    5: q=vi (tv.qy), kv=txt (tv.kx/vx)
    q_idx = jnp.array([TXT, AU, VI, AU, TXT, VI], dtype=jnp.int32)
    kv_idx = jnp.array([AU, TXT, AU, VI, VI, TXT], dtype=jnp.int32)
    w_q = jnp.stack([ta_p["qx"], ta_p["qy"], va_p["qx"], va_p["qy"], tv_p["qx"], tv_p["qy"]])
    w_kv = jnp.stack(
        [
            _kv_weight(ta_p["ky"], ta_p["vy"]), _kv_weight(ta_p["kx"], ta_p["vx"]),
            _kv_weight(va_p["ky"], va_p["vy"]), _kv_weight(va_p["kx"], va_p["vx"]),
            _kv_weight(tv_p["ky"], tv_p["vy"]), _kv_weight(tv_p["kx"], tv_p["vx"]),
        ]
    )
    cross = gathered_cross_attention(mods, mods, w_q, w_kv, q_idx, kv_idx)  # (6, B, L, H)
    ta = cross[0] + cross[1]
    av = cross[2] + cross[3]
    tv = cross[4] + cross[5]

    # ---- stage 4: tav = Attention(txt, queries=av) ---------------------------
    tav_p = fz["tav"]
    tav = gathered_cross_attention(
        av[None], txt_e[None],
        tav_p["q"][None], _kv_weight(tav_p["k"], tav_p["v"])[None],
        jnp.zeros((1,), jnp.int32), jnp.zeros((1,), jnp.int32),
    )[0]                                                                    # (B, L, H)

    # ---- stage 5: concat + AttRnnFuser RNN (merge_bi='cat') ------------------
    fused = jnp.concatenate([txt_e, au_e, vi_e, ta, tv, av, tav], axis=-1)  # (B, L, 7H)

    rnn_p = params["fuser"]["rnn"]
    whh_r, bias8_r = _prep_bilstm(rnn_p)
    gx_r = _lstm_input_gates(fused, rnn_p, bias8_r)                         # (L, B, 8H)
    rnn_out = bilstm_batched(gx_r[None], whh_r[None], lstm_mask)[0]         # (L, B, 2H)
    rnn_cat = jnp.concatenate([rnn_out[:, :, :H], rnn_out[::-1, :, H:]], axis=-1)
    rnn_cat = jnp.transpose(rnn_cat, (1, 0, 2))                             # (B, L, 2H)

    # ---- stage 6: fuser self-attention + sum over time -----------------------
    w_kqv_r = _kqv_weight(rnn_p["att"])[None]                               # (1, 2H, 6H)
    att_out = batched_self_attention(rnn_cat[None], w_kqv_r, att_bias)[0]   # (B, L, 2H)

    # Reference sums all timesteps (padded query rows are key-masked, not zeroed).
    return att_out.sum(axis=1)                                              # (B, 2H)


# ============================================================================
# Deterministic parameter initialization (synthetic, shapes per module __init__)
# ============================================================================
class _KeyGen:
    def __init__(self, key):
        self._key = key
        self._i = 0

    def __call__(self):
        self._i += 1
        return jax.random.fold_in(self._key, self._i)


def _init_linear(key, d_in, d_out):
    bound = math.sqrt(6.0 / (d_in + d_out))       # xavier-uniform-like (bias=False)
    return jax.random.uniform(key, (d_in, d_out), jnp.float32, -bound, bound)


def _init_lstm_dir(kg, d_in, hidden):
    bound = 1.0 / math.sqrt(hidden)               # PyTorch nn.LSTM default init
    w_ih_t = jax.random.uniform(kg(), (d_in, 4 * hidden), jnp.float32, -bound, bound)
    w_hh_t = jax.random.uniform(kg(), (hidden, 4 * hidden), jnp.float32, -bound, bound)
    b_ih = jax.random.uniform(kg(), (4 * hidden,), jnp.float32, -bound, bound)
    b_hh = jax.random.uniform(kg(), (4 * hidden,), jnp.float32, -bound, bound)
    return dict(w_ih_t=w_ih_t, w_hh_t=w_hh_t, bias=b_ih + b_hh)


def _init_attentive_rnn(kg, d_in, hidden, att_size):
    return dict(
        fwd=_init_lstm_dir(kg, d_in, hidden),
        bwd=_init_lstm_dir(kg, d_in, hidden),
        att=dict(k=_init_linear(kg(), att_size, att_size),
                 q=_init_linear(kg(), att_size, att_size),
                 v=_init_linear(kg(), att_size, att_size)),
    )


def _init_symmetric(kg, p):
    return dict(kx=_init_linear(kg(), p, p), qx=_init_linear(kg(), p, p), vx=_init_linear(kg(), p, p),
                ky=_init_linear(kg(), p, p), qy=_init_linear(kg(), p, p), vy=_init_linear(kg(), p, p))


def init_params(key, *, text_in, audio_in, visual_in, proj):
    kg = _KeyGen(key)
    return dict(
        text=_init_attentive_rnn(kg, text_in, proj, proj),       # merge_bi='sum' -> att_size = proj
        audio=_init_attentive_rnn(kg, audio_in, proj, proj),
        visual=_init_attentive_rnn(kg, visual_in, proj, proj),
        fuser=dict(
            att_fuser=dict(
                ta=_init_symmetric(kg, proj),
                va=_init_symmetric(kg, proj),
                tv=_init_symmetric(kg, proj),
                tav=dict(k=_init_linear(kg(), proj, proj),
                         q=_init_linear(kg(), proj, proj),
                         v=_init_linear(kg(), proj, proj)),
            ),
            # AttRnnFuser rnn: input 7*proj, hidden proj, bidirectional, merge_bi='cat'
            rnn=_init_attentive_rnn(kg, 7 * proj, proj, 2 * proj),
        ),
    )


# ============================================================================
# Demo
# ============================================================================
if __name__ == "__main__":
    B, L = 2, 8
    TEXT_IN, AUDIO_IN, VISUAL_IN, PROJ = 32, 16, 24, 32   # encoder hidden == projection_size

    root = jax.random.PRNGKey(0)
    kt, ka, kv, kp = jax.random.split(root, 4)
    txt = jax.random.normal(kt, (B, L, TEXT_IN), jnp.float32)
    au = jax.random.normal(ka, (B, L, AUDIO_IN), jnp.float32)
    vi = jax.random.normal(kv, (B, L, VISUAL_IN), jnp.float32)
    lengths = jnp.array([8, 5], dtype=jnp.int32)

    params = init_params(kp, text_in=TEXT_IN, audio_in=AUDIO_IN, visual_in=VISUAL_IN, proj=PROJ)

    fwd = jax.jit(audio_visual_text_encoder)
    fused = fwd(txt, au, vi, lengths, params)
    fused = jax.block_until_ready(fused)

    assert fused.shape == (B, 2 * PROJ), fused.shape
    assert bool(jnp.all(jnp.isfinite(fused)))
    print("KERNEL_OK")
</pallas_src>

<mosaic_0001>
module attributes {stable_mosaic.version = 11 : i64} {
  func.func @_bilstm_kernel(%arg0: i32, %arg1: memref<1x8x2x256xf32, #tpu.memory_space<vmem>>, %arg2: memref<1x64x256xf32, #tpu.memory_space<vmem>>, %arg3: memref<8x2x64xf32, #tpu.memory_space<vmem>>, %arg4: memref<1x8x2x64xf32, #tpu.memory_space<vmem>>, %arg5: memref<2x64xf32, #tpu.memory_space<vmem>>, %arg6: memref<2x64xf32, #tpu.memory_space<vmem>>) attributes {dimension_semantics = [#tpu.dimension_semantics<parallel>], iteration_bounds = array<i64: 3>, scalar_prefetch = 0 : i64, scratch_operands = 2 : i64, tpu.core_type = #tpu.core_type<tc>, window_params = [{transform_indices = @transform_0, window_bounds = array<i64: 1, 8, 2, 256>}, {transform_indices = @transform_1, window_bounds = array<i64: 1, 64, 256>}, {pipeline_mode = #tpu.pipeline_mode<synchronous>, transform_indices = @transform_2, window_bounds = array<i64: 8, 2, 64>}, {transform_indices = @transform_3, window_bounds = array<i64: 1, 8, 2, 64>}]} {
    %cst = arith.constant 0.000000e+00 : f32
    %0 = vector.broadcast %cst : f32 to vector<2x64xf32>
    %c0 = arith.constant 0 : index
    %c0_0 = arith.constant 0 : index
    %1 = vector.load %arg5[%c0, %c0_0] : memref<2x64xf32, #tpu.memory_space<vmem>>, vector<2x64xf32>
    tpu.vector_store %arg5[%c0, %c0_0], %0 {strides = array<i32>} : memref<2x64xf32, #tpu.memory_space<vmem>>, vector<2x64xf32>,
    %cst_1 = arith.constant 0.000000e+00 : f32
    %2 = vector.broadcast %cst_1 : f32 to vector<2x64xf32>
    %c0_2 = arith.constant 0 : index
    %c0_3 = arith.constant 0 : index
    %3 = vector.load %arg6[%c0_2, %c0_3] : memref<2x64xf32, #tpu.memory_space<vmem>>, vector<2x64xf32>
    tpu.vector_store %arg6[%c0_2, %c0_3], %2 {strides = array<i32>} : memref<2x64xf32, #tpu.memory_space<vmem>>, vector<2x64xf32>,
    %c0_4 = arith.constant 0 : index
    %c0_5 = arith.constant 0 : index
    %c0_6 = arith.constant 0 : index
    %4 = vector.load %arg2[%c0_4, %c0_5, %c0_6] : memref<1x64x256xf32, #tpu.memory_space<vmem>>, vector<1x64x256xf32>
    %5 = vector.shape_cast %4 : vector<1x64x256xf32> to vector<64x256xf32>
    %c0_i32 = arith.constant 0 : i32
    %c0_7 = arith.constant 0 : index
    %6 = arith.index_cast %c0_i32 : i32 to index
    %c0_8 = arith.constant 0 : index
    %c0_9 = arith.constant 0 : index
    %7 = vector.load %arg1[%c0_7, %6, %c0_8, %c0_9] : memref<1x8x2x256xf32, #tpu.memory_space<vmem>>, vector<1x1x2x256xf32>
    %8 = vector.shape_cast %7 : vector<1x1x2x256xf32> to vector<2x256xf32>
    %9 = arith.index_cast %c0_i32 : i32 to index
    %c0_10 = arith.constant 0 : index
    %c0_11 = arith.constant 0 : index
    %10 = vector.load %arg3[%9, %c0_10, %c0_11] : memref<8x2x64xf32, #tpu.memory_space<vmem>>, vector<1x2x64xf32>
    %11 = vector.shape_cast %10 : vector<1x2x64xf32> to vector<2x64xf32>
    %c0_12 = arith.constant 0 : index
    %c0_13 = arith.constant 0 : index
    %12 = vector.load %arg5[%c0_12, %c0_13] : memref<2x64xf32, #tpu.memory_space<vmem>>, vector<2x64xf32>
    %c0_14 = arith.constant 0 : index
    %c0_15 = arith.constant 0 : index
    %13 = vector.load %arg6[%c0_14, %c0_15] : memref<2x64xf32, #tpu.memory_space<vmem>>, vector<2x64xf32>
    %cst_16 = arith.constant dense<0.000000e+00> : vector<2x256xf32>
    %14 = tpu.matmul %12, %5, %cst_16 {dimension_numbers = #tpu.dot_dimension_numbers<[1], [0], [0], [1], [0, 0, 1, 1], [], []>} : vector<2x64xf32>, vector<64x256xf32>, vector<2x256xf32> -> vector<2x256xf32>
    %15 = arith.addf %8, %14 : vector<2x256xf32>
    %16 = vector.extract_strided_slice %15 {offsets = [0, 0], sizes = [2, 192], strides = [1, 1]} : vector<2x256xf32> to vector<2x192xf32>
    %17 = arith.negf %16 : vector<2x192xf32>
    %18 = math.exp %17 : vector<2x192xf32>
    %cst_17 = arith.constant 1.000000e+00 : f32
    %19 = vector.broadcast %cst_17 : f32 to vector<2x192xf32>
    %20 = arith.addf %19, %18 : vector<2x192xf32>
    %21 = arith.divf %19, %20 : vector<2x192xf32>
    %22 = vector.extract_strided_slice %15 {offsets = [0, 192], sizes = [2, 64], strides = [1, 1]} : vector<2x256xf32> to vector<2x64xf32>
    %23 = math.tanh %22 : vector<2x64xf32>
    %24 = vector.extract_strided_slice %21 {offsets = [0, 0], sizes = [2, 64], strides = [1, 1]} : vector<2x192xf32> to vector<2x64xf32>
    %25 = vector.extract_strided_slice %21 {offsets = [0, 64], sizes = [2, 64], strides = [1, 1]} : vector<2x192xf32> to vector<2x64xf32>
    %26 = vector.extract_strided_slice %21 {offsets = [0, 128], sizes = [2, 64], strides = [1, 1]} : vector<2x192xf32> to vector<2x64xf32>
    %27 = arith.mulf %25, %13 : vector<2x64xf32>
    %28 = arith.mulf %24, %23 : vector<2x64xf32>
    %29 = arith.addf %27, %28 : vector<2x64xf32>
    %30 = math.tanh %29 : vector<2x64xf32>
    %31 = arith.mulf %26, %30 : vector<2x64xf32>
    %cst_18 = arith.constant 5.000000e-01 : f32
    %32 = vector.broadcast %cst_18 : f32 to vector<2x64xf32>
    %33 = arith.cmpf ogt, %11, %32 : vector<2x64xf32>
    %34 = arith.select %33, %31, %12 : vector<2x64xi1>, vector<2x64xf32>
    %c0_19 = arith.constant 0 : index
    %c0_20 = arith.constant 0 : index
    %35 = vector.load %arg5[%c0_19, %c0_20] : memref<2x64xf32, #tpu.memory_space<vmem>>, vector<2x64xf32>
    tpu.vector_store %arg5[%c0_19, %c0_20], %34 {strides = array<i32>} : memref<2x64xf32, #tpu.memory_space<vmem>>, vector<2x64xf32>,
    %36 = arith.select %33, %29, %13 : vector<2x64xi1>, vector<2x64xf32>
    %c0_21 = arith.constant 0 : index
    %c0_22 = arith.constant 0 : index
    %37 = vector.load %arg6[%c0_21, %c0_22] : memref<2x64xf32, #tpu.memory_space<vmem>>, vector<2x64xf32>
    tpu.vector_store %arg6[%c0_21, %c0_22], %36 {strides = array<i32>} : memref<2x64xf32, #tpu.memory_space<vmem>>, vector<2x64xf32>,
    %cst_23 = arith.constant 0.000000e+00 : f32
    %38 = vector.broadcast %cst_23 : f32 to vector<2x64xf32>
    %39 = arith.select %33, %31, %38 : vector<2x64xi1>, vector<2x64xf32>
    %c0_24 = arith.constant 0 : index
    %40 = arith.index_cast %c0_i32 : i32 to index
    %c0_25 = arith.constant 0 : index
    %c0_26 = arith.constant 0 : index
    %41 = vector.load %arg4[%c0_24, %40, %c0_25, %c0_26] : memref<1x8x2x64xf32, #tpu.memory_space<vmem>>, vector<1x1x2x64xf32>
    %42 = vector.shape_cast %41 : vector<1x1x2x64xf32> to vector<2x64xf32>
    %43 = vector.shape_cast %39 : vector<2x64xf32> to vector<1x1x2x64xf32>
    tpu.vector_store %arg4[%c0_24, %40, %c0_25, %c0_26], %43 {strides = array<i32>} : memref<1x8x2x64xf32, #tpu.memory_space<vmem>>, vector<1x1x2x64xf32>,
    %c1_i32 = arith.constant 1 : i32
    %c0_27 = arith.constant 0 : index
    %44 = arith.index_cast %c1_i32 : i32 to index
    %c0_28 = arith.constant 0 : index
    %c0_29 = arith.constant 0 : index
    %45 = vector.load %arg1[%c0_27, %44, %c0_28, %c0_29] : memref<1x8x2x256xf32, #tpu.memory_space<vmem>>, vector<1x1x2x256xf32>
    %46 = vector.shape_cast %45 : vector<1x1x2x256xf32> to vector<2x256xf32>
    %47 = arith.index_cast %c1_i32 : i32 to index
    %c0_30 = arith.constant 0 : index
    %c0_31 = arith.constant 0 : index
    %48 = vector.load %arg3[%47, %c0_30, %c0_31] : memref<8x2x64xf32, #tpu.memory_space<vmem>>, vector<1x2x64xf32>
    %49 = vector.shape_cast %48 : vector<1x2x64xf32> to vector<2x64xf32>
    %c0_32 = arith.constant 0 : index
    %c0_33 = arith.constant 0 : index
    %50 = vector.load %arg5[%c0_32, %c0_33] : memref<2x64xf32, #tpu.memory_space<vmem>>, vector<2x64xf32>
    %c0_34 = arith.constant 0 : index
    %c0_35 = arith.constant 0 : index
    %51 = vector.load %arg6[%c0_34, %c0_35] : memref<2x64xf32, #tpu.memory_space<vmem>>, vector<2x64xf32>
    %cst_36 = arith.constant dense<0.000000e+00> : vector<2x256xf32>
    %52 = tpu.matmul %50, %5, %cst_36 {dimension_numbers = #tpu.dot_dimension_numbers<[1], [0], [0], [1], [0, 0, 1, 1], [], []>} : vector<2x64xf32>, vector<64x256xf32>, vector<2x256xf32> -> vector<2x256xf32>
    %53 = arith.addf %46, %52 : vector<2x256xf32>
    %54 = vector.extract_strided_slice %53 {offsets = [0, 0], sizes = [2, 192], strides = [1, 1]} : vector<2x256xf32> to vector<2x192xf32>
    %55 = arith.negf %54 : vector<2x192xf32>
    %56 = math.exp %55 : vector<2x192xf32>
    %cst_37 = arith.constant 1.000000e+00 : f32
    %57 = vector.broadcast %cst_37 : f32 to vector<2x192xf32>
    %58 = arith.addf %57, %56 : vector<2x192xf32>
    %59 = arith.divf %57, %58 : vector<2x192xf32>
    %60 = vector.extract_strided_slice %53 {offsets = [0, 192], sizes = [2, 64], strides = [1, 1]} : vector<2x256xf32> to vector<2x64xf32>
    %61 = math.tanh %60 : vector<2x64xf32>
    %62 = vector.extract_strided_slice %59 {offsets = [0, 0], sizes = [2, 64], strides = [1, 1]} : vector<2x192xf32> to vector<2x64xf32>
    %63 = vector.extract_strided_slice %59 {offsets = [0, 64], sizes = [2, 64], strides = [1, 1]} : vector<2x192xf32> to vector<2x64xf32>
    %64 = vector.extract_strided_slice %59 {offsets = [0, 128], sizes = [2, 64], strides = [1, 1]} : vector<2x192xf32> to vector<2x64xf32>
    %65 = arith.mulf %63, %51 : vector<2x64xf32>
    %66 = arith.mulf %62, %61 : vector<2x64xf32>
    %67 = arith.addf %65, %66 : vector<2x64xf32>
    %68 = math.tanh %67 : vector<2x64xf32>
    %69 = arith.mulf %64, %68 : vector<2x64xf32>
    %cst_38 = arith.constant 5.000000e-01 : f32
    %70 = vector.broadcast %cst_38 : f32 to vector<2x64xf32>
    %71 = arith.cmpf ogt, %49, %70 : vector<2x64xf32>
    %72 = arith.select %71, %69, %50 : vector<2x64xi1>, vector<2x64xf32>
    %c0_39 = arith.constant 0 : index
    %c0_40 = arith.constant 0 : index
    %73 = vector.load %arg5[%c0_39, %c0_40] : memref<2x64xf32, #tpu.memory_space<vmem>>, vector<2x64xf32>
    tpu.vector_store %arg5[%c0_39, %c0_40], %72 {strides = array<i32>} : memref<2x64xf32, #tpu.memory_space<vmem>>, vector<2x64xf32>,
    %74 = arith.select %71, %67, %51 : vector<2x64xi1>, vector<2x64xf32>
    %c0_41 = arith.constant 0 : index
    %c0_42 = arith.constant 0 : index
    %75 = vector.load %arg6[%c0_41, %c0_42] : memref<2x64xf32, #tpu.memory_space<vmem>>, vector<2x64xf32>
    tpu.vector_store %arg6[%c0_41, %c0_42], %74 {strides = array<i32>} : memref<2x64xf32, #tpu.memory_space<vmem>>, vector<2x64xf32>,
    %cst_43 = arith.constant 0.000000e+00 : f32
    %76 = vector.broadcast %cst_43 : f32 to vector<2x64xf32>
    %77 = arith.select %71, %69, %76 : vector<2x64xi1>, vector<2x64xf32>
    %c0_44 = arith.constant 0 : index
    %78 = arith.index_cast %c1_i32 : i32 to index
    %c0_45 = arith.constant 0 : index
    %c0_46 = arith.constant 0 : index
    %79 = vector.load %arg4[%c0_44, %78, %c0_45, %c0_46] : memref<1x8x2x64xf32, #tpu.memory_space<vmem>>, vector<1x1x2x64xf32>
    %80 = vector.shape_cast %79 : vector<1x1x2x64xf32> to vector<2x64xf32>
    %81 = vector.shape_cast %77 : vector<2x64xf32> to vector<1x1x2x64xf32>
    tpu.vector_store %arg4[%c0_44, %78, %c0_45, %c0_46], %81 {strides = array<i32>} : memref<1x8x2x64xf32, #tpu.memory_space<vmem>>, vector<1x1x2x64xf32>,
    %c2_i32 = arith.constant 2 : i32
    %c0_47 = arith.constant 0 : index
    %82 = arith.index_cast %c2_i32 : i32 to index
    %c0_48 = arith.constant 0 : index
    %c0_49 = arith.constant 0 : index
    %83 = vector.load %arg1[%c0_47, %82, %c0_48, %c0_49] : memref<1x8x2x256xf32, #tpu.memory_space<vmem>>, vector<1x1x2x256xf32>
    %84 = vector.shape_cast %83 : vector<1x1x2x256xf32> to vector<2x256xf32>
    %85 = arith.index_cast %c2_i32 : i32 to index
    %c0_50 = arith.constant 0 : index
    %c0_51 = arith.constant 0 : index
    %86 = vector.load %arg3[%85, %c0_50, %c0_51] : memref<8x2x64xf32, #tpu.memory_space<vmem>>, vector<1x2x64xf32>
    %87 = vector.shape_cast %86 : vector<1x2x64xf32> to vector<2x64xf32>
    %c0_52 = arith.constant 0 : index
    %c0_53 = arith.constant 0 : index
    %88 = vector.load %arg5[%c0_52, %c0_53] : memref<2x64xf32, #tpu.memory_space<vmem>>, vector<2x64xf32>
    %c0_54 = arith.constant 0 : index
    %c0_55 = arith.constant 0 : index
    %89 = vector.load %arg6[%c0_54, %c0_55] : memref<2x64xf32, #tpu.memory_space<vmem>>, vector<2x64xf32>
    %cst_56 = arith.constant dense<0.000000e+00> : vector<2x256xf32>
    %90 = tpu.matmul %88, %5, %cst_56 {dimension_numbers = #tpu.dot_dimension_numbers<[1], [0], [0], [1], [0, 0, 1, 1], [], []>} : vector<2x64xf32>, vector<64x256xf32>, vector<2x256xf32> -> vector<2x256xf32>
    %91 = arith.addf %84, %90 : vector<2x256xf32>
    %92 = vector.extract_strided_slice %91 {offsets = [0, 0], sizes = [2, 192], strides = [1, 1]} : vector<2x256xf32> to vector<2x192xf32>
    %93 = arith.negf %92 : vector<2x192xf32>
    %94 = math.exp %93 : vector<2x192xf32>
    %cst_57 = arith.constant 1.000000e+00 : f32
    %95 = vector.broadcast %cst_57 : f32 to vector<2x192xf32>
    %96 = arith.addf %95, %94 : vector<2x192xf32>
    %97 = arith.divf %95, %96 : vector<2x192xf32>
    %98 = vector.extract_strided_slice %91 {offsets = [0, 192], sizes = [2, 64], strides = [1, 1]} : vector<2x256xf32> to vector<2x64xf32>
    %99 = math.tanh %98 : vector<2x64xf32>
    %100 = vector.extract_strided_slice %97 {offsets = [0, 0], sizes = [2, 64], strides = [1, 1]} : vector<2x192xf32> to vector<2x64xf32>
    %101 = vector.extract_strided_slice %97 {offsets = [0, 64], sizes = [2, 64], strides = [1, 1]} : vector<2x192xf32> to vector<2x64xf32>
    %102 = vector.extract_strided_slice %97 {offsets = [0, 128], sizes = [2, 64], strides = [1, 1]} : vector<2x192xf32> to vector<2x64xf32>
    %103 = arith.mulf %101, %89 : vector<2x64xf32>
    %104 = arith.mulf %100, %99 : vector<2x64xf32>
    %105 = arith.addf %103, %104 : vector<2x64xf32>
    %106 = math.tanh %105 : vector<2x64xf32>
    %107 = arith.mulf %102, %106 : vector<2x64xf32>
    %cst_58 = arith.constant 5.000000e-01 : f32
    %108 = vector.broadcast %cst_58 : f32 to vector<2x64xf32>
    %109 = arith.cmpf ogt, %87, %108 : vector<2x64xf32>
    %110 = arith.select %109, %107, %88 : vector<2x64xi1>, vector<2x64xf32>
    %c0_59 = arith.constant 0 : index
    %c0_60 = arith.constant 0 : index
    %111 = vector.load %arg5[%c0_59, %c0_60] : memref<2x64xf32, #tpu.memory_space<vmem>>, vector<2x64xf32>
    tpu.vector_store %arg5[%c0_59, %c0_60], %110 {strides = array<i32>} : memref<2x64xf32, #tpu.memory_space<vmem>>, vector<2x64xf32>,
    %112 = arith.select %109, %105, %89 : vector<2x64xi1>, vector<2x64xf32>
    %c0_61 = arith.constant 0 : index
    %c0_62 = arith.constant 0 : index
    %113 = vector.load %arg6[%c0_61, %c0_62] : memref<2x64xf32, #tpu.memory_space<vmem>>, vector<2x64xf32>
    tpu.vector_store %arg6[%c0_61, %c0_62], %112 {strides = array<i32>} : memref<2x64xf32, #tpu.memory_space<vmem>>, vector<2x64xf32>,
    %cst_63 = arith.constant 0.000000e+00 : f32
    %114 = vector.broadcast %cst_63 : f32 to vector<2x64xf32>
    %115 = arith.select %109, %107, %114 : vector<2x64xi1>, vector<2x64xf32>
    %c0_64 = arith.constant 0 : index
    %116 = arith.index_cast %c2_i32 : i32 to index
    %c0_65 = arith.constant 0 : index
    %c0_66 = arith.constant 0 : index
    %117 = vector.load %arg4[%c0_64, %116, %c0_65, %c0_66] : memref<1x8x2x64xf32, #tpu.memory_space<vmem>>, vector<1x1x2x64xf32>
    %118 = vector.shape_cast %117 : vector<1x1x2x64xf32> to vector<2x64xf32>
    %119 = vector.shape_cast %115 : vector<2x64xf32> to vector<1x1x2x64xf32>
    tpu.vector_store %arg4[%c0_64, %116, %c0_65, %c0_66], %119 {strides = array<i32>} : memref<1x8x2x64xf32, #tpu.memory_space<vmem>>, vector<1x1x2x64xf32>,
    %c3_i32 = arith.constant 3 : i32
    %c0_67 = arith.constant 0 : index
    %120 = arith.index_cast %c3_i32 : i32 to index
    %c0_68 = arith.constant 0 : index
    %c0_69 = arith.constant 0 : index
    %121 = vector.load %arg1[%c0_67, %120, %c0_68, %c0_69] : memref<1x8x2x256xf32, #tpu.memory_space<vmem>>, vector<1x1x2x256xf32>
    %122 = vector.shape_cast %121 : vector<1x1x2x256xf32> to vector<2x256xf32>
    %123 = arith.index_cast %c3_i32 : i32 to index
    %c0_70 = arith.constant 0 : index
    %c0_71 = arith.constant 0 : index
    %124 = vector.load %arg3[%123, %c0_70, %c0_71] : memref<8x2x64xf32, #tpu.memory_space<vmem>>, vector<1x2x64xf32>
    %125 = vector.shape_cast %124 : vector<1x2x64xf32> to vector<2x64xf32>
    %c0_72 = arith.constant 0 : index
    %c0_73 = arith.constant 0 : index
    %126 = vector.load %arg5[%c0_72, %c0_73] : memref<2x64xf32, #tpu.memory_space<vmem>>, vector<2x64xf32>
    %c0_74 = arith.constant 0 : index
    %c0_75 = arith.constant 0 : index
    %127 = vector.load %arg6[%c0_74, %c0_75] : memref<2x64xf32, #tpu.memory_space<vmem>>, vector<2x64xf32>
    %cst_76 = arith.constant dense<0.000000e+00> : vector<2x256xf32>
    %128 = tpu.matmul %126, %5, %cst_76 {dimension_numbers = #tpu.dot_dimension_numbers<[1], [0], [0], [1], [0, 0, 1, 1], [], []>} : vector<2x64xf32>, vector<64x256xf32>, vector<2x256xf32> -> vector<2x256xf32>
    %129 = arith.addf %122, %128 : vector<2x256xf32>
    %130 = vector.extract_strided_slice %129 {offsets = [0, 0], sizes = [2, 192], strides = [1, 1]} : vector<2x256xf32> to vector<2x192xf32>
    %131 = arith.negf %130 : vector<2x192xf32>
    %132 = math.exp %131 : vector<2x192xf32>
    %cst_77 = arith.constant 1.000000e+00 : f32
    %133 = vector.broadcast %cst_77 : f32 to vector<2x192xf32>
    %134 = arith.addf %133, %132 : vector<2x192xf32>
    %135 = arith.divf %133, %134 : vector<2x192xf32>
    %136 = vector.extract_strided_slice %129 {offsets = [0, 192], sizes = [2, 64], strides = [1, 1]} : vector<2x256xf32> to vector<2x64xf32>
    %137 = math.tanh %136 : vector<2x64xf32>
    %138 = vector.extract_strided_slice %135 {offsets = [0, 0], sizes = [2, 64], strides = [1, 1]} : vector<2x192xf32> to vector<2x64xf32>
    %139 = vector.extract_strided_slice %135 {offsets = [0, 64], sizes = [2, 64], strides = [1, 1]} : vector<2x192xf32> to vector<2x64xf32>
    %140 = vector.extract_strided_slice %135 {offsets = [0, 128], sizes = [2, 64], strides = [1, 1]} : vector<2x192xf32> to vector<2x64xf32>
    %141 = arith.mulf %139, %127 : vector<2x64xf32>
    %142 = arith.mulf %138, %137 : vector<2x64xf32>
    %143 = arith.addf %141, %142 : vector<2x64xf32>
    %144 = math.tanh %143 : vector<2x64xf32>
    %145 = arith.mulf %140, %144 : vector<2x64xf32>
    %cst_78 = arith.constant 5.000000e-01 : f32
    %146 = vector.broadcast %cst_78 : f32 to vector<2x64xf32>
    %147 = arith.cmpf ogt, %125, %146 : vector<2x64xf32>
    %148 = arith.select %147, %145, %126 : vector<2x64xi1>, vector<2x64xf32>
    %c0_79 = arith.constant 0 : index
    %c0_80 = arith.constant 0 : index
    %149 = vector.load %arg5[%c0_79, %c0_80] : memref<2x64xf32, #tpu.memory_space<vmem>>, vector<2x64xf32>
    tpu.vector_store %arg5[%c0_79, %c0_80], %148 {strides = array<i32>} : memref<2x64xf32, #tpu.memory_space<vmem>>, vector<2x64xf32>,
    %150 = arith.select %147, %143, %127 : vector<2x64xi1>, vector<2x64xf32>
    %c0_81 = arith.constant 0 : index
    %c0_82 = arith.constant 0 : index
    %151 = vector.load %arg6[%c0_81, %c0_82] : memref<2x64xf32, #tpu.memory_space<vmem>>, vector<2x64xf32>
    tpu.vector_store %arg6[%c0_81, %c0_82], %150 {strides = array<i32>} : memref<2x64xf32, #tpu.memory_space<vmem>>, vector<2x64xf32>,
    %cst_83 = arith.constant 0.000000e+00 : f32
    %152 = vector.broadcast %cst_83 : f32 to vector<2x64xf32>
    %153 = arith.select %147, %145, %152 : vector<2x64xi1>, vector<2x64xf32>
    %c0_84 = arith.constant 0 : index
    %154 = arith.index_cast %c3_i32 : i32 to index
    %c0_85 = arith.constant 0 : index
    %c0_86 = arith.constant 0 : index
    %155 = vector.load %arg4[%c0_84, %154, %c0_85, %c0_86] : memref<1x8x2x64xf32, #tpu.memory_space<vmem>>, vector<1x1x2x64xf32>
    %156 = vector.shape_cast %155 : vector<1x1x2x64xf32> to vector<2x64xf32>
    %157 = vector.shape_cast %153 : vector<2x64xf32> to vector<1x1x2x64xf32>
    tpu.vector_store %arg4[%c0_84, %154, %c0_85, %c0_86], %157 {strides = array<i32>} : memref<1x8x2x64xf32, #tpu.memory_space<vmem>>, vector<1x1x2x64xf32>,
    %c4_i32 = arith.constant 4 : i32
    %c0_87 = arith.constant 0 : index
    %158 = arith.index_cast %c4_i32 : i32 to index
    %c0_88 = arith.constant 0 : index
    %c0_89 = arith.constant 0 : index
    %159 = vector.load %arg1[%c0_87, %158, %c0_88, %c0_89] : memref<1x8x2x256xf32, #tpu.memory_space<vmem>>, vector<1x1x2x256xf32>
    %160 = vector.shape_cast %159 : vector<1x1x2x256xf32> to vector<2x256xf32>
    %161 = arith.index_cast %c4_i32 : i32 to index
    %c0_90 = arith.constant 0 : index
    %c0_91 = arith.constant 0 : index
    %162 = vector.load %arg3[%161, %c0_90, %c0_91] : memref<8x2x64xf32, #tpu.memory_space<vmem>>, vector<1x2x64xf32>
    %163 = vector.shape_cast %162 : vector<1x2x64xf32> to vector<2x64xf32>
    %c0_92 = arith.constant 0 : index
    %c0_93 = arith.constant 0 : index
    %164 = vector.load %arg5[%c0_92, %c0_93] : memref<2x64xf32, #tpu.memory_space<vmem>>, vector<2x64xf32>
    %c0_94 = arith.constant 0 : index
    %c0_95 = arith.constant 0 : index
    %165 = vector.load %arg6[%c0_94, %c0_95] : memref<2x64xf32, #tpu.memory_space<vmem>>, vector<2x64xf32>
    %cst_96 = arith.constant dense<0.000000e+00> : vector<2x256xf32>
    %166 = tpu.matmul %164, %5, %cst_96 {dimension_numbers = #tpu.dot_dimension_numbers<[1], [0], [0], [1], [0, 0, 1, 1], [], []>} : vector<2x64xf32>, vector<64x256xf32>, vector<2x256xf32> -> vector<2x256xf32>
    %167 = arith.addf %160, %166 : vector<2x256xf32>
    %168 = vector.extract_strided_slice %167 {offsets = [0, 0], sizes = [2, 192], strides = [1, 1]} : vector<2x256xf32> to vector<2x192xf32>
    %169 = arith.negf %168 : vector<2x192xf32>
    %170 = math.exp %169 : vector<2x192xf32>
    %cst_97 = arith.constant 1.000000e+00 : f32
    %171 = vector.broadcast %cst_97 : f32 to vector<2x192xf32>
    %172 = arith.addf %171, %170 : vector<2x192xf32>
    %173 = arith.divf %171, %172 : vector<2x192xf32>
    %174 = vector.extract_strided_slice %167 {offsets = [0, 192], sizes = [2, 64], strides = [1, 1]} : vector<2x256xf32> to vector<2x64xf32>
    %175 = math.tanh %174 : vector<2x64xf32>
    %176 = vector.extract_strided_slice %173 {offsets = [0, 0], sizes = [2, 64], strides = [1, 1]} : vector<2x192xf32> to vector<2x64xf32>
    %177 = vector.extract_strided_slice %173 {offsets = [0, 64], sizes = [2, 64], strides = [1, 1]} : vector<2x192xf32> to vector<2x64xf32>
    %178 = vector.extract_strided_slice %173 {offsets = [0, 128], sizes = [2, 64], strides = [1, 1]} : vector<2x192xf32> to vector<2x64xf32>
    %179 = arith.mulf %177, %165 : vector<2x64xf32>
    %180 = arith.mulf %176, %175 : vector<2x64xf32>
    %181 = arith.addf %179, %180 : vector<2x64xf32>
    %182 = math.tanh %181 : vector<2x64xf32>
    %183 = arith.mulf %178, %182 : vector<2x64xf32>
    %cst_98 = arith.constant 5.000000e-01 : f32
    %184 = vector.broadcast %cst_98 : f32 to vector<2x64xf32>
    %185 = arith.cmpf ogt, %163, %184 : vector<2x64xf32>
    %186 = arith.select %185, %183, %164 : vector<2x64xi1>, vector<2x64xf32>
    %c0_99 = arith.constant 0 : index
    %c0_100 = arith.constant 0 : index
    %187 = vector.load %arg5[%c0_99, %c0_100] : memref<2x64xf32, #tpu.memory_space<vmem>>, vector<2x64xf32>
    tpu.vector_store %arg5[%c0_99, %c0_100], %186 {strides = array<i32>} : memref<2x64xf32, #tpu.memory_space<vmem>>, vector<2x64xf32>,
    %188 = arith.select %185, %181, %165 : vector<2x64xi1>, vector<2x64xf32>
    %c0_101 = arith.constant 0 : index
    %c0_102 = arith.constant 0 : index
    %189 = vector.load %arg6[%c0_101, %c0_102] : memref<2x64xf32, #tpu.memory_space<vmem>>, vector<2x64xf32>
    tpu.vector_store %arg6[%c0_101, %c0_102], %188 {strides = array<i32>} : memref<2x64xf32, #tpu.memory_space<vmem>>, vector<2x64xf32>,
    %cst_103 = arith.constant 0.000000e+00 : f32
    %190 = vector.broadcast %cst_103 : f32 to vector<2x64xf32>
    %191 = arith.select %185, %183, %190 : vector<2x64xi1>, vector<2x64xf32>
    %c0_104 = arith.constant 0 : index
    %192 = arith.index_cast %c4_i32 : i32 to index
    %c0_105 = arith.constant 0 : index
    %c0_106 = arith.constant 0 : index
    %193 = vector.load %arg4[%c0_104, %192, %c0_105, %c0_106] : memref<1x8x2x64xf32, #tpu.memory_space<vmem>>, vector<1x1x2x64xf32>
    %194 = vector.shape_cast %193 : vector<1x1x2x64xf32> to vector<2x64xf32>
    %195 = vector.shape_cast %191 : vector<2x64xf32> to vector<1x1x2x64xf32>
    tpu.vector_store %arg4[%c0_104, %192, %c0_105, %c0_106], %195 {strides = array<i32>} : memref<1x8x2x64xf32, #tpu.memory_space<vmem>>, vector<1x1x2x64xf32>,
    %c5_i32 = arith.constant 5 : i32
    %c0_107 = arith.constant 0 : index
    %196 = arith.index_cast %c5_i32 : i32 to index
    %c0_108 = arith.constant 0 : index
    %c0_109 = arith.constant 0 : index
    %197 = vector.load %arg1[%c0_107, %196, %c0_108, %c0_109] : memref<1x8x2x256xf32, #tpu.memory_space<vmem>>, vector<1x1x2x256xf32>
    %198 = vector.shape_cast %197 : vector<1x1x2x256xf32> to vector<2x256xf32>
    %199 = arith.index_cast %c5_i32 : i32 to index
    %c0_110 = arith.constant 0 : index
    %c0_111 = arith.constant 0 : index
    %200 = vector.load %arg3[%199, %c0_110, %c0_111] : memref<8x2x64xf32, #tpu.memory_space<vmem>>, vector<1x2x64xf32>
    %201 = vector.shape_cast %200 : vector<1x2x64xf32> to vector<2x64xf32>
    %c0_112 = arith.constant 0 : index
    %c0_113 = arith.constant 0 : index
    %202 = vector.load %arg5[%c0_112, %c0_113] : memref<2x64xf32, #tpu.memory_space<vmem>>, vector<2x64xf32>
    %c0_114 = arith.constant 0 : index
    %c0_115 = arith.constant 0 : index
    %203 = vector.load %arg6[%c0_114, %c0_115] : memref<2x64xf32, #tpu.memory_space<vmem>>, vector<2x64xf32>
    %cst_116 = arith.constant dense<0.000000e+00> : vector<2x256xf32>
    %204 = tpu.matmul %202, %5, %cst_116 {dimension_numbers = #tpu.dot_dimension_numbers<[1], [0], [0], [1], [0, 0, 1, 1], [], []>} : vector<2x64xf32>, vector<64x256xf32>, vector<2x256xf32> -> vector<2x256xf32>
    %205 = arith.addf %198, %204 : vector<2x256xf32>
    %206 = vector.extract_strided_slice %205 {offsets = [0, 0], sizes = [2, 192], strides = [1, 1]} : vector<2x256xf32> to vector<2x192xf32>
    %207 = arith.negf %206 : vector<2x192xf32>
    %208 = math.exp %207 : vector<2x192xf32>
    %cst_117 = arith.constant 1.000000e+00 : f32
    %209 = vector.broadcast %cst_117 : f32 to vector<2x192xf32>
    %210 = arith.addf %209, %208 : vector<2x192xf32>
    %211 = arith.divf %209, %210 : vector<2x192xf32>
    %212 = vector.extract_strided_slice %205 {offsets = [0, 192], sizes = [2, 64], strides = [1, 1]} : vector<2x256xf32> to vector<2x64xf32>
    %213 = math.tanh %212 : vector<2x64xf32>
    %214 = vector.extract_strided_slice %211 {offsets = [0, 0], sizes = [2, 64], strides = [1, 1]} : vector<2x192xf32> to vector<2x64xf32>
    %215 = vector.extract_strided_slice %211 {offsets = [0, 64], sizes = [2, 64], strides = [1, 1]} : vector<2x192xf32> to vector<2x64xf32>
    %216 = vector.extract_strided_slice %211 {offsets = [0, 128], sizes = [2, 64], strides = [1, 1]} : vector<2x192xf32> to vector<2x64xf32>
    %217 = arith.mulf %215, %203 : vector<2x64xf32>
    %218 = arith.mulf %214, %213 : vector<2x64xf32>
    %219 = arith.addf %217, %218 : vector<2x64xf32>
    %220 = math.tanh %219 : vector<2x64xf32>
    %221 = arith.mulf %216, %220 : vector<2x64xf32>
    %cst_118 = arith.constant 5.000000e-01 : f32
    %222 = vector.broadcast %cst_118 : f32 to vector<2x64xf32>
    %223 = arith.cmpf ogt, %201, %222 : vector<2x64xf32>
    %224 = arith.select %223, %221, %202 : vector<2x64xi1>, vector<2x64xf32>
    %c0_119 = arith.constant 0 : index
    %c0_120 = arith.constant 0 : index
    %225 = vector.load %arg5[%c0_119, %c0_120] : memref<2x64xf32, #tpu.memory_space<vmem>>, vector<2x64xf32>
    tpu.vector_store %arg5[%c0_119, %c0_120], %224 {strides = array<i32>} : memref<2x64xf32, #tpu.memory_space<vmem>>, vector<2x64xf32>,
    %226 = arith.select %223, %219, %203 : vector<2x64xi1>, vector<2x64xf32>
    %c0_121 = arith.constant 0 : index
    %c0_122 = arith.constant 0 : index
    %227 = vector.load %arg6[%c0_121, %c0_122] : memref<2x64xf32, #tpu.memory_space<vmem>>, vector<2x64xf32>
    tpu.vector_store %arg6[%c0_121, %c0_122], %226 {strides = array<i32>} : memref<2x64xf32, #tpu.memory_space<vmem>>, vector<2x64xf32>,
    %cst_123 = arith.constant 0.000000e+00 : f32
    %228 = vector.broadcast %cst_123 : f32 to vector<2x64xf32>
    %229 = arith.select %223, %221, %228 : vector<2x64xi1>, vector<2x64xf32>
    %c0_124 = arith.constant 0 : index
    %230 = arith.index_cast %c5_i32 : i32 to index
    %c0_125 = arith.constant 0 : index
    %c0_126 = arith.constant 0 : index
    %231 = vector.load %arg4[%c0_124, %230, %c0_125, %c0_126] : memref<1x8x2x64xf32, #tpu.memory_space<vmem>>, vector<1x1x2x64xf32>
    %232 = vector.shape_cast %231 : vector<1x1x2x64xf32> to vector<2x64xf32>
    %233 = vector.shape_cast %229 : vector<2x64xf32> to vector<1x1x2x64xf32>
    tpu.vector_store %arg4[%c0_124, %230, %c0_125, %c0_126], %233 {strides = array<i32>} : memref<1x8x2x64xf32, #tpu.memory_space<vmem>>, vector<1x1x2x64xf32>,
    %c6_i32 = arith.constant 6 : i32
    %c0_127 = arith.constant 0 : index
    %234 = arith.index_cast %c6_i32 : i32 to index
    %c0_128 = arith.constant 0 : index
    %c0_129 = arith.constant 0 : index
    %235 = vector.load %arg1[%c0_127, %234, %c0_128, %c0_129] : memref<1x8x2x256xf32, #tpu.memory_space<vmem>>, vector<1x1x2x256xf32>
    %236 = vector.shape_cast %235 : vector<1x1x2x256xf32> to vector<2x256xf32>
    %237 = arith.index_cast %c6_i32 : i32 to index
    %c0_130 = arith.constant 0 : index
    %c0_131 = arith.constant 0 : index
    %238 = vector.load %arg3[%237, %c0_130, %c0_131] : memref<8x2x64xf32, #tpu.memory_space<vmem>>, vector<1x2x64xf32>
    %239 = vector.shape_cast %238 : vector<1x2x64xf32> to vector<2x64xf32>
    %c0_132 = arith.constant 0 : index
    %c0_133 = arith.constant 0 : index
    %240 = vector.load %arg5[%c0_132, %c0_133] : memref<2x64xf32, #tpu.memory_space<vmem>>, vector<2x64xf32>
    %c0_134 = arith.constant 0 : index
    %c0_135 = arith.constant 0 : index
    %241 = vector.load %arg6[%c0_134, %c0_135] : memref<2x64xf32, #tpu.memory_space<vmem>>, vector<2x64xf32>
    %cst_136 = arith.constant dense<0.000000e+00> : vector<2x256xf32>
    %242 = tpu.matmul %240, %5, %cst_136 {dimension_numbers = #tpu.dot_dimension_numbers<[1], [0], [0], [1], [0, 0, 1, 1], [], []>} : vector<2x64xf32>, vector<64x256xf32>, vector<2x256xf32> -> vector<2x256xf32>
    %243 = arith.addf %236, %242 : vector<2x256xf32>
    %244 = vector.extract_strided_slice %243 {offsets = [0, 0], sizes = [2, 192], strides = [1, 1]} : vector<2x256xf32> to vector<2x192xf32>
    %245 = arith.negf %244 : vector<2x192xf32>
    %246 = math.exp %245 : vector<2x192xf32>
    %cst_137 = arith.constant 1.000000e+00 : f32
    %247 = vector.broadcast %cst_137 : f32 to vector<2x192xf32>
    %248 = arith.addf %247, %246 : vector<2x192xf32>
    %249 = arith.divf %247, %248 : vector<2x192xf32>
    %250 = vector.extract_strided_slice %243 {offsets = [0, 192], sizes = [2, 64], strides = [1, 1]} : vector<2x256xf32> to vector<2x64xf32>
    %251 = math.tanh %250 : vector<2x64xf32>
    %252 = vector.extract_strided_slice %249 {offsets = [0, 0], sizes = [2, 64], strides = [1, 1]} : vector<2x192xf32> to vector<2x64xf32>
    %253 = vector.extract_strided_slice %249 {offsets = [0, 64], sizes = [2, 64], strides = [1, 1]} : vector<2x192xf32> to vector<2x64xf32>
    %254 = vector.extract_strided_slice %249 {offsets = [0, 128], sizes = [2, 64], strides = [1, 1]} : vector<2x192xf32> to vector<2x64xf32>
    %255 = arith.mulf %253, %241 : vector<2x64xf32>
    %256 = arith.mulf %252, %251 : vector<2x64xf32>
    %257 = arith.addf %255, %256 : vector<2x64xf32>
    %258 = math.tanh %257 : vector<2x64xf32>
    %259 = arith.mulf %254, %258 : vector<2x64xf32>
    %cst_138 = arith.constant 5.000000e-01 : f32
    %260 = vector.broadcast %cst_138 : f32 to vector<2x64xf32>
    %261 = arith.cmpf ogt, %239, %260 : vector<2x64xf32>
    %262 = arith.select %261, %259, %240 : vector<2x64xi1>, vector<2x64xf32>
    %c0_139 = arith.constant 0 : index
    %c0_140 = arith.constant 0 : index
    %263 = vector.load %arg5[%c0_139, %c0_140] : memref<2x64xf32, #tpu.memory_space<vmem>>, vector<2x64xf32>
    tpu.vector_store %arg5[%c0_139, %c0_140], %262 {strides = array<i32>} : memref<2x64xf32, #tpu.memory_space<vmem>>, vector<2x64xf32>,
    %264 = arith.select %261, %257, %241 : vector<2x64xi1>, vector<2x64xf32>
    %c0_141 = arith.constant 0 : index
    %c0_142 = arith.constant 0 : index
    %265 = vector.load %arg6[%c0_141, %c0_142] : memref<2x64xf32, #tpu.memory_space<vmem>>, vector<2x64xf32>
    tpu.vector_store %arg6[%c0_141, %c0_142], %264 {strides = array<i32>} : memref<2x64xf32, #tpu.memory_space<vmem>>, vector<2x64xf32>,
    %cst_143 = arith.constant 0.000000e+00 : f32
    %266 = vector.broadcast %cst_143 : f32 to vector<2x64xf32>
    %267 = arith.select %261, %259, %266 : vector<2x64xi1>, vector<2x64xf32>
    %c0_144 = arith.constant 0 : index
    %268 = arith.index_cast %c6_i32 : i32 to index
    %c0_145 = arith.constant 0 : index
    %c0_146 = arith.constant 0 : index
    %269 = vector.load %arg4[%c0_144, %268, %c0_145, %c0_146] : memref<1x8x2x64xf32, #tpu.memory_space<vmem>>, vector<1x1x2x64xf32>
    %270 = vector.shape_cast %269 : vector<1x1x2x64xf32> to vector<2x64xf32>
    %271 = vector.shape_cast %267 : vector<2x64xf32> to vector<1x1x2x64xf32>
    tpu.vector_store %arg4[%c0_144, %268, %c0_145, %c0_146], %271 {strides = array<i32>} : memref<1x8x2x64xf32, #tpu.memory_space<vmem>>, vector<1x1x2x64xf32>,
    %c7_i32 = arith.constant 7 : i32
    %c0_147 = arith.constant 0 : index
    %272 = arith.index_cast %c7_i32 : i32 to index
    %c0_148 = arith.constant 0 : index
    %c0_149 = arith.constant 0 : index
    %273 = vector.load %arg1[%c0_147, %272, %c0_148, %c0_149] : memref<1x8x2x256xf32, #tpu.memory_space<vmem>>, vector<1x1x2x256xf32>
    %274 = vector.shape_cast %273 : vector<1x1x2x256xf32> to vector<2x256xf32>
    %275 = arith.index_cast %c7_i32 : i32 to index
    %c0_150 = arith.constant 0 : index
    %c0_151 = arith.constant 0 : index
    %276 = vector.load %arg3[%275, %c0_150, %c0_151] : memref<8x2x64xf32, #tpu.memory_space<vmem>>, vector<1x2x64xf32>
    %277 = vector.shape_cast %276 : vector<1x2x64xf32> to vector<2x64xf32>
    %c0_152 = arith.constant 0 : index
    %c0_153 = arith.constant 0 : index
    %278 = vector.load %arg5[%c0_152, %c0_153] : memref<2x64xf32, #tpu.memory_space<vmem>>, vector<2x64xf32>
    %c0_154 = arith.constant 0 : index
    %c0_155 = arith.constant 0 : index
    %279 = vector.load %arg6[%c0_154, %c0_155] : memref<2x64xf32, #tpu.memory_space<vmem>>, vector<2x64xf32>
    %cst_156 = arith.constant dense<0.000000e+00> : vector<2x256xf32>
    %280 = tpu.matmul %278, %5, %cst_156 {dimension_numbers = #tpu.dot_dimension_numbers<[1], [0], [0], [1], [0, 0, 1, 1], [], []>} : vector<2x64xf32>, vector<64x256xf32>, vector<2x256xf32> -> vector<2x256xf32>
    %281 = arith.addf %274, %280 : vector<2x256xf32>
    %282 = vector.extract_strided_slice %281 {offsets = [0, 0], sizes = [2, 192], strides = [1, 1]} : vector<2x256xf32> to vector<2x192xf32>
    %283 = arith.negf %282 : vector<2x192xf32>
    %284 = math.exp %283 : vector<2x192xf32>
    %cst_157 = arith.constant 1.000000e+00 : f32
    %285 = vector.broadcast %cst_157 : f32 to vector<2x192xf32>
    %286 = arith.addf %285, %284 : vector<2x192xf32>
    %287 = arith.divf %285, %286 : vector<2x192xf32>
    %288 = vector.extract_strided_slice %281 {offsets = [0, 192], sizes = [2, 64], strides = [1, 1]} : vector<2x256xf32> to vector<2x64xf32>
    %289 = math.tanh %288 : vector<2x64xf32>
    %290 = vector.extract_strided_slice %287 {offsets = [0, 0], sizes = [2, 64], strides = [1, 1]} : vector<2x192xf32> to vector<2x64xf32>
    %291 = vector.extract_strided_slice %287 {offsets = [0, 64], sizes = [2, 64], strides = [1, 1]} : vector<2x192xf32> to vector<2x64xf32>
    %292 = vector.extract_strided_slice %287 {offsets = [0, 128], sizes = [2, 64], strides = [1, 1]} : vector<2x192xf32> to vector<2x64xf32>
    %293 = arith.mulf %291, %279 : vector<2x64xf32>
    %294 = arith.mulf %290, %289 : vector<2x64xf32>
    %295 = arith.addf %293, %294 : vector<2x64xf32>
    %296 = math.tanh %295 : vector<2x64xf32>
    %297 = arith.mulf %292, %296 : vector<2x64xf32>
    %cst_158 = arith.constant 5.000000e-01 : f32
    %298 = vector.broadcast %cst_158 : f32 to vector<2x64xf32>
    %299 = arith.cmpf ogt, %277, %298 : vector<2x64xf32>
    %300 = arith.select %299, %297, %278 : vector<2x64xi1>, vector<2x64xf32>
    %c0_159 = arith.constant 0 : index
    %c0_160 = arith.constant 0 : index
    %301 = vector.load %arg5[%c0_159, %c0_160] : memref<2x64xf32, #tpu.memory_space<vmem>>, vector<2x64xf32>
    tpu.vector_store %arg5[%c0_159, %c0_160], %300 {strides = array<i32>} : memref<2x64xf32, #tpu.memory_space<vmem>>, vector<2x64xf32>,
    %302 = arith.select %299, %295, %279 : vector<2x64xi1>, vector<2x64xf32>
    %c0_161 = arith.constant 0 : index
    %c0_162 = arith.constant 0 : index
    %303 = vector.load %arg6[%c0_161, %c0_162] : memref<2x64xf32, #tpu.memory_space<vmem>>, vector<2x64xf32>
    tpu.vector_store %arg6[%c0_161, %c0_162], %302 {strides = array<i32>} : memref<2x64xf32, #tpu.memory_space<vmem>>, vector<2x64xf32>,
    %cst_163 = arith.constant 0.000000e+00 : f32
    %304 = vector.broadcast %cst_163 : f32 to vector<2x64xf32>
    %305 = arith.select %299, %297, %304 : vector<2x64xi1>, vector<2x64xf32>
    %c0_164 = arith.constant 0 : index
    %306 = arith.index_cast %c7_i32 : i32 to index
    %c0_165 = arith.constant 0 : index
    %c0_166 = arith.constant 0 : index
    %307 = vector.load %arg4[%c0_164, %306, %c0_165, %c0_166] : memref<1x8x2x64xf32, #tpu.memory_space<vmem>>, vector<1x1x2x64xf32>
    %308 = vector.shape_cast %307 : vector<1x1x2x64xf32> to vector<2x64xf32>
    %309 = vector.shape_cast %305 : vector<2x64xf32> to vector<1x1x2x64xf32>
    tpu.vector_store %arg4[%c0_164, %306, %c0_165, %c0_166], %309 {strides = array<i32>} : memref<1x8x2x64xf32, #tpu.memory_space<vmem>>, vector<1x1x2x64xf32>,
    %c8_i32 = arith.constant 8 : i32
    return
  }
  func.func @transform_0(%arg0: i32) -> (i32, i32, i32, i32) {
    %c0_i32 = arith.constant 0 : i32
    %c0_i32_0 = arith.constant 0 : i32
    %c0_i32_1 = arith.constant 0 : i32
    %c0_i32_2 = arith.constant 0 : i32
    return %arg0, %c0_i32, %c0_i32_0, %c0_i32_1 : i32, i32, i32, i32
  }
  func.func @transform_1(%arg0: i32) -> (i32, i32, i32) {
    %c0_i32 = arith.constant 0 : i32
    %c0_i32_0 = arith.constant 0 : i32
    %c0_i32_1 = arith.constant 0 : i32
    return %arg0, %c0_i32, %c0_i32_0 : i32, i32, i32
  }
  func.func @transform_2(%arg0: i32) -> (i32, i32, i32) {
    %c0_i32 = arith.constant 0 : i32
    %c0_i32_0 = arith.constant 0 : i32
    %c0_i32_1 = arith.constant 0 : i32
    %c0_i32_2 = arith.constant 0 : i32
    return %c0_i32, %c0_i32_0, %c0_i32_1 : i32, i32, i32
  }
  func.func @transform_3(%arg0: i32) -> (i32, i32, i32, i32) {
    %c0_i32 = arith.constant 0 : i32
    %c0_i32_0 = arith.constant 0 : i32
    %c0_i32_1 = arith.constant 0 : i32
    %c0_i32_2 = arith.constant 0 : i32
    return %arg0, %c0_i32, %c0_i32_0, %c0_i32_1 : i32, i32, i32, i32
  }
}

module attributes {stable_mosaic.version = 11 : i64} {
  func.func @_self_attn_kernel(%arg0: i32, %arg1: memref<1x2x8x32xf32, #tpu.memory_space<vmem>>, %arg2: memref<1x32x96xf32, #tpu.memory_space<vmem>>, %arg3: memref<2x1x8xf32, #tpu.memory_space<vmem>>, %arg4: memref<1x2x8x32xf32, #tpu.memory_space<vmem>>) attributes {dimension_semantics = [#tpu.dimension_semantics<parallel>], iteration_bounds = array<i64: 3>, scalar_prefetch = 0 : i64, scratch_operands = 0 : i64, tpu.core_type = #tpu.core_type<tc>, window_params = [{transform_indices = @transform_0, window_bounds = array<i64: 1, 2, 8, 32>}, {transform_indices = @transform_1, window_bounds = array<i64: 1, 32, 96>}, {pipeline_mode = #tpu.pipeline_mode<synchronous>, transform_indices = @transform_2, window_bounds = array<i64: 2, 1, 8>}, {transform_indices = @transform_3, window_bounds = array<i64: 1, 2, 8, 32>}]} {
    %c0 = arith.constant 0 : index
    %c0_0 = arith.constant 0 : index
    %c0_1 = arith.constant 0 : index
    %c0_2 = arith.constant 0 : index
    %0 = vector.load %arg1[%c0, %c0_0, %c0_1, %c0_2] : memref<1x2x8x32xf32, #tpu.memory_space<vmem>>, vector<1x2x8x32xf32>
    %1 = vector.shape_cast %0 : vector<1x2x8x32xf32> to vector<2x8x32xf32>
    %c0_3 = arith.constant 0 : index
    %c0_4 = arith.constant 0 : index
    %c0_5 = arith.constant 0 : index
    %2 = vector.load %arg2[%c0_3, %c0_4, %c0_5] : memref<1x32x96xf32, #tpu.memory_space<vmem>>, vector<1x32x96xf32>
    %3 = vector.shape_cast %2 : vector<1x32x96xf32> to vector<32x96xf32>
    "tpu.trace_start"() <{level = 10 : i32, message = "bld,da->bla"}> : () -> ()
    %cst = arith.constant dense<0.000000e+00> : vector<2x8x96xf32>
    %4 = tpu.matmul %1, %3, %cst {dimension_numbers = #tpu.dot_dimension_numbers<[2], [0], [0, 1], [1], [0, 0, 0, 1, 1, 1], [], []>} : vector<2x8x32xf32>, vector<32x96xf32>, vector<2x8x96xf32> -> vector<2x8x96xf32>
    "tpu.trace_stop"() : () -> ()
    %5 = vector.extract_strided_slice %4 {offsets = [0, 0, 0], sizes = [2, 8, 32], strides = [1, 1, 1]} : vector<2x8x96xf32> to vector<2x8x32xf32>
    %6 = vector.extract_strided_slice %4 {offsets = [0, 0, 32], sizes = [2, 8, 32], strides = [1, 1, 1]} : vector<2x8x96xf32> to vector<2x8x32xf32>
    %7 = vector.extract_strided_slice %4 {offsets = [0, 0, 64], sizes = [2, 8, 32], strides = [1, 1, 1]} : vector<2x8x96xf32> to vector<2x8x32xf32>
    "tpu.trace_start"() <{level = 10 : i32, message = "bqa,bka->bqk"}> : () -> ()
    %cst_6 = arith.constant dense<0.000000e+00> : vector<2x8x8xf32>
    %8 = tpu.matmul %6, %5, %cst_6 {dimension_numbers = #tpu.dot_dimension_numbers<[2], [2], [1], [1], [0, 0, 0, 1, 1, 1], [0], [0]>} : vector<2x8x32xf32>, vector<2x8x32xf32>, vector<2x8x8xf32> -> vector<2x8x8xf32>
    "tpu.trace_stop"() : () -> ()
    %cst_7 = arith.constant 0.176776692 : f32
    %9 = vector.broadcast %cst_7 : f32 to vector<2x8x8xf32>
    %10 = arith.mulf %8, %9 : vector<2x8x8xf32>
    %c0_8 = arith.constant 0 : index
    %c0_9 = arith.constant 0 : index
    %c0_10 = arith.constant 0 : index
    %11 = vector.load %arg3[%c0_8, %c0_9, %c0_10] : memref<2x1x8xf32, #tpu.memory_space<vmem>>, vector<2x1x8xf32>
    %12 = vector.broadcast %11 : vector<2x1x8xf32> to vector<2x8x8xf32>
    %13 = arith.addf %10, %12 : vector<2x8x8xf32>
    %cst_11 = arith.constant dense<0xFF800000> : vector<2x8xf32>
    %14 = vector.multi_reduction <maximumf>, %13, %cst_11 [2] : vector<2x8x8xf32> to vector<2x8xf32>
    %cst_12 = arith.constant 0xFF800000 : f32
    %15 = vector.broadcast %cst_12 : f32 to vector<2x8xf32>
    %16 = arith.maximumf %15, %14 : vector<2x8xf32>
    %17 = vector.shape_cast %16 : vector<2x8xf32> to vector<2x8x1xf32>
    %18 = vector.broadcast %17 : vector<2x8x1xf32> to vector<2x8x8xf32>
    %19 = arith.subf %13, %18 : vector<2x8x8xf32>
    %20 = math.exp %19 : vector<2x8x8xf32>
    %cst_13 = arith.constant dense<0.000000e+00> : vector<2x8xf32>
    %21 = vector.multi_reduction <add>, %20, %cst_13 [2] : vector<2x8x8xf32> to vector<2x8xf32>
    %22 = vector.shape_cast %21 : vector<2x8xf32> to vector<2x8x1xf32>
    %23 = vector.broadcast %22 : vector<2x8x1xf32> to vector<2x8x8xf32>
    %24 = arith.divf %20, %23 : vector<2x8x8xf32>
    "tpu.trace_start"() <{level = 10 : i32, message = "bqk,bka->bqa"}> : () -> ()
    %cst_14 = arith.constant dense<0.000000e+00> : vector<2x8x32xf32>
    %25 = tpu.matmul %24, %7, %cst_14 {dimension_numbers = #tpu.dot_dimension_numbers<[2], [1], [1], [2], [0, 0, 0, 1, 1, 2], [0], [0]>} : vector<2x8x8xf32>, vector<2x8x32xf32>, vector<2x8x32xf32> -> vector<2x8x32xf32>
    "tpu.trace_stop"() : () -> ()
    %c0_15 = arith.constant 0 : index
    %c0_16 = arith.constant 0 : index
    %c0_17 = arith.constant 0 : index
    %c0_18 = arith.constant 0 : index
    %26 = vector.load %arg4[%c0_15, %c0_16, %c0_17, %c0_18] : memref<1x2x8x32xf32, #tpu.memory_space<vmem>>, vector<1x2x8x32xf32>
    %27 = vector.shape_cast %26 : vector<1x2x8x32xf32> to vector<2x8x32xf32>
    %28 = vector.shape_cast %25 : vector<2x8x32xf32> to vector<1x2x8x32xf32>
    tpu.vector_store %arg4[%c0_15, %c0_16, %c0_17, %c0_18], %28 {strides = array<i32>} : memref<1x2x8x32xf32, #tpu.memory_space<vmem>>, vector<1x2x8x32xf32>,
    return
  }
  func.func @transform_0(%arg0: i32) -> (i32, i32, i32, i32) {
    %c0_i32 = arith.constant 0 : i32
    %c0_i32_0 = arith.constant 0 : i32
    %c0_i32_1 = arith.constant 0 : i32
    %c0_i32_2 = arith.constant 0 : i32
    return %arg0, %c0_i32, %c0_i32_0, %c0_i32_1 : i32, i32, i32, i32
  }
  func.func @transform_1(%arg0: i32) -> (i32, i32, i32) {
    %c0_i32 = arith.constant 0 : i32
    %c0_i32_0 = arith.constant 0 : i32
    %c0_i32_1 = arith.constant 0 : i32
    return %arg0, %c0_i32, %c0_i32_0 : i32, i32, i32
  }
  func.func @transform_2(%arg0: i32) -> (i32, i32, i32) {
    %c0_i32 = arith.constant 0 : i32
    %c0_i32_0 = arith.constant 0 : i32
    %c0_i32_1 = arith.constant 0 : i32
    %c0_i32_2 = arith.constant 0 : i32
    return %c0_i32, %c0_i32_0, %c0_i32_1 : i32, i32, i32
  }
  func.func @transform_3(%arg0: i32) -> (i32, i32, i32, i32) {
    %c0_i32 = arith.constant 0 : i32
    %c0_i32_0 = arith.constant 0 : i32
    %c0_i32_1 = arith.constant 0 : i32
    %c0_i32_2 = arith.constant 0 : i32
    return %arg0, %c0_i32, %c0_i32_0, %c0_i32_1 : i32, i32, i32, i32
  }
}

module attributes {stable_mosaic.version = 11 : i64} {
  func.func @_cross_attn_kernel(%arg0: i32, %arg1: memref<6xi32, #tpu.memory_space<smem>>, %arg2: memref<6xi32, #tpu.memory_space<smem>>, %arg3: memref<1x2x8x32xf32, #tpu.memory_space<vmem>>, %arg4: memref<1x2x8x32xf32, #tpu.memory_space<vmem>>, %arg5: memref<1x32x32xf32, #tpu.memory_space<vmem>>, %arg6: memref<1x32x64xf32, #tpu.memory_space<vmem>>, %arg7: memref<1x2x8x32xf32, #tpu.memory_space<vmem>>) attributes {dimension_semantics = [#tpu.dimension_semantics<parallel>], iteration_bounds = array<i64: 6>, scalar_prefetch = 2 : i64, scratch_operands = 0 : i64, tpu.core_type = #tpu.core_type<tc>, window_params = [{transform_indices = @transform_0, window_bounds = array<i64: 1, 2, 8, 32>}, {transform_indices = @transform_1, window_bounds = array<i64: 1, 2, 8, 32>}, {transform_indices = @transform_2, window_bounds = array<i64: 1, 32, 32>}, {transform_indices = @transform_3, window_bounds = array<i64: 1, 32, 64>}, {transform_indices = @transform_4, window_bounds = array<i64: 1, 2, 8, 32>}]} {
    %c0 = arith.constant 0 : index
    %c0_0 = arith.constant 0 : index
    %c0_1 = arith.constant 0 : index
    %c0_2 = arith.constant 0 : index
    %0 = vector.load %arg3[%c0, %c0_0, %c0_1, %c0_2] : memref<1x2x8x32xf32, #tpu.memory_space<vmem>>, vector<1x2x8x32xf32>
    %1 = vector.shape_cast %0 : vector<1x2x8x32xf32> to vector<2x8x32xf32>
    %c0_3 = arith.constant 0 : index
    %c0_4 = arith.constant 0 : index
    %c0_5 = arith.constant 0 : index
    %c0_6 = arith.constant 0 : index
    %2 = vector.load %arg4[%c0_3, %c0_4, %c0_5, %c0_6] : memref<1x2x8x32xf32, #tpu.memory_space<vmem>>, vector<1x2x8x32xf32>
    %3 = vector.shape_cast %2 : vector<1x2x8x32xf32> to vector<2x8x32xf32>
    %c0_7 = arith.constant 0 : index
    %c0_8 = arith.constant 0 : index
    %c0_9 = arith.constant 0 : index
    %4 = vector.load %arg5[%c0_7, %c0_8, %c0_9] : memref<1x32x32xf32, #tpu.memory_space<vmem>>, vector<1x32x32xf32>
    %5 = vector.shape_cast %4 : vector<1x32x32xf32> to vector<32x32xf32>
    "tpu.trace_start"() <{level = 10 : i32, message = "bld,da->bla"}> : () -> ()
    %cst = arith.constant dense<0.000000e+00> : vector<2x8x32xf32>
    %6 = tpu.matmul %1, %5, %cst {dimension_numbers = #tpu.dot_dimension_numbers<[2], [0], [0, 1], [1], [0, 0, 0, 1, 1, 1], [], []>} : vector<2x8x32xf32>, vector<32x32xf32>, vector<2x8x32xf32> -> vector<2x8x32xf32>
    "tpu.trace_stop"() : () -> ()
    %c0_10 = arith.constant 0 : index
    %c0_11 = arith.constant 0 : index
    %c0_12 = arith.constant 0 : index
    %7 = vector.load %arg6[%c0_10, %c0_11, %c0_12] : memref<1x32x64xf32, #tpu.memory_space<vmem>>, vector<1x32x64xf32>
    %8 = vector.shape_cast %7 : vector<1x32x64xf32> to vector<32x64xf32>
    "tpu.trace_start"() <{level = 10 : i32, message = "bld,da->bla"}> : () -> ()
    %cst_13 = arith.constant dense<0.000000e+00> : vector<2x8x64xf32>
    %9 = tpu.matmul %3, %8, %cst_13 {dimension_numbers = #tpu.dot_dimension_numbers<[2], [0], [0, 1], [1], [0, 0, 0, 1, 1, 1], [], []>} : vector<2x8x32xf32>, vector<32x64xf32>, vector<2x8x64xf32> -> vector<2x8x64xf32>
    "tpu.trace_stop"() : () -> ()
    %10 = vector.extract_strided_slice %9 {offsets = [0, 0, 0], sizes = [2, 8, 32], strides = [1, 1, 1]} : vector<2x8x64xf32> to vector<2x8x32xf32>
    %11 = vector.extract_strided_slice %9 {offsets = [0, 0, 32], sizes = [2, 8, 32], strides = [1, 1, 1]} : vector<2x8x64xf32> to vector<2x8x32xf32>
    "tpu.trace_start"() <{level = 10 : i32, message = "bqa,bka->bqk"}> : () -> ()
    %cst_14 = arith.constant dense<0.000000e+00> : vector<2x8x8xf32>
    %12 = tpu.matmul %6, %10, %cst_14 {dimension_numbers = #tpu.dot_dimension_numbers<[2], [2], [1], [1], [0, 0, 0, 1, 1, 1], [0], [0]>} : vector<2x8x32xf32>, vector<2x8x32xf32>, vector<2x8x8xf32> -> vector<2x8x8xf32>
    "tpu.trace_stop"() : () -> ()
    %cst_15 = arith.constant 0.176776692 : f32
    %13 = vector.broadcast %cst_15 : f32 to vector<2x8x8xf32>
    %14 = arith.mulf %12, %13 : vector<2x8x8xf32>
    %cst_16 = arith.constant dense<0xFF800000> : vector<2x8xf32>
    %15 = vector.multi_reduction <maximumf>, %14, %cst_16 [2] : vector<2x8x8xf32> to vector<2x8xf32>
    %cst_17 = arith.constant 0xFF800000 : f32
    %16 = vector.broadcast %cst_17 : f32 to vector<2x8xf32>
    %17 = arith.maximumf %16, %15 : vector<2x8xf32>
    %18 = vector.shape_cast %17 : vector<2x8xf32> to vector<2x8x1xf32>
    %19 = vector.broadcast %18 : vector<2x8x1xf32> to vector<2x8x8xf32>
    %20 = arith.subf %14, %19 : vector<2x8x8xf32>
    %21 = math.exp %20 : vector<2x8x8xf32>
    %cst_18 = arith.constant dense<0.000000e+00> : vector<2x8xf32>
    %22 = vector.multi_reduction <add>, %21, %cst_18 [2] : vector<2x8x8xf32> to vector<2x8xf32>
    %23 = vector.shape_cast %22 : vector<2x8xf32> to vector<2x8x1xf32>
    %24 = vector.broadcast %23 : vector<2x8x1xf32> to vector<2x8x8xf32>
    %25 = arith.divf %21, %24 : vector<2x8x8xf32>
    "tpu.trace_start"() <{level = 10 : i32, message = "bqk,bka->bqa"}> : () -> ()
    %cst_19 = arith.constant dense<0.000000e+00> : vector<2x8x32xf32>
    %26 = tpu.matmul %25, %11, %cst_19 {dimension_numbers = #tpu.dot_dimension_numbers<[2], [1], [1], [2], [0, 0, 0, 1, 1, 2], [0], [0]>} : vector<2x8x8xf32>, vector<2x8x32xf32>, vector<2x8x32xf32> -> vector<2x8x32xf32>
    "tpu.trace_stop"() : () -> ()
    %c0_20 = arith.constant 0 : index
    %c0_21 = arith.constant 0 : index
    %c0_22 = arith.constant 0 : index
    %c0_23 = arith.constant 0 : index
    %27 = vector.load %arg7[%c0_20, %c0_21, %c0_22, %c0_23] : memref<1x2x8x32xf32, #tpu.memory_space<vmem>>, vector<1x2x8x32xf32>
    %28 = vector.shape_cast %27 : vector<1x2x8x32xf32> to vector<2x8x32xf32>
    %29 = vector.shape_cast %26 : vector<2x8x32xf32> to vector<1x2x8x32xf32>
    tpu.vector_store %arg7[%c0_20, %c0_21, %c0_22, %c0_23], %29 {strides = array<i32>} : memref<1x2x8x32xf32, #tpu.memory_space<vmem>>, vector<1x2x8x32xf32>,
    return
  }
  func.func @transform_0(%arg0: i32, %arg1: memref<6xi32, #tpu.memory_space<smem>>, %arg2: memref<6xi32, #tpu.memory_space<smem>>) -> (i32, i32, i32, i32) {
    %0 = arith.index_cast %arg0 : i32 to index
    %1 = memref.load %arg1[%0] : memref<6xi32, #tpu.memory_space<smem>>
    %c0_i32 = arith.constant 0 : i32
    %c0_i32_0 = arith.constant 0 : i32
    %c0_i32_1 = arith.constant 0 : i32
    %c0_i32_2 = arith.constant 0 : i32
    return %1, %c0_i32, %c0_i32_0, %c0_i32_1 : i32, i32, i32, i32
  }
  func.func @transform_1(%arg0: i32, %arg1: memref<6xi32, #tpu.memory_space<smem>>, %arg2: memref<6xi32, #tpu.memory_space<smem>>) -> (i32, i32, i32, i32) {
    %0 = arith.index_cast %arg0 : i32 to index
    %1 = memref.load %arg2[%0] : memref<6xi32, #tpu.memory_space<smem>>
    %c0_i32 = arith.constant 0 : i32
    %c0_i32_0 = arith.constant 0 : i32
    %c0_i32_1 = arith.constant 0 : i32
    %c0_i32_2 = arith.constant 0 : i32
    return %1, %c0_i32, %c0_i32_0, %c0_i32_1 : i32, i32, i32, i32
  }
  func.func @transform_2(%arg0: i32, %arg1: memref<6xi32, #tpu.memory_space<smem>>, %arg2: memref<6xi32, #tpu.memory_space<smem>>) -> (i32, i32, i32) {
    %c0_i32 = arith.constant 0 : i32
    %c0_i32_0 = arith.constant 0 : i32
    %c0_i32_1 = arith.constant 0 : i32
    return %arg0, %c0_i32, %c0_i32_0 : i32, i32, i32
  }
  func.func @transform_3(%arg0: i32, %arg1: memref<6xi32, #tpu.memory_space<smem>>, %arg2: memref<6xi32, #tpu.memory_space<smem>>) -> (i32, i32, i32) {
    %c0_i32 = arith.constant 0 : i32
    %c0_i32_0 = arith.constant 0 : i32
    %c0_i32_1 = arith.constant 0 : i32
    return %arg0, %c0_i32, %c0_i32_0 : i32, i32, i32
  }
  func.func @transform_4(%arg0: i32, %arg1: memref<6xi32, #tpu.memory_space<smem>>, %arg2: memref<6xi32, #tpu.memory_space<smem>>) -> (i32, i32, i32, i32) {
    %c0_i32 = arith.constant 0 : i32
    %c0_i32_0 = arith.constant 0 : i32
    %c0_i32_1 = arith.constant 0 : i32
    %c0_i32_2 = arith.constant 0 : i32
    return %arg0, %c0_i32, %c0_i32_0, %c0_i32_1 : i32, i32, i32, i32
  }
}

module attributes {stable_mosaic.version = 11 : i64} {
  func.func @_cross_attn_kernel(%arg0: i32, %arg1: memref<1xi32, #tpu.memory_space<smem>>, %arg2: memref<1xi32, #tpu.memory_space<smem>>, %arg3: memref<1x2x8x32xf32, #tpu.memory_space<vmem>>, %arg4: memref<1x2x8x32xf32, #tpu.memory_space<vmem>>, %arg5: memref<1x32x32xf32, #tpu.memory_space<vmem>>, %arg6: memref<1x32x64xf32, #tpu.memory_space<vmem>>, %arg7: memref<1x2x8x32xf32, #tpu.memory_space<vmem>>) attributes {dimension_semantics = [#tpu.dimension_semantics<parallel>], iteration_bounds = array<i64: 1>, scalar_prefetch = 2 : i64, scratch_operands = 0 : i64, tpu.core_type = #tpu.core_type<tc>, window_params = [{transform_indices = @transform_0, window_bounds = array<i64: 1, 2, 8, 32>}, {transform_indices = @transform_1, window_bounds = array<i64: 1, 2, 8, 32>}, {transform_indices = @transform_2, window_bounds = array<i64: 1, 32, 32>}, {transform_indices = @transform_3, window_bounds = array<i64: 1, 32, 64>}, {transform_indices = @transform_4, window_bounds = array<i64: 1, 2, 8, 32>}]} {
    %c0 = arith.constant 0 : index
    %c0_0 = arith.constant 0 : index
    %c0_1 = arith.constant 0 : index
    %c0_2 = arith.constant 0 : index
    %0 = vector.load %arg3[%c0, %c0_0, %c0_1, %c0_2] : memref<1x2x8x32xf32, #tpu.memory_space<vmem>>, vector<1x2x8x32xf32>
    %1 = vector.shape_cast %0 : vector<1x2x8x32xf32> to vector<2x8x32xf32>
    %c0_3 = arith.constant 0 : index
    %c0_4 = arith.constant 0 : index
    %c0_5 = arith.constant 0 : index
    %c0_6 = arith.constant 0 : index
    %2 = vector.load %arg4[%c0_3, %c0_4, %c0_5, %c0_6] : memref<1x2x8x32xf32, #tpu.memory_space<vmem>>, vector<1x2x8x32xf32>
    %3 = vector.shape_cast %2 : vector<1x2x8x32xf32> to vector<2x8x32xf32>
    %c0_7 = arith.constant 0 : index
    %c0_8 = arith.constant 0 : index
    %c0_9 = arith.constant 0 : index
    %4 = vector.load %arg5[%c0_7, %c0_8, %c0_9] : memref<1x32x32xf32, #tpu.memory_space<vmem>>, vector<1x32x32xf32>
    %5 = vector.shape_cast %4 : vector<1x32x32xf32> to vector<32x32xf32>
    "tpu.trace_start"() <{level = 10 : i32, message = "bld,da->bla"}> : () -> ()
    %cst = arith.constant dense<0.000000e+00> : vector<2x8x32xf32>
    %6 = tpu.matmul %1, %5, %cst {dimension_numbers = #tpu.dot_dimension_numbers<[2], [0], [0, 1], [1], [0, 0, 0, 1, 1, 1], [], []>} : vector<2x8x32xf32>, vector<32x32xf32>, vector<2x8x32xf32> -> vector<2x8x32xf32>
    "tpu.trace_stop"() : () -> ()
    %c0_10 = arith.constant 0 : index
    %c0_11 = arith.constant 0 : index
    %c0_12 = arith.constant 0 : index
    %7 = vector.load %arg6[%c0_10, %c0_11, %c0_12] : memref<1x32x64xf32, #tpu.memory_space<vmem>>, vector<1x32x64xf32>
    %8 = vector.shape_cast %7 : vector<1x32x64xf32> to vector<32x64xf32>
    "tpu.trace_start"() <{level = 10 : i32, message = "bld,da->bla"}> : () -> ()
    %cst_13 = arith.constant dense<0.000000e+00> : vector<2x8x64xf32>
    %9 = tpu.matmul %3, %8, %cst_13 {dimension_numbers = #tpu.dot_dimension_numbers<[2], [0], [0, 1], [1], [0, 0, 0, 1, 1, 1], [], []>} : vector<2x8x32xf32>, vector<32x64xf32>, vector<2x8x64xf32> -> vector<2x8x64xf32>
    "tpu.trace_stop"() : () -> ()
    %10 = vector.extract_strided_slice %9 {offsets = [0, 0, 0], sizes = [2, 8, 32], strides = [1, 1, 1]} : vector<2x8x64xf32> to vector<2x8x32xf32>
    %11 = vector.extract_strided_slice %9 {offsets = [0, 0, 32], sizes = [2, 8, 32], strides = [1, 1, 1]} : vector<2x8x64xf32> to vector<2x8x32xf32>
    "tpu.trace_start"() <{level = 10 : i32, message = "bqa,bka->bqk"}> : () -> ()
    %cst_14 = arith.constant dense<0.000000e+00> : vector<2x8x8xf32>
    %12 = tpu.matmul %6, %10, %cst_14 {dimension_numbers = #tpu.dot_dimension_numbers<[2], [2], [1], [1], [0, 0, 0, 1, 1, 1], [0], [0]>} : vector<2x8x32xf32>, vector<2x8x32xf32>, vector<2x8x8xf32> -> vector<2x8x8xf32>
    "tpu.trace_stop"() : () -> ()
    %cst_15 = arith.constant 0.176776692 : f32
    %13 = vector.broadcast %cst_15 : f32 to vector<2x8x8xf32>
    %14 = arith.mulf %12, %13 : vector<2x8x8xf32>
    %cst_16 = arith.constant dense<0xFF800000> : vector<2x8xf32>
    %15 = vector.multi_reduction <maximumf>, %14, %cst_16 [2] : vector<2x8x8xf32> to vector<2x8xf32>
    %cst_17 = arith.constant 0xFF800000 : f32
    %16 = vector.broadcast %cst_17 : f32 to vector<2x8xf32>
    %17 = arith.maximumf %16, %15 : vector<2x8xf32>
    %18 = vector.shape_cast %17 : vector<2x8xf32> to vector<2x8x1xf32>
    %19 = vector.broadcast %18 : vector<2x8x1xf32> to vector<2x8x8xf32>
    %20 = arith.subf %14, %19 : vector<2x8x8xf32>
    %21 = math.exp %20 : vector<2x8x8xf32>
    %cst_18 = arith.constant dense<0.000000e+00> : vector<2x8xf32>
    %22 = vector.multi_reduction <add>, %21, %cst_18 [2] : vector<2x8x8xf32> to vector<2x8xf32>
    %23 = vector.shape_cast %22 : vector<2x8xf32> to vector<2x8x1xf32>
    %24 = vector.broadcast %23 : vector<2x8x1xf32> to vector<2x8x8xf32>
    %25 = arith.divf %21, %24 : vector<2x8x8xf32>
    "tpu.trace_start"() <{level = 10 : i32, message = "bqk,bka->bqa"}> : () -> ()
    %cst_19 = arith.constant dense<0.000000e+00> : vector<2x8x32xf32>
    %26 = tpu.matmul %25, %11, %cst_19 {dimension_numbers = #tpu.dot_dimension_numbers<[2], [1], [1], [2], [0, 0, 0, 1, 1, 2], [0], [0]>} : vector<2x8x8xf32>, vector<2x8x32xf32>, vector<2x8x32xf32> -> vector<2x8x32xf32>
    "tpu.trace_stop"() : () -> ()
    %c0_20 = arith.constant 0 : index
    %c0_21 = arith.constant 0 : index
    %c0_22 = arith.constant 0 : index
    %c0_23 = arith.constant 0 : index
    %27 = vector.load %arg7[%c0_20, %c0_21, %c0_22, %c0_23] : memref<1x2x8x32xf32, #tpu.memory_space<vmem>>, vector<1x2x8x32xf32>
    %28 = vector.shape_cast %27 : vector<1x2x8x32xf32> to vector<2x8x32xf32>
    %29 = vector.shape_cast %26 : vector<2x8x32xf32> to vector<1x2x8x32xf32>
    tpu.vector_store %arg7[%c0_20, %c0_21, %c0_22, %c0_23], %29 {strides = array<i32>} : memref<1x2x8x32xf32, #tpu.memory_space<vmem>>, vector<1x2x8x32xf32>,
    return
  }
  func.func @transform_0(%arg0: i32, %arg1: memref<1xi32, #tpu.memory_space<smem>>, %arg2: memref<1xi32, #tpu.memory_space<smem>>) -> (i32, i32, i32, i32) {
    %0 = arith.index_cast %arg0 : i32 to index
    %1 = memref.load %arg1[%0] : memref<1xi32, #tpu.memory_space<smem>>
    %c0_i32 = arith.constant 0 : i32
    %c0_i32_0 = arith.constant 0 : i32
    %c0_i32_1 = arith.constant 0 : i32
    %c0_i32_2 = arith.constant 0 : i32
    return %1, %c0_i32, %c0_i32_0, %c0_i32_1 : i32, i32, i32, i32
  }
  func.func @transform_1(%arg0: i32, %arg1: memref<1xi32, #tpu.memory_space<smem>>, %arg2: memref<1xi32, #tpu.memory_space<smem>>) -> (i32, i32, i32, i32) {
    %0 = arith.index_cast %arg0 : i32 to index
    %1 = memref.load %arg2[%0] : memref<1xi32, #tpu.memory_space<smem>>
    %c0_i32 = arith.constant 0 : i32
    %c0_i32_0 = arith.constant 0 : i32
    %c0_i32_1 = arith.constant 0 : i32
    %c0_i32_2 = arith.constant 0 : i32
    return %1, %c0_i32, %c0_i32_0, %c0_i32_1 : i32, i32, i32, i32
  }
  func.func @transform_2(%arg0: i32, %arg1: memref<1xi32, #tpu.memory_space<smem>>, %arg2: memref<1xi32, #tpu.memory_space<smem>>) -> (i32, i32, i32) {
    %c0_i32 = arith.constant 0 : i32
    %c0_i32_0 = arith.constant 0 : i32
    %c0_i32_1 = arith.constant 0 : i32
    return %arg0, %c0_i32, %c0_i32_0 : i32, i32, i32
  }
  func.func @transform_3(%arg0: i32, %arg1: memref<1xi32, #tpu.memory_space<smem>>, %arg2: memref<1xi32, #tpu.memory_space<smem>>) -> (i32, i32, i32) {
    %c0_i32 = arith.constant 0 : i32
    %c0_i32_0 = arith.constant 0 : i32
    %c0_i32_1 = arith.constant 0 : i32
    return %arg0, %c0_i32, %c0_i32_0 : i32, i32, i32
  }
  func.func @transform_4(%arg0: i32, %arg1: memref<1xi32, #tpu.memory_space<smem>>, %arg2: memref<1xi32, #tpu.memory_space<smem>>) -> (i32, i32, i32, i32) {
    %c0_i32 = arith.constant 0 : i32
    %c0_i32_0 = arith.constant 0 : i32
    %c0_i32_1 = arith.constant 0 : i32
    %c0_i32_2 = arith.constant 0 : i32
    return %arg0, %c0_i32, %c0_i32_0, %c0_i32_1 : i32, i32, i32, i32
  }
}

module attributes {stable_mosaic.version = 11 : i64} {
  func.func @_bilstm_kernel(%arg0: i32, %arg1: memref<1x8x2x256xf32, #tpu.memory_space<vmem>>, %arg2: memref<1x64x256xf32, #tpu.memory_space<vmem>>, %arg3: memref<8x2x64xf32, #tpu.memory_space<vmem>>, %arg4: memref<1x8x2x64xf32, #tpu.memory_space<vmem>>, %arg5: memref<2x64xf32, #tpu.memory_space<vmem>>, %arg6: memref<2x64xf32, #tpu.memory_space<vmem>>) attributes {dimension_semantics = [#tpu.dimension_semantics<parallel>], iteration_bounds = array<i64: 1>, scalar_prefetch = 0 : i64, scratch_operands = 2 : i64, tpu.core_type = #tpu.core_type<tc>, window_params = [{transform_indices = @transform_0, window_bounds = array<i64: 1, 8, 2, 256>}, {transform_indices = @transform_1, window_bounds = array<i64: 1, 64, 256>}, {pipeline_mode = #tpu.pipeline_mode<synchronous>, transform_indices = @transform_2, window_bounds = array<i64: 8, 2, 64>}, {transform_indices = @transform_3, window_bounds = array<i64: 1, 8, 2, 64>}]} {
    %cst = arith.constant 0.000000e+00 : f32
    %0 = vector.broadcast %cst : f32 to vector<2x64xf32>
    %c0 = arith.constant 0 : index
    %c0_0 = arith.constant 0 : index
    %1 = vector.load %arg5[%c0, %c0_0] : memref<2x64xf32, #tpu.memory_space<vmem>>, vector<2x64xf32>
    tpu.vector_store %arg5[%c0, %c0_0], %0 {strides = array<i32>} : memref<2x64xf32, #tpu.memory_space<vmem>>, vector<2x64xf32>,
    %cst_1 = arith.constant 0.000000e+00 : f32
    %2 = vector.broadcast %cst_1 : f32 to vector<2x64xf32>
    %c0_2 = arith.constant 0 : index
    %c0_3 = arith.constant 0 : index
    %3 = vector.load %arg6[%c0_2, %c0_3] : memref<2x64xf32, #tpu.memory_space<vmem>>, vector<2x64xf32>
    tpu.vector_store %arg6[%c0_2, %c0_3], %2 {strides = array<i32>} : memref<2x64xf32, #tpu.memory_space<vmem>>, vector<2x64xf32>,
    %c0_4 = arith.constant 0 : index
    %c0_5 = arith.constant 0 : index
    %c0_6 = arith.constant 0 : index
    %4 = vector.load %arg2[%c0_4, %c0_5, %c0_6] : memref<1x64x256xf32, #tpu.memory_space<vmem>>, vector<1x64x256xf32>
    %5 = vector.shape_cast %4 : vector<1x64x256xf32> to vector<64x256xf32>
    %c0_i32 = arith.constant 0 : i32
    %c0_7 = arith.constant 0 : index
    %6 = arith.index_cast %c0_i32 : i32 to index
    %c0_8 = arith.constant 0 : index
    %c0_9 = arith.constant 0 : index
    %7 = vector.load %arg1[%c0_7, %6, %c0_8, %c0_9] : memref<1x8x2x256xf32, #tpu.memory_space<vmem>>, vector<1x1x2x256xf32>
    %8 = vector.shape_cast %7 : vector<1x1x2x256xf32> to vector<2x256xf32>
    %9 = arith.index_cast %c0_i32 : i32 to index
    %c0_10 = arith.constant 0 : index
    %c0_11 = arith.constant 0 : index
    %10 = vector.load %arg3[%9, %c0_10, %c0_11] : memref<8x2x64xf32, #tpu.memory_space<vmem>>, vector<1x2x64xf32>
    %11 = vector.shape_cast %10 : vector<1x2x64xf32> to vector<2x64xf32>
    %c0_12 = arith.constant 0 : index
    %c0_13 = arith.constant 0 : index
    %12 = vector.load %arg5[%c0_12, %c0_13] : memref<2x64xf32, #tpu.memory_space<vmem>>, vector<2x64xf32>
    %c0_14 = arith.constant 0 : index
    %c0_15 = arith.constant 0 : index
    %13 = vector.load %arg6[%c0_14, %c0_15] : memref<2x64xf32, #tpu.memory_space<vmem>>, vector<2x64xf32>
    %cst_16 = arith.constant dense<0.000000e+00> : vector<2x256xf32>
    %14 = tpu.matmul %12, %5, %cst_16 {dimension_numbers = #tpu.dot_dimension_numbers<[1], [0], [0], [1], [0, 0, 1, 1], [], []>} : vector<2x64xf32>, vector<64x256xf32>, vector<2x256xf32> -> vector<2x256xf32>
    %15 = arith.addf %8, %14 : vector<2x256xf32>
    %16 = vector.extract_strided_slice %15 {offsets = [0, 0], sizes = [2, 192], strides = [1, 1]} : vector<2x256xf32> to vector<2x192xf32>
    %17 = arith.negf %16 : vector<2x192xf32>
    %18 = math.exp %17 : vector<2x192xf32>
    %cst_17 = arith.constant 1.000000e+00 : f32
    %19 = vector.broadcast %cst_17 : f32 to vector<2x192xf32>
    %20 = arith.addf %19, %18 : vector<2x192xf32>
    %21 = arith.divf %19, %20 : vector<2x192xf32>
    %22 = vector.extract_strided_slice %15 {offsets = [0, 192], sizes = [2, 64], strides = [1, 1]} : vector<2x256xf32> to vector<2x64xf32>
    %23 = math.tanh %22 : vector<2x64xf32>
    %24 = vector.extract_strided_slice %21 {offsets = [0, 0], sizes = [2, 64], strides = [1, 1]} : vector<2x192xf32> to vector<2x64xf32>
    %25 = vector.extract_strided_slice %21 {offsets = [0, 64], sizes = [2, 64], strides = [1, 1]} : vector<2x192xf32> to vector<2x64xf32>
    %26 = vector.extract_strided_slice %21 {offsets = [0, 128], sizes = [2, 64], strides = [1, 1]} : vector<2x192xf32> to vector<2x64xf32>
    %27 = arith.mulf %25, %13 : vector<2x64xf32>
    %28 = arith.mulf %24, %23 : vector<2x64xf32>
    %29 = arith.addf %27, %28 : vector<2x64xf32>
    %30 = math.tanh %29 : vector<2x64xf32>
    %31 = arith.mulf %26, %30 : vector<2x64xf32>
    %cst_18 = arith.constant 5.000000e-01 : f32
    %32 = vector.broadcast %cst_18 : f32 to vector<2x64xf32>
    %33 = arith.cmpf ogt, %11, %32 : vector<2x64xf32>
    %34 = arith.select %33, %31, %12 : vector<2x64xi1>, vector<2x64xf32>
    %c0_19 = arith.constant 0 : index
    %c0_20 = arith.constant 0 : index
    %35 = vector.load %arg5[%c0_19, %c0_20] : memref<2x64xf32, #tpu.memory_space<vmem>>, vector<2x64xf32>
    tpu.vector_store %arg5[%c0_19, %c0_20], %34 {strides = array<i32>} : memref<2x64xf32, #tpu.memory_space<vmem>>, vector<2x64xf32>,
    %36 = arith.select %33, %29, %13 : vector<2x64xi1>, vector<2x64xf32>
    %c0_21 = arith.constant 0 : index
    %c0_22 = arith.constant 0 : index
    %37 = vector.load %arg6[%c0_21, %c0_22] : memref<2x64xf32, #tpu.memory_space<vmem>>, vector<2x64xf32>
    tpu.vector_store %arg6[%c0_21, %c0_22], %36 {strides = array<i32>} : memref<2x64xf32, #tpu.memory_space<vmem>>, vector<2x64xf32>,
    %cst_23 = arith.constant 0.000000e+00 : f32
    %38 = vector.broadcast %cst_23 : f32 to vector<2x64xf32>
    %39 = arith.select %33, %31, %38 : vector<2x64xi1>, vector<2x64xf32>
    %c0_24 = arith.constant 0 : index
    %40 = arith.index_cast %c0_i32 : i32 to index
    %c0_25 = arith.constant 0 : index
    %c0_26 = arith.constant 0 : index
    %41 = vector.load %arg4[%c0_24, %40, %c0_25, %c0_26] : memref<1x8x2x64xf32, #tpu.memory_space<vmem>>, vector<1x1x2x64xf32>
    %42 = vector.shape_cast %41 : vector<1x1x2x64xf32> to vector<2x64xf32>
    %43 = vector.shape_cast %39 : vector<2x64xf32> to vector<1x1x2x64xf32>
    tpu.vector_store %arg4[%c0_24, %40, %c0_25, %c0_26], %43 {strides = array<i32>} : memref<1x8x2x64xf32, #tpu.memory_space<vmem>>, vector<1x1x2x64xf32>,
    %c1_i32 = arith.constant 1 : i32
    %c0_27 = arith.constant 0 : index
    %44 = arith.index_cast %c1_i32 : i32 to index
    %c0_28 = arith.constant 0 : index
    %c0_29 = arith.constant 0 : index
    %45 = vector.load %arg1[%c0_27, %44, %c0_28, %c0_29] : memref<1x8x2x256xf32, #tpu.memory_space<vmem>>, vector<1x1x2x256xf32>
    %46 = vector.shape_cast %45 : vector<1x1x2x256xf32> to vector<2x256xf32>
    %47 = arith.index_cast %c1_i32 : i32 to index
    %c0_30 = arith.constant 0 : index
    %c0_31 = arith.constant 0 : index
    %48 = vector.load %arg3[%47, %c0_30, %c0_31] : memref<8x2x64xf32, #tpu.memory_space<vmem>>, vector<1x2x64xf32>
    %49 = vector.shape_cast %48 : vector<1x2x64xf32> to vector<2x64xf32>
    %c0_32 = arith.constant 0 : index
    %c0_33 = arith.constant 0 : index
    %50 = vector.load %arg5[%c0_32, %c0_33] : memref<2x64xf32, #tpu.memory_space<vmem>>, vector<2x64xf32>
    %c0_34 = arith.constant 0 : index
    %c0_35 = arith.constant 0 : index
    %51 = vector.load %arg6[%c0_34, %c0_35] : memref<2x64xf32, #tpu.memory_space<vmem>>, vector<2x64xf32>
    %cst_36 = arith.constant dense<0.000000e+00> : vector<2x256xf32>
    %52 = tpu.matmul %50, %5, %cst_36 {dimension_numbers = #tpu.dot_dimension_numbers<[1], [0], [0], [1], [0, 0, 1, 1], [], []>} : vector<2x64xf32>, vector<64x256xf32>, vector<2x256xf32> -> vector<2x256xf32>
    %53 = arith.addf %46, %52 : vector<2x256xf32>
    %54 = vector.extract_strided_slice %53 {offsets = [0, 0], sizes = [2, 192], strides = [1, 1]} : vector<2x256xf32> to vector<2x192xf32>
    %55 = arith.negf %54 : vector<2x192xf32>
    %56 = math.exp %55 : vector<2x192xf32>
    %cst_37 = arith.constant 1.000000e+00 : f32
    %57 = vector.broadcast %cst_37 : f32 to vector<2x192xf32>
    %58 = arith.addf %57, %56 : vector<2x192xf32>
    %59 = arith.divf %57, %58 : vector<2x192xf32>
    %60 = vector.extract_strided_slice %53 {offsets = [0, 192], sizes = [2, 64], strides = [1, 1]} : vector<2x256xf32> to vector<2x64xf32>
    %61 = math.tanh %60 : vector<2x64xf32>
    %62 = vector.extract_strided_slice %59 {offsets = [0, 0], sizes = [2, 64], strides = [1, 1]} : vector<2x192xf32> to vector<2x64xf32>
    %63 = vector.extract_strided_slice %59 {offsets = [0, 64], sizes = [2, 64], strides = [1, 1]} : vector<2x192xf32> to vector<2x64xf32>
    %64 = vector.extract_strided_slice %59 {offsets = [0, 128], sizes = [2, 64], strides = [1, 1]} : vector<2x192xf32> to vector<2x64xf32>
    %65 = arith.mulf %63, %51 : vector<2x64xf32>
    %66 = arith.mulf %62, %61 : vector<2x64xf32>
    %67 = arith.addf %65, %66 : vector<2x64xf32>
    %68 = math.tanh %67 : vector<2x64xf32>
    %69 = arith.mulf %64, %68 : vector<2x64xf32>
    %cst_38 = arith.constant 5.000000e-01 : f32
    %70 = vector.broadcast %cst_38 : f32 to vector<2x64xf32>
    %71 = arith.cmpf ogt, %49, %70 : vector<2x64xf32>
    %72 = arith.select %71, %69, %50 : vector<2x64xi1>, vector<2x64xf32>
    %c0_39 = arith.constant 0 : index
    %c0_40 = arith.constant 0 : index
    %73 = vector.load %arg5[%c0_39, %c0_40] : memref<2x64xf32, #tpu.memory_space<vmem>>, vector<2x64xf32>
    tpu.vector_store %arg5[%c0_39, %c0_40], %72 {strides = array<i32>} : memref<2x64xf32, #tpu.memory_space<vmem>>, vector<2x64xf32>,
    %74 = arith.select %71, %67, %51 : vector<2x64xi1>, vector<2x64xf32>
    %c0_41 = arith.constant 0 : index
    %c0_42 = arith.constant 0 : index
    %75 = vector.load %arg6[%c0_41, %c0_42] : memref<2x64xf32, #tpu.memory_space<vmem>>, vector<2x64xf32>
    tpu.vector_store %arg6[%c0_41, %c0_42], %74 {strides = array<i32>} : memref<2x64xf32, #tpu.memory_space<vmem>>, vector<2x64xf32>,
    %cst_43 = arith.constant 0.000000e+00 : f32
    %76 = vector.broadcast %cst_43 : f32 to vector<2x64xf32>
    %77 = arith.select %71, %69, %76 : vector<2x64xi1>, vector<2x64xf32>
    %c0_44 = arith.constant 0 : index
    %78 = arith.index_cast %c1_i32 : i32 to index
    %c0_45 = arith.constant 0 : index
    %c0_46 = arith.constant 0 : index
    %79 = vector.load %arg4[%c0_44, %78, %c0_45, %c0_46] : memref<1x8x2x64xf32, #tpu.memory_space<vmem>>, vector<1x1x2x64xf32>
    %80 = vector.shape_cast %79 : vector<1x1x2x64xf32> to vector<2x64xf32>
    %81 = vector.shape_cast %77 : vector<2x64xf32> to vector<1x1x2x64xf32>
    tpu.vector_store %arg4[%c0_44, %78, %c0_45, %c0_46], %81 {strides = array<i32>} : memref<1x8x2x64xf32, #tpu.memory_space<vmem>>, vector<1x1x2x64xf32>,
    %c2_i32 = arith.constant 2 : i32
    %c0_47 = arith.constant 0 : index
    %82 = arith.index_cast %c2_i32 : i32 to index
    %c0_48 = arith.constant 0 : index
    %c0_49 = arith.constant 0 : index
    %83 = vector.load %arg1[%c0_47, %82, %c0_48, %c0_49] : memref<1x8x2x256xf32, #tpu.memory_space<vmem>>, vector<1x1x2x256xf32>
    %84 = vector.shape_cast %83 : vector<1x1x2x256xf32> to vector<2x256xf32>
    %85 = arith.index_cast %c2_i32 : i32 to index
    %c0_50 = arith.constant 0 : index
    %c0_51 = arith.constant 0 : index
    %86 = vector.load %arg3[%85, %c0_50, %c0_51] : memref<8x2x64xf32, #tpu.memory_space<vmem>>, vector<1x2x64xf32>
    %87 = vector.shape_cast %86 : vector<1x2x64xf32> to vector<2x64xf32>
    %c0_52 = arith.constant 0 : index
    %c0_53 = arith.constant 0 : index
    %88 = vector.load %arg5[%c0_52, %c0_53] : memref<2x64xf32, #tpu.memory_space<vmem>>, vector<2x64xf32>
    %c0_54 = arith.constant 0 : index
    %c0_55 = arith.constant 0 : index
    %89 = vector.load %arg6[%c0_54, %c0_55] : memref<2x64xf32, #tpu.memory_space<vmem>>, vector<2x64xf32>
    %cst_56 = arith.constant dense<0.000000e+00> : vector<2x256xf32>
    %90 = tpu.matmul %88, %5, %cst_56 {dimension_numbers = #tpu.dot_dimension_numbers<[1], [0], [0], [1], [0, 0, 1, 1], [], []>} : vector<2x64xf32>, vector<64x256xf32>, vector<2x256xf32> -> vector<2x256xf32>
    %91 = arith.addf %84, %90 : vector<2x256xf32>
    %92 = vector.extract_strided_slice %91 {offsets = [0, 0], sizes = [2, 192], strides = [1, 1]} : vector<2x256xf32> to vector<2x192xf32>
    %93 = arith.negf %92 : vector<2x192xf32>
    %94 = math.exp %93 : vector<2x192xf32>
    %cst_57 = arith.constant 1.000000e+00 : f32
    %95 = vector.broadcast %cst_57 : f32 to vector<2x192xf32>
    %96 = arith.addf %95, %94 : vector<2x192xf32>
    %97 = arith.divf %95, %96 : vector<2x192xf32>
    %98 = vector.extract_strided_slice %91 {offsets = [0, 192], sizes = [2, 64], strides = [1, 1]} : vector<2x256xf32> to vector<2x64xf32>
    %99 = math.tanh %98 : vector<2x64xf32>
    %100 = vector.extract_strided_slice %97 {offsets = [0, 0], sizes = [2, 64], strides = [1, 1]} : vector<2x192xf32> to vector<2x64xf32>
    %101 = vector.extract_strided_slice %97 {offsets = [0, 64], sizes = [2, 64], strides = [1, 1]} : vector<2x192xf32> to vector<2x64xf32>
    %102 = vector.extract_strided_slice %97 {offsets = [0, 128], sizes = [2, 64], strides = [1, 1]} : vector<2x192xf32> to vector<2x64xf32>
    %103 = arith.mulf %101, %89 : vector<2x64xf32>
    %104 = arith.mulf %100, %99 : vector<2x64xf32>
    %105 = arith.addf %103, %104 : vector<2x64xf32>
    %106 = math.tanh %105 : vector<2x64xf32>
    %107 = arith.mulf %102, %106 : vector<2x64xf32>
    %cst_58 = arith.constant 5.000000e-01 : f32
    %108 = vector.broadcast %cst_58 : f32 to vector<2x64xf32>
    %109 = arith.cmpf ogt, %87, %108 : vector<2x64xf32>
    %110 = arith.select %109, %107, %88 : vector<2x64xi1>, vector<2x64xf32>
    %c0_59 = arith.constant 0 : index
    %c0_60 = arith.constant 0 : index
    %111 = vector.load %arg5[%c0_59, %c0_60] : memref<2x64xf32, #tpu.memory_space<vmem>>, vector<2x64xf32>
    tpu.vector_store %arg5[%c0_59, %c0_60], %110 {strides = array<i32>} : memref<2x64xf32, #tpu.memory_space<vmem>>, vector<2x64xf32>,
    %112 = arith.select %109, %105, %89 : vector<2x64xi1>, vector<2x64xf32>
    %c0_61 = arith.constant 0 : index
    %c0_62 = arith.constant 0 : index
    %113 = vector.load %arg6[%c0_61, %c0_62] : memref<2x64xf32, #tpu.memory_space<vmem>>, vector<2x64xf32>
    tpu.vector_store %arg6[%c0_61, %c0_62], %112 {strides = array<i32>} : memref<2x64xf32, #tpu.memory_space<vmem>>, vector<2x64xf32>,
    %cst_63 = arith.constant 0.000000e+00 : f32
    %114 = vector.broadcast %cst_63 : f32 to vector<2x64xf32>
    %115 = arith.select %109, %107, %114 : vector<2x64xi1>, vector<2x64xf32>
    %c0_64 = arith.constant 0 : index
    %116 = arith.index_cast %c2_i32 : i32 to index
    %c0_65 = arith.constant 0 : index
    %c0_66 = arith.constant 0 : index
    %117 = vector.load %arg4[%c0_64, %116, %c0_65, %c0_66] : memref<1x8x2x64xf32, #tpu.memory_space<vmem>>, vector<1x1x2x64xf32>
    %118 = vector.shape_cast %117 : vector<1x1x2x64xf32> to vector<2x64xf32>
    %119 = vector.shape_cast %115 : vector<2x64xf32> to vector<1x1x2x64xf32>
    tpu.vector_store %arg4[%c0_64, %116, %c0_65, %c0_66], %119 {strides = array<i32>} : memref<1x8x2x64xf32, #tpu.memory_space<vmem>>, vector<1x1x2x64xf32>,
    %c3_i32 = arith.constant 3 : i32
    %c0_67 = arith.constant 0 : index
    %120 = arith.index_cast %c3_i32 : i32 to index
    %c0_68 = arith.constant 0 : index
    %c0_69 = arith.constant 0 : index
    %121 = vector.load %arg1[%c0_67, %120, %c0_68, %c0_69] : memref<1x8x2x256xf32, #tpu.memory_space<vmem>>, vector<1x1x2x256xf32>
    %122 = vector.shape_cast %121 : vector<1x1x2x256xf32> to vector<2x256xf32>
    %123 = arith.index_cast %c3_i32 : i32 to index
    %c0_70 = arith.constant 0 : index
    %c0_71 = arith.constant 0 : index
    %124 = vector.load %arg3[%123, %c0_70, %c0_71] : memref<8x2x64xf32, #tpu.memory_space<vmem>>, vector<1x2x64xf32>
    %125 = vector.shape_cast %124 : vector<1x2x64xf32> to vector<2x64xf32>
    %c0_72 = arith.constant 0 : index
    %c0_73 = arith.constant 0 : index
    %126 = vector.load %arg5[%c0_72, %c0_73] : memref<2x64xf32, #tpu.memory_space<vmem>>, vector<2x64xf32>
    %c0_74 = arith.constant 0 : index
    %c0_75 = arith.constant 0 : index
    %127 = vector.load %arg6[%c0_74, %c0_75] : memref<2x64xf32, #tpu.memory_space<vmem>>, vector<2x64xf32>
    %cst_76 = arith.constant dense<0.000000e+00> : vector<2x256xf32>
    %128 = tpu.matmul %126, %5, %cst_76 {dimension_numbers = #tpu.dot_dimension_numbers<[1], [0], [0], [1], [0, 0, 1, 1], [], []>} : vector<2x64xf32>, vector<64x256xf32>, vector<2x256xf32> -> vector<2x256xf32>
    %129 = arith.addf %122, %128 : vector<2x256xf32>
    %130 = vector.extract_strided_slice %129 {offsets = [0, 0], sizes = [2, 192], strides = [1, 1]} : vector<2x256xf32> to vector<2x192xf32>
    %131 = arith.negf %130 : vector<2x192xf32>
    %132 = math.exp %131 : vector<2x192xf32>
    %cst_77 = arith.constant 1.000000e+00 : f32
    %133 = vector.broadcast %cst_77 : f32 to vector<2x192xf32>
    %134 = arith.addf %133, %132 : vector<2x192xf32>
    %135 = arith.divf %133, %134 : vector<2x192xf32>
    %136 = vector.extract_strided_slice %129 {offsets = [0, 192], sizes = [2, 64], strides = [1, 1]} : vector<2x256xf32> to vector<2x64xf32>
    %137 = math.tanh %136 : vector<2x64xf32>
    %138 = vector.extract_strided_slice %135 {offsets = [0, 0], sizes = [2, 64], strides = [1, 1]} : vector<2x192xf32> to vector<2x64xf32>
    %139 = vector.extract_strided_slice %135 {offsets = [0, 64], sizes = [2, 64], strides = [1, 1]} : vector<2x192xf32> to vector<2x64xf32>
    %140 = vector.extract_strided_slice %135 {offsets = [0, 128], sizes = [2, 64], strides = [1, 1]} : vector<2x192xf32> to vector<2x64xf32>
    %141 = arith.mulf %139, %127 : vector<2x64xf32>
    %142 = arith.mulf %138, %137 : vector<2x64xf32>
    %143 = arith.addf %141, %142 : vector<2x64xf32>
    %144 = math.tanh %143 : vector<2x64xf32>
    %145 = arith.mulf %140, %144 : vector<2x64xf32>
    %cst_78 = arith.constant 5.000000e-01 : f32
    %146 = vector.broadcast %cst_78 : f32 to vector<2x64xf32>
    %147 = arith.cmpf ogt, %125, %146 : vector<2x64xf32>
    %148 = arith.select %147, %145, %126 : vector<2x64xi1>, vector<2x64xf32>
    %c0_79 = arith.constant 0 : index
    %c0_80 = arith.constant 0 : index
    %149 = vector.load %arg5[%c0_79, %c0_80] : memref<2x64xf32, #tpu.memory_space<vmem>>, vector<2x64xf32>
    tpu.vector_store %arg5[%c0_79, %c0_80], %148 {strides = array<i32>} : memref<2x64xf32, #tpu.memory_space<vmem>>, vector<2x64xf32>,
    %150 = arith.select %147, %143, %127 : vector<2x64xi1>, vector<2x64xf32>
    %c0_81 = arith.constant 0 : index
    %c0_82 = arith.constant 0 : index
    %151 = vector.load %arg6[%c0_81, %c0_82] : memref<2x64xf32, #tpu.memory_space<vmem>>, vector<2x64xf32>
    tpu.vector_store %arg6[%c0_81, %c0_82], %150 {strides = array<i32>} : memref<2x64xf32, #tpu.memory_space<vmem>>, vector<2x64xf32>,
    %cst_83 = arith.constant 0.000000e+00 : f32
    %152 = vector.broadcast %cst_83 : f32 to vector<2x64xf32>
    %153 = arith.select %147, %145, %152 : vector<2x64xi1>, vector<2x64xf32>
    %c0_84 = arith.constant 0 : index
    %154 = arith.index_cast %c3_i32 : i32 to index
    %c0_85 = arith.constant 0 : index
    %c0_86 = arith.constant 0 : index
    %155 = vector.load %arg4[%c0_84, %154, %c0_85, %c0_86] : memref<1x8x2x64xf32, #tpu.memory_space<vmem>>, vector<1x1x2x64xf32>
    %156 = vector.shape_cast %155 : vector<1x1x2x64xf32> to vector<2x64xf32>
    %157 = vector.shape_cast %153 : vector<2x64xf32> to vector<1x1x2x64xf32>
    tpu.vector_store %arg4[%c0_84, %154, %c0_85, %c0_86], %157 {strides = array<i32>} : memref<1x8x2x64xf32, #tpu.memory_space<vmem>>, vector<1x1x2x64xf32>,
    %c4_i32 = arith.constant 4 : i32
    %c0_87 = arith.constant 0 : index
    %158 = arith.index_cast %c4_i32 : i32 to index
    %c0_88 = arith.constant 0 : index
    %c0_89 = arith.constant 0 : index
    %159 = vector.load %arg1[%c0_87, %158, %c0_88, %c0_89] : memref<1x8x2x256xf32, #tpu.memory_space<vmem>>, vector<1x1x2x256xf32>
    %160 = vector.shape_cast %159 : vector<1x1x2x256xf32> to vector<2x256xf32>
    %161 = arith.index_cast %c4_i32 : i32 to index
    %c0_90 = arith.constant 0 : index
    %c0_91 = arith.constant 0 : index
    %162 = vector.load %arg3[%161, %c0_90, %c0_91] : memref<8x2x64xf32, #tpu.memory_space<vmem>>, vector<1x2x64xf32>
    %163 = vector.shape_cast %162 : vector<1x2x64xf32> to vector<2x64xf32>
    %c0_92 = arith.constant 0 : index
    %c0_93 = arith.constant 0 : index
    %164 = vector.load %arg5[%c0_92, %c0_93] : memref<2x64xf32, #tpu.memory_space<vmem>>, vector<2x64xf32>
    %c0_94 = arith.constant 0 : index
    %c0_95 = arith.constant 0 : index
    %165 = vector.load %arg6[%c0_94, %c0_95] : memref<2x64xf32, #tpu.memory_space<vmem>>, vector<2x64xf32>
    %cst_96 = arith.constant dense<0.000000e+00> : vector<2x256xf32>
    %166 = tpu.matmul %164, %5, %cst_96 {dimension_numbers = #tpu.dot_dimension_numbers<[1], [0], [0], [1], [0, 0, 1, 1], [], []>} : vector<2x64xf32>, vector<64x256xf32>, vector<2x256xf32> -> vector<2x256xf32>
    %167 = arith.addf %160, %166 : vector<2x256xf32>
    %168 = vector.extract_strided_slice %167 {offsets = [0, 0], sizes = [2, 192], strides = [1, 1]} : vector<2x256xf32> to vector<2x192xf32>
    %169 = arith.negf %168 : vector<2x192xf32>
    %170 = math.exp %169 : vector<2x192xf32>
    %cst_97 = arith.constant 1.000000e+00 : f32
    %171 = vector.broadcast %cst_97 : f32 to vector<2x192xf32>
    %172 = arith.addf %171, %170 : vector<2x192xf32>
    %173 = arith.divf %171, %172 : vector<2x192xf32>
    %174 = vector.extract_strided_slice %167 {offsets = [0, 192], sizes = [2, 64], strides = [1, 1]} : vector<2x256xf32> to vector<2x64xf32>
    %175 = math.tanh %174 : vector<2x64xf32>
    %176 = vector.extract_strided_slice %173 {offsets = [0, 0], sizes = [2, 64], strides = [1, 1]} : vector<2x192xf32> to vector<2x64xf32>
    %177 = vector.extract_strided_slice %173 {offsets = [0, 64], sizes = [2, 64], strides = [1, 1]} : vector<2x192xf32> to vector<2x64xf32>
    %178 = vector.extract_strided_slice %173 {offsets = [0, 128], sizes = [2, 64], strides = [1, 1]} : vector<2x192xf32> to vector<2x64xf32>
    %179 = arith.mulf %177, %165 : vector<2x64xf32>
    %180 = arith.mulf %176, %175 : vector<2x64xf32>
    %181 = arith.addf %179, %180 : vector<2x64xf32>
    %182 = math.tanh %181 : vector<2x64xf32>
    %183 = arith.mulf %178, %182 : vector<2x64xf32>
    %cst_98 = arith.constant 5.000000e-01 : f32
    %184 = vector.broadcast %cst_98 : f32 to vector<2x64xf32>
    %185 = arith.cmpf ogt, %163, %184 : vector<2x64xf32>
    %186 = arith.select %185, %183, %164 : vector<2x64xi1>, vector<2x64xf32>
    %c0_99 = arith.constant 0 : index
    %c0_100 = arith.constant 0 : index
    %187 = vector.load %arg5[%c0_99, %c0_100] : memref<2x64xf32, #tpu.memory_space<vmem>>, vector<2x64xf32>
    tpu.vector_store %arg5[%c0_99, %c0_100], %186 {strides = array<i32>} : memref<2x64xf32, #tpu.memory_space<vmem>>, vector<2x64xf32>,
    %188 = arith.select %185, %181, %165 : vector<2x64xi1>, vector<2x64xf32>
    %c0_101 = arith.constant 0 : index
    %c0_102 = arith.constant 0 : index
    %189 = vector.load %arg6[%c0_101, %c0_102] : memref<2x64xf32, #tpu.memory_space<vmem>>, vector<2x64xf32>
    tpu.vector_store %arg6[%c0_101, %c0_102], %188 {strides = array<i32>} : memref<2x64xf32, #tpu.memory_space<vmem>>, vector<2x64xf32>,
    %cst_103 = arith.constant 0.000000e+00 : f32
    %190 = vector.broadcast %cst_103 : f32 to vector<2x64xf32>
    %191 = arith.select %185, %183, %190 : vector<2x64xi1>, vector<2x64xf32>
    %c0_104 = arith.constant 0 : index
    %192 = arith.index_cast %c4_i32 : i32 to index
    %c0_105 = arith.constant 0 : index
    %c0_106 = arith.constant 0 : index
    %193 = vector.load %arg4[%c0_104, %192, %c0_105, %c0_106] : memref<1x8x2x64xf32, #tpu.memory_space<vmem>>, vector<1x1x2x64xf32>
    %194 = vector.shape_cast %193 : vector<1x1x2x64xf32> to vector<2x64xf32>
    %195 = vector.shape_cast %191 : vector<2x64xf32> to vector<1x1x2x64xf32>
    tpu.vector_store %arg4[%c0_104, %192, %c0_105, %c0_106], %195 {strides = array<i32>} : memref<1x8x2x64xf32, #tpu.memory_space<vmem>>, vector<1x1x2x64xf32>,
    %c5_i32 = arith.constant 5 : i32
    %c0_107 = arith.constant 0 : index
    %196 = arith.index_cast %c5_i32 : i32 to index
    %c0_108 = arith.constant 0 : index
    %c0_109 = arith.constant 0 : index
    %197 = vector.load %arg1[%c0_107, %196, %c0_108, %c0_109] : memref<1x8x2x256xf32, #tpu.memory_space<vmem>>, vector<1x1x2x256xf32>
    %198 = vector.shape_cast %197 : vector<1x1x2x256xf32> to vector<2x256xf32>
    %199 = arith.index_cast %c5_i32 : i32 to index
    %c0_110 = arith.constant 0 : index
    %c0_111 = arith.constant 0 : index
    %200 = vector.load %arg3[%199, %c0_110, %c0_111] : memref<8x2x64xf32, #tpu.memory_space<vmem>>, vector<1x2x64xf32>
    %201 = vector.shape_cast %200 : vector<1x2x64xf32> to vector<2x64xf32>
    %c0_112 = arith.constant 0 : index
    %c0_113 = arith.constant 0 : index
    %202 = vector.load %arg5[%c0_112, %c0_113] : memref<2x64xf32, #tpu.memory_space<vmem>>, vector<2x64xf32>
    %c0_114 = arith.constant 0 : index
    %c0_115 = arith.constant 0 : index
    %203 = vector.load %arg6[%c0_114, %c0_115] : memref<2x64xf32, #tpu.memory_space<vmem>>, vector<2x64xf32>
    %cst_116 = arith.constant dense<0.000000e+00> : vector<2x256xf32>
    %204 = tpu.matmul %202, %5, %cst_116 {dimension_numbers = #tpu.dot_dimension_numbers<[1], [0], [0], [1], [0, 0, 1, 1], [], []>} : vector<2x64xf32>, vector<64x256xf32>, vector<2x256xf32> -> vector<2x256xf32>
    %205 = arith.addf %198, %204 : vector<2x256xf32>
    %206 = vector.extract_strided_slice %205 {offsets = [0, 0], sizes = [2, 192], strides = [1, 1]} : vector<2x256xf32> to vector<2x192xf32>
    %207 = arith.negf %206 : vector<2x192xf32>
    %208 = math.exp %207 : vector<2x192xf32>
    %cst_117 = arith.constant 1.000000e+00 : f32
    %209 = vector.broadcast %cst_117 : f32 to vector<2x192xf32>
    %210 = arith.addf %209, %208 : vector<2x192xf32>
    %211 = arith.divf %209, %210 : vector<2x192xf32>
    %212 = vector.extract_strided_slice %205 {offsets = [0, 192], sizes = [2, 64], strides = [1, 1]} : vector<2x256xf32> to vector<2x64xf32>
    %213 = math.tanh %212 : vector<2x64xf32>
    %214 = vector.extract_strided_slice %211 {offsets = [0, 0], sizes = [2, 64], strides = [1, 1]} : vector<2x192xf32> to vector<2x64xf32>
    %215 = vector.extract_strided_slice %211 {offsets = [0, 64], sizes = [2, 64], strides = [1, 1]} : vector<2x192xf32> to vector<2x64xf32>
    %216 = vector.extract_strided_slice %211 {offsets = [0, 128], sizes = [2, 64], strides = [1, 1]} : vector<2x192xf32> to vector<2x64xf32>
    %217 = arith.mulf %215, %203 : vector<2x64xf32>
    %218 = arith.mulf %214, %213 : vector<2x64xf32>
    %219 = arith.addf %217, %218 : vector<2x64xf32>
    %220 = math.tanh %219 : vector<2x64xf32>
    %221 = arith.mulf %216, %220 : vector<2x64xf32>
    %cst_118 = arith.constant 5.000000e-01 : f32
    %222 = vector.broadcast %cst_118 : f32 to vector<2x64xf32>
    %223 = arith.cmpf ogt, %201, %222 : vector<2x64xf32>
    %224 = arith.select %223, %221, %202 : vector<2x64xi1>, vector<2x64xf32>
    %c0_119 = arith.constant 0 : index
    %c0_120 = arith.constant 0 : index
    %225 = vector.load %arg5[%c0_119, %c0_120] : memref<2x64xf32, #tpu.memory_space<vmem>>, vector<2x64xf32>
    tpu.vector_store %arg5[%c0_119, %c0_120], %224 {strides = array<i32>} : memref<2x64xf32, #tpu.memory_space<vmem>>, vector<2x64xf32>,
    %226 = arith.select %223, %219, %203 : vector<2x64xi1>, vector<2x64xf32>
    %c0_121 = arith.constant 0 : index
    %c0_122 = arith.constant 0 : index
    %227 = vector.load %arg6[%c0_121, %c0_122] : memref<2x64xf32, #tpu.memory_space<vmem>>, vector<2x64xf32>
    tpu.vector_store %arg6[%c0_121, %c0_122], %226 {strides = array<i32>} : memref<2x64xf32, #tpu.memory_space<vmem>>, vector<2x64xf32>,
    %cst_123 = arith.constant 0.000000e+00 : f32
    %228 = vector.broadcast %cst_123 : f32 to vector<2x64xf32>
    %229 = arith.select %223, %221, %228 : vector<2x64xi1>, vector<2x64xf32>
    %c0_124 = arith.constant 0 : index
    %230 = arith.index_cast %c5_i32 : i32 to index
    %c0_125 = arith.constant 0 : index
    %c0_126 = arith.constant 0 : index
    %231 = vector.load %arg4[%c0_124, %230, %c0_125, %c0_126] : memref<1x8x2x64xf32, #tpu.memory_space<vmem>>, vector<1x1x2x64xf32>
    %232 = vector.shape_cast %231 : vector<1x1x2x64xf32> to vector<2x64xf32>
    %233 = vector.shape_cast %229 : vector<2x64xf32> to vector<1x1x2x64xf32>
    tpu.vector_store %arg4[%c0_124, %230, %c0_125, %c0_126], %233 {strides = array<i32>} : memref<1x8x2x64xf32, #tpu.memory_space<vmem>>, vector<1x1x2x64xf32>,
    %c6_i32 = arith.constant 6 : i32
    %c0_127 = arith.constant 0 : index
    %234 = arith.index_cast %c6_i32 : i32 to index
    %c0_128 = arith.constant 0 : index
    %c0_129 = arith.constant 0 : index
    %235 = vector.load %arg1[%c0_127, %234, %c0_128, %c0_129] : memref<1x8x2x256xf32, #tpu.memory_space<vmem>>, vector<1x1x2x256xf32>
    %236 = vector.shape_cast %235 : vector<1x1x2x256xf32> to vector<2x256xf32>
    %237 = arith.index_cast %c6_i32 : i32 to index
    %c0_130 = arith.constant 0 : index
    %c0_131 = arith.constant 0 : index
    %238 = vector.load %arg3[%237, %c0_130, %c0_131] : memref<8x2x64xf32, #tpu.memory_space<vmem>>, vector<1x2x64xf32>
    %239 = vector.shape_cast %238 : vector<1x2x64xf32> to vector<2x64xf32>
    %c0_132 = arith.constant 0 : index
    %c0_133 = arith.constant 0 : index
    %240 = vector.load %arg5[%c0_132, %c0_133] : memref<2x64xf32, #tpu.memory_space<vmem>>, vector<2x64xf32>
    %c0_134 = arith.constant 0 : index
    %c0_135 = arith.constant 0 : index
    %241 = vector.load %arg6[%c0_134, %c0_135] : memref<2x64xf32, #tpu.memory_space<vmem>>, vector<2x64xf32>
    %cst_136 = arith.constant dense<0.000000e+00> : vector<2x256xf32>
    %242 = tpu.matmul %240, %5, %cst_136 {dimension_numbers = #tpu.dot_dimension_numbers<[1], [0], [0], [1], [0, 0, 1, 1], [], []>} : vector<2x64xf32>, vector<64x256xf32>, vector<2x256xf32> -> vector<2x256xf32>
    %243 = arith.addf %236, %242 : vector<2x256xf32>
    %244 = vector.extract_strided_slice %243 {offsets = [0, 0], sizes = [2, 192], strides = [1, 1]} : vector<2x256xf32> to vector<2x192xf32>
    %245 = arith.negf %244 : vector<2x192xf32>
    %246 = math.exp %245 : vector<2x192xf32>
    %cst_137 = arith.constant 1.000000e+00 : f32
    %247 = vector.broadcast %cst_137 : f32 to vector<2x192xf32>
    %248 = arith.addf %247, %246 : vector<2x192xf32>
    %249 = arith.divf %247, %248 : vector<2x192xf32>
    %250 = vector.extract_strided_slice %243 {offsets = [0, 192], sizes = [2, 64], strides = [1, 1]} : vector<2x256xf32> to vector<2x64xf32>
    %251 = math.tanh %250 : vector<2x64xf32>
    %252 = vector.extract_strided_slice %249 {offsets = [0, 0], sizes = [2, 64], strides = [1, 1]} : vector<2x192xf32> to vector<2x64xf32>
    %253 = vector.extract_strided_slice %249 {offsets = [0, 64], sizes = [2, 64], strides = [1, 1]} : vector<2x192xf32> to vector<2x64xf32>
    %254 = vector.extract_strided_slice %249 {offsets = [0, 128], sizes = [2, 64], strides = [1, 1]} : vector<2x192xf32> to vector<2x64xf32>
    %255 = arith.mulf %253, %241 : vector<2x64xf32>
    %256 = arith.mulf %252, %251 : vector<2x64xf32>
    %257 = arith.addf %255, %256 : vector<2x64xf32>
    %258 = math.tanh %257 : vector<2x64xf32>
    %259 = arith.mulf %254, %258 : vector<2x64xf32>
    %cst_138 = arith.constant 5.000000e-01 : f32
    %260 = vector.broadcast %cst_138 : f32 to vector<2x64xf32>
    %261 = arith.cmpf ogt, %239, %260 : vector<2x64xf32>
    %262 = arith.select %261, %259, %240 : vector<2x64xi1>, vector<2x64xf32>
    %c0_139 = arith.constant 0 : index
    %c0_140 = arith.constant 0 : index
    %263 = vector.load %arg5[%c0_139, %c0_140] : memref<2x64xf32, #tpu.memory_space<vmem>>, vector<2x64xf32>
    tpu.vector_store %arg5[%c0_139, %c0_140], %262 {strides = array<i32>} : memref<2x64xf32, #tpu.memory_space<vmem>>, vector<2x64xf32>,
    %264 = arith.select %261, %257, %241 : vector<2x64xi1>, vector<2x64xf32>
    %c0_141 = arith.constant 0 : index
    %c0_142 = arith.constant 0 : index
    %265 = vector.load %arg6[%c0_141, %c0_142] : memref<2x64xf32, #tpu.memory_space<vmem>>, vector<2x64xf32>
    tpu.vector_store %arg6[%c0_141, %c0_142], %264 {strides = array<i32>} : memref<2x64xf32, #tpu.memory_space<vmem>>, vector<2x64xf32>,
    %cst_143 = arith.constant 0.000000e+00 : f32
    %266 = vector.broadcast %cst_143 : f32 to vector<2x64xf32>
    %267 = arith.select %261, %259, %266 : vector<2x64xi1>, vector<2x64xf32>
    %c0_144 = arith.constant 0 : index
    %268 = arith.index_cast %c6_i32 : i32 to index
    %c0_145 = arith.constant 0 : index
    %c0_146 = arith.constant 0 : index
    %269 = vector.load %arg4[%c0_144, %268, %c0_145, %c0_146] : memref<1x8x2x64xf32, #tpu.memory_space<vmem>>, vector<1x1x2x64xf32>
    %270 = vector.shape_cast %269 : vector<1x1x2x64xf32> to vector<2x64xf32>
    %271 = vector.shape_cast %267 : vector<2x64xf32> to vector<1x1x2x64xf32>
    tpu.vector_store %arg4[%c0_144, %268, %c0_145, %c0_146], %271 {strides = array<i32>} : memref<1x8x2x64xf32, #tpu.memory_space<vmem>>, vector<1x1x2x64xf32>,
    %c7_i32 = arith.constant 7 : i32
    %c0_147 = arith.constant 0 : index
    %272 = arith.index_cast %c7_i32 : i32 to index
    %c0_148 = arith.constant 0 : index
    %c0_149 = arith.constant 0 : index
    %273 = vector.load %arg1[%c0_147, %272, %c0_148, %c0_149] : memref<1x8x2x256xf32, #tpu.memory_space<vmem>>, vector<1x1x2x256xf32>
    %274 = vector.shape_cast %273 : vector<1x1x2x256xf32> to vector<2x256xf32>
    %275 = arith.index_cast %c7_i32 : i32 to index
    %c0_150 = arith.constant 0 : index
    %c0_151 = arith.constant 0 : index
    %276 = vector.load %arg3[%275, %c0_150, %c0_151] : memref<8x2x64xf32, #tpu.memory_space<vmem>>, vector<1x2x64xf32>
    %277 = vector.shape_cast %276 : vector<1x2x64xf32> to vector<2x64xf32>
    %c0_152 = arith.constant 0 : index
    %c0_153 = arith.constant 0 : index
    %278 = vector.load %arg5[%c0_152, %c0_153] : memref<2x64xf32, #tpu.memory_space<vmem>>, vector<2x64xf32>
    %c0_154 = arith.constant 0 : index
    %c0_155 = arith.constant 0 : index
    %279 = vector.load %arg6[%c0_154, %c0_155] : memref<2x64xf32, #tpu.memory_space<vmem>>, vector<2x64xf32>
    %cst_156 = arith.constant dense<0.000000e+00> : vector<2x256xf32>
    %280 = tpu.matmul %278, %5, %cst_156 {dimension_numbers = #tpu.dot_dimension_numbers<[1], [0], [0], [1], [0, 0, 1, 1], [], []>} : vector<2x64xf32>, vector<64x256xf32>, vector<2x256xf32> -> vector<2x256xf32>
    %281 = arith.addf %274, %280 : vector<2x256xf32>
    %282 = vector.extract_strided_slice %281 {offsets = [0, 0], sizes = [2, 192], strides = [1, 1]} : vector<2x256xf32> to vector<2x192xf32>
    %283 = arith.negf %282 : vector<2x192xf32>
    %284 = math.exp %283 : vector<2x192xf32>
    %cst_157 = arith.constant 1.000000e+00 : f32
    %285 = vector.broadcast %cst_157 : f32 to vector<2x192xf32>
    %286 = arith.addf %285, %284 : vector<2x192xf32>
    %287 = arith.divf %285, %286 : vector<2x192xf32>
    %288 = vector.extract_strided_slice %281 {offsets = [0, 192], sizes = [2, 64], strides = [1, 1]} : vector<2x256xf32> to vector<2x64xf32>
    %289 = math.tanh %288 : vector<2x64xf32>
    %290 = vector.extract_strided_slice %287 {offsets = [0, 0], sizes = [2, 64], strides = [1, 1]} : vector<2x192xf32> to vector<2x64xf32>
    %291 = vector.extract_strided_slice %287 {offsets = [0, 64], sizes = [2, 64], strides = [1, 1]} : vector<2x192xf32> to vector<2x64xf32>
    %292 = vector.extract_strided_slice %287 {offsets = [0, 128], sizes = [2, 64], strides = [1, 1]} : vector<2x192xf32> to vector<2x64xf32>
    %293 = arith.mulf %291, %279 : vector<2x64xf32>
    %294 = arith.mulf %290, %289 : vector<2x64xf32>
    %295 = arith.addf %293, %294 : vector<2x64xf32>
    %296 = math.tanh %295 : vector<2x64xf32>
    %297 = arith.mulf %292, %296 : vector<2x64xf32>
    %cst_158 = arith.constant 5.000000e-01 : f32
    %298 = vector.broadcast %cst_158 : f32 to vector<2x64xf32>
    %299 = arith.cmpf ogt, %277, %298 : vector<2x64xf32>
    %300 = arith.select %299, %297, %278 : vector<2x64xi1>, vector<2x64xf32>
    %c0_159 = arith.constant 0 : index
    %c0_160 = arith.constant 0 : index
    %301 = vector.load %arg5[%c0_159, %c0_160] : memref<2x64xf32, #tpu.memory_space<vmem>>, vector<2x64xf32>
    tpu.vector_store %arg5[%c0_159, %c0_160], %300 {strides = array<i32>} : memref<2x64xf32, #tpu.memory_space<vmem>>, vector<2x64xf32>,
    %302 = arith.select %299, %295, %279 : vector<2x64xi1>, vector<2x64xf32>
    %c0_161 = arith.constant 0 : index
    %c0_162 = arith.constant 0 : index
    %303 = vector.load %arg6[%c0_161, %c0_162] : memref<2x64xf32, #tpu.memory_space<vmem>>, vector<2x64xf32>
    tpu.vector_store %arg6[%c0_161, %c0_162], %302 {strides = array<i32>} : memref<2x64xf32, #tpu.memory_space<vmem>>, vector<2x64xf32>,
    %cst_163 = arith.constant 0.000000e+00 : f32
    %304 = vector.broadcast %cst_163 : f32 to vector<2x64xf32>
    %305 = arith.select %299, %297, %304 : vector<2x64xi1>, vector<2x64xf32>
    %c0_164 = arith.constant 0 : index
    %306 = arith.index_cast %c7_i32 : i32 to index
    %c0_165 = arith.constant 0 : index
    %c0_166 = arith.constant 0 : index
    %307 = vector.load %arg4[%c0_164, %306, %c0_165, %c0_166] : memref<1x8x2x64xf32, #tpu.memory_space<vmem>>, vector<1x1x2x64xf32>
    %308 = vector.shape_cast %307 : vector<1x1x2x64xf32> to vector<2x64xf32>
    %309 = vector.shape_cast %305 : vector<2x64xf32> to vector<1x1x2x64xf32>
    tpu.vector_store %arg4[%c0_164, %306, %c0_165, %c0_166], %309 {strides = array<i32>} : memref<1x8x2x64xf32, #tpu.memory_space<vmem>>, vector<1x1x2x64xf32>,
    %c8_i32 = arith.constant 8 : i32
    return
  }
  func.func @transform_0(%arg0: i32) -> (i32, i32, i32, i32) {
    %c0_i32 = arith.constant 0 : i32
    %c0_i32_0 = arith.constant 0 : i32
    %c0_i32_1 = arith.constant 0 : i32
    %c0_i32_2 = arith.constant 0 : i32
    return %arg0, %c0_i32, %c0_i32_0, %c0_i32_1 : i32, i32, i32, i32
  }
  func.func @transform_1(%arg0: i32) -> (i32, i32, i32) {
    %c0_i32 = arith.constant 0 : i32
    %c0_i32_0 = arith.constant 0 : i32
    %c0_i32_1 = arith.constant 0 : i32
    return %arg0, %c0_i32, %c0_i32_0 : i32, i32, i32
  }
  func.func @transform_2(%arg0: i32) -> (i32, i32, i32) {
    %c0_i32 = arith.constant 0 : i32
    %c0_i32_0 = arith.constant 0 : i32
    %c0_i32_1 = arith.constant 0 : i32
    %c0_i32_2 = arith.constant 0 : i32
    return %c0_i32, %c0_i32_0, %c0_i32_1 : i32, i32, i32
  }
  func.func @transform_3(%arg0: i32) -> (i32, i32, i32, i32) {
    %c0_i32 = arith.constant 0 : i32
    %c0_i32_0 = arith.constant 0 : i32
    %c0_i32_1 = arith.constant 0 : i32
    %c0_i32_2 = arith.constant 0 : i32
    return %arg0, %c0_i32, %c0_i32_0, %c0_i32_1 : i32, i32, i32, i32
  }
}

module attributes {stable_mosaic.version = 11 : i64} {
  func.func @_self_attn_kernel(%arg0: i32, %arg1: memref<1x2x8x64xf32, #tpu.memory_space<vmem>>, %arg2: memref<1x64x192xf32, #tpu.memory_space<vmem>>, %arg3: memref<2x1x8xf32, #tpu.memory_space<vmem>>, %arg4: memref<1x2x8x64xf32, #tpu.memory_space<vmem>>) attributes {dimension_semantics = [#tpu.dimension_semantics<parallel>], iteration_bounds = array<i64: 1>, scalar_prefetch = 0 : i64, scratch_operands = 0 : i64, tpu.core_type = #tpu.core_type<tc>, window_params = [{transform_indices = @transform_0, window_bounds = array<i64: 1, 2, 8, 64>}, {transform_indices = @transform_1, window_bounds = array<i64: 1, 64, 192>}, {pipeline_mode = #tpu.pipeline_mode<synchronous>, transform_indices = @transform_2, window_bounds = array<i64: 2, 1, 8>}, {transform_indices = @transform_3, window_bounds = array<i64: 1, 2, 8, 64>}]} {
    %c0 = arith.constant 0 : index
    %c0_0 = arith.constant 0 : index
    %c0_1 = arith.constant 0 : index
    %c0_2 = arith.constant 0 : index
    %0 = vector.load %arg1[%c0, %c0_0, %c0_1, %c0_2] : memref<1x2x8x64xf32, #tpu.memory_space<vmem>>, vector<1x2x8x64xf32>
    %1 = vector.shape_cast %0 : vector<1x2x8x64xf32> to vector<2x8x64xf32>
    %c0_3 = arith.constant 0 : index
    %c0_4 = arith.constant 0 : index
    %c0_5 = arith.constant 0 : index
    %2 = vector.load %arg2[%c0_3, %c0_4, %c0_5] : memref<1x64x192xf32, #tpu.memory_space<vmem>>, vector<1x64x192xf32>
    %3 = vector.shape_cast %2 : vector<1x64x192xf32> to vector<64x192xf32>
    "tpu.trace_start"() <{level = 10 : i32, message = "bld,da->bla"}> : () -> ()
    %cst = arith.constant dense<0.000000e+00> : vector<2x8x192xf32>
    %4 = tpu.matmul %1, %3, %cst {dimension_numbers = #tpu.dot_dimension_numbers<[2], [0], [0, 1], [1], [0, 0, 0, 1, 1, 1], [], []>} : vector<2x8x64xf32>, vector<64x192xf32>, vector<2x8x192xf32> -> vector<2x8x192xf32>
    "tpu.trace_stop"() : () -> ()
    %5 = vector.extract_strided_slice %4 {offsets = [0, 0, 0], sizes = [2, 8, 64], strides = [1, 1, 1]} : vector<2x8x192xf32> to vector<2x8x64xf32>
    %6 = vector.extract_strided_slice %4 {offsets = [0, 0, 64], sizes = [2, 8, 64], strides = [1, 1, 1]} : vector<2x8x192xf32> to vector<2x8x64xf32>
    %7 = vector.extract_strided_slice %4 {offsets = [0, 0, 128], sizes = [2, 8, 64], strides = [1, 1, 1]} : vector<2x8x192xf32> to vector<2x8x64xf32>
    "tpu.trace_start"() <{level = 10 : i32, message = "bqa,bka->bqk"}> : () -> ()
    %cst_6 = arith.constant dense<0.000000e+00> : vector<2x8x8xf32>
    %8 = tpu.matmul %6, %5, %cst_6 {dimension_numbers = #tpu.dot_dimension_numbers<[2], [2], [1], [1], [0, 0, 0, 1, 1, 1], [0], [0]>} : vector<2x8x64xf32>, vector<2x8x64xf32>, vector<2x8x8xf32> -> vector<2x8x8xf32>
    "tpu.trace_stop"() : () -> ()
    %cst_7 = arith.constant 1.250000e-01 : f32
    %9 = vector.broadcast %cst_7 : f32 to vector<2x8x8xf32>
    %10 = arith.mulf %8, %9 : vector<2x8x8xf32>
    %c0_8 = arith.constant 0 : index
    %c0_9 = arith.constant 0 : index
    %c0_10 = arith.constant 0 : index
    %11 = vector.load %arg3[%c0_8, %c0_9, %c0_10] : memref<2x1x8xf32, #tpu.memory_space<vmem>>, vector<2x1x8xf32>
    %12 = vector.broadcast %11 : vector<2x1x8xf32> to vector<2x8x8xf32>
    %13 = arith.addf %10, %12 : vector<2x8x8xf32>
    %cst_11 = arith.constant dense<0xFF800000> : vector<2x8xf32>
    %14 = vector.multi_reduction <maximumf>, %13, %cst_11 [2] : vector<2x8x8xf32> to vector<2x8xf32>
    %cst_12 = arith.constant 0xFF800000 : f32
    %15 = vector.broadcast %cst_12 : f32 to vector<2x8xf32>
    %16 = arith.maximumf %15, %14 : vector<2x8xf32>
    %17 = vector.shape_cast %16 : vector<2x8xf32> to vector<2x8x1xf32>
    %18 = vector.broadcast %17 : vector<2x8x1xf32> to vector<2x8x8xf32>
    %19 = arith.subf %13, %18 : vector<2x8x8xf32>
    %20 = math.exp %19 : vector<2x8x8xf32>
    %cst_13 = arith.constant dense<0.000000e+00> : vector<2x8xf32>
    %21 = vector.multi_reduction <add>, %20, %cst_13 [2] : vector<2x8x8xf32> to vector<2x8xf32>
    %22 = vector.shape_cast %21 : vector<2x8xf32> to vector<2x8x1xf32>
    %23 = vector.broadcast %22 : vector<2x8x1xf32> to vector<2x8x8xf32>
    %24 = arith.divf %20, %23 : vector<2x8x8xf32>
    "tpu.trace_start"() <{level = 10 : i32, message = "bqk,bka->bqa"}> : () -> ()
    %cst_14 = arith.constant dense<0.000000e+00> : vector<2x8x64xf32>
    %25 = tpu.matmul %24, %7, %cst_14 {dimension_numbers = #tpu.dot_dimension_numbers<[2], [1], [1], [2], [0, 0, 0, 1, 1, 2], [0], [0]>} : vector<2x8x8xf32>, vector<2x8x64xf32>, vector<2x8x64xf32> -> vector<2x8x64xf32>
    "tpu.trace_stop"() : () -> ()
    %c0_15 = arith.constant 0 : index
    %c0_16 = arith.constant 0 : index
    %c0_17 = arith.constant 0 : index
    %c0_18 = arith.constant 0 : index
    %26 = vector.load %arg4[%c0_15, %c0_16, %c0_17, %c0_18] : memref<1x2x8x64xf32, #tpu.memory_space<vmem>>, vector<1x2x8x64xf32>
    %27 = vector.shape_cast %26 : vector<1x2x8x64xf32> to vector<2x8x64xf32>
    %28 = vector.shape_cast %25 : vector<2x8x64xf32> to vector<1x2x8x64xf32>
    tpu.vector_store %arg4[%c0_15, %c0_16, %c0_17, %c0_18], %28 {strides = array<i32>} : memref<1x2x8x64xf32, #tpu.memory_space<vmem>>, vector<1x2x8x64xf32>,
    return
  }
  func.func @transform_0(%arg0: i32) -> (i32, i32, i32, i32) {
    %c0_i32 = arith.constant 0 : i32
    %c0_i32_0 = arith.constant 0 : i32
    %c0_i32_1 = arith.constant 0 : i32
    %c0_i32_2 = arith.constant 0 : i32
    return %arg0, %c0_i32, %c0_i32_0, %c0_i32_1 : i32, i32, i32, i32
  }
  func.func @transform_1(%arg0: i32) -> (i32, i32, i32) {
    %c0_i32 = arith.constant 0 : i32
    %c0_i32_0 = arith.constant 0 : i32
    %c0_i32_1 = arith.constant 0 : i32
    return %arg0, %c0_i32, %c0_i32_0 : i32, i32, i32
  }
  func.func @transform_2(%arg0: i32) -> (i32, i32, i32) {
    %c0_i32 = arith.constant 0 : i32
    %c0_i32_0 = arith.constant 0 : i32
    %c0_i32_1 = arith.constant 0 : i32
    %c0_i32_2 = arith.constant 0 : i32
    return %c0_i32, %c0_i32_0, %c0_i32_1 : i32, i32, i32
  }
  func.func @transform_3(%arg0: i32) -> (i32, i32, i32, i32) {
    %c0_i32 = arith.constant 0 : i32
    %c0_i32_0 = arith.constant 0 : i32
    %c0_i32_1 = arith.constant 0 : i32
    %c0_i32_2 = arith.constant 0 : i32
    return %arg0, %c0_i32, %c0_i32_0, %c0_i32_1 : i32, i32, i32, i32
  }
}

</mosaic_0001>

<bundles_post_ra>
// kernel: audio_visual_text_encoder.7
= control target key start
LH: loop header
LB: loop body
LE: loop exit
PB: predicated region body
PF: predicated region fallthrough
CT: control target
= control target key end

     0   :  { %s826_s12 = smov 0   ;;  %s878_s0 = inlined_call_operand.vmem [shape: f32[3,2,8,32], index: 0, kind: input, shape index: {}]   ;;  %s879_s1 = inlined_call_operand.vmem [shape: f32[3,32,96], index: 1, kind: input, shape index: {}]   ;;  %s880_s2 = inlined_call_operand.vmem [shape: f32[2,1,8], index: 2, kind: input, shape index: {}]   ;;  %s881_s3 = inlined_call_operand.vmem [shape: f32[3,2,8,32], index: 3, kind: output, shape index: {}]  }
   0x1 LB: > { %s695_s13 = sadd.s32 4294967295, %s800_s12   ;;  %p699_p0 = scmp.ge.s32.totalorder %s800_s12, 1  ;;  %s800_s12 = sphi %s826_s12, %s13_s12  }
   0x2   : > { %p147_p1 = scmp.lt.s32.totalorder %s800_s12, 4 }
   0x4   : > { %p148_p2 = pnand %p699_p0, %p147_p1 }
   0x5   : > { %p176_p3 = scmp.lt.s32.totalorder (!%p148_p2), %s695_s13, 2  ;;  %vm197_vm0 = vcmask (!%p148_p2), 261120   ;;  %v802_v8 = vmov (!%p148_p2), 0.0   ;;  %vm803_vm1 = vmmov (!%p148_p2), 0   ;;  %s804_s22 = smov (!%p148_p2), 96   ;;  %vm451_vm2 = vcmask (!%p148_p2), 64512  }
   0x6   : > { %151 = sbr.rel (%p148_p2) target bundleno = 1102 (0x44e), region = 32  ;;  %746 = vmatprep.subr.mxu1 (!%p148_p2), %v802_v8  ;;  %748 = vmatprep.mubr.msk.f32.mxu1 (!%p148_p2), %vm803_vm1, %v802_v8  ;;  %v712_v14 = vld [vmem:[%s880_s2] ss:$0 sm:$0xff] (!%p148_p2)  ;;  %v713_v19 = vld [vmem:[%s880_s2 + $0x1] ss:$0 sm:$0xff] (!%p148_p2)  ;;  %s805_s27 = smov (!%p148_p2), 64  }
   0xd   : > { %s883_s13 = smov (!%p176_p3, %s695_s13), 2 }
   0xe   : > { %s719_s14 = sshll.u32 %s883_s13, 5  ;;  %s718_s15 = sshll.u32 %s883_s13, 4 }
   0xf   : > { %s185_s18 = scalar_lea.vmem %s879_s1, %s719_s14  ;;  %s180_s21 = scalar_lea.vmem %s878_s0, %s718_s15 }
  0x10   : > { %v193_v0 = vld [vmem:[%s185_s18] sm:$0xff]  ;;  %v194_v1 = vld [vmem:[%s185_s18 + $0x8] sm:$0xff]  ;;  %v195_v2 = vld [vmem:[%s185_s18 + $0x10] sm:$0xff]  ;;  %s190_s30 = scalar_lea.vmem %s881_s3, %s718_s15 }
  0x11   : > { %v766_v3 = vpack.c.bf16 %v194_v1, %v193_v0  ;;  %v196_v4 = vld [vmem:[%s185_s18 + $0x18] sm:$0xff]  ;;  %v191_v5 = vld [vmem:[%s180_s21] sm:$0xff]  ;;  %v192_v7 = vld [vmem:[%s180_s21 + $0x8] sm:$0xff] }
  0x12   : > { %v770_v6 = vpack.c.bf16 %v196_v4, %v195_v2  ;;  %743 = vmatprep.mubr.msk.f32.mxu0 %vm197_vm0, %v191_v5 }
  0x13   : > { %767 = vmatprep.subr.bf16.mxu0 %v766_v3 }
  0x14   : > { %769 = vmatpush3.bf16.msra.mxu0 %v766_v3 }
  0x15   : > { %771 = vmatprep.subr.bf16.mxu0 %v770_v6 }
  0x18   : > { %773 = vmatpush3.bf16.msra.mxu0 %v770_v6 }
  0x19   : > { %756 = vmatprep.subr.mxu0 %v802_v8 }
  0x1b   : > { %744 = vmatmul.mubr.msk.f32.vlgmr.msra.gmra.mrb[0].mxu0 %vm197_vm0, %v192_v7 }
  0x1c   : > { %758 = vmatprep.mubr.msk.f32.mxu0 %vm803_vm1, %v802_v8 }
  0xee   : > { %v745_v9 = vpop.f32.mrb[0].mxu0 }
  0xef   : > { %v270_v10 = vpop.f32.mrb[1].mxu0 }
  0xf0   : > { %280 = vrot.lane.b32.xlu0 %v270_v10, %s804_s22  ;;  %747 = vmatpush3.xpose.msk.msra.mxu1 %vm197_vm0, %v270_v10 }
  0xf1   : > { %751 = vmatprep.subr.mxu1 %v802_v8 }
  0xf4   : > { %357 = vrot.lane.b32.xlu0 %v745_v9, %s804_s22 }
 0x162   : > { %v281_v11 = vpop.permute.xlu0 %280 }
 0x163   : > { %749 = vmatmul.mubr.msk.f32.vlgmr.msra.gmra.mrb[0].mxu1 %vm197_vm0, %v281_v11 }
 0x164   : > { %752 = vmatpush3.xpose.msk.msra.mxu1 %vm197_vm0, %v745_v9  ;;  %753 = vmatprep.mubr.msk.f32.mxu1 %vm803_vm1, %v802_v8 }
 0x165   : > { %761 = vmatprep.subr.mxu1 %v802_v8 }
 0x166   : > { %v358_v12 = vpop.permute.xlu0 %357 }
 0x167   : > { %754 = vmatmul.mubr.msk.f32.vlgmr.msra.gmra.mrb[2].mxu1 %vm197_vm0, %v358_v12 }
 0x168   : > { %763 = vmatprep.mubr.msk.f32.mxu1 %vm803_vm1, %v802_v8 }
 0x236   : > { %v352_v13 = vpop.f32.mrb[0].mxu1 }
 0x237   : > { %v433_v15 = vmul.f32 0.17677669, %v352_v13  ;;  %v750_v16 = vpop.f32.mrb[1].mxu1 }
 0x239   : > { %v449_v17 = vadd.f32 %v712_v14, %v433_v15 }
 0x23a   : > { %v429_v18 = vpop.f32.mrb[2].mxu1 }
 0x23b   : > { %v434_v20 = vmul.f32 0.17677669, %v429_v18  ;;  %v755_v21 = vpop.f32.mrb[3].mxu1  ;;  %v452_v22 = vsel %vm451_vm2, %v449_v17, -inf }
 0x23c   : > { %453 = vmax.xlane.f32.xlu1 %v452_v22 }
 0x23d   : > { %v450_v23 = vadd.f32 %v713_v19, %v434_v20 }
 0x23f   : > { %v455_v24 = vsel %vm451_vm2, %v450_v23, -inf }
 0x240   : > { %456 = vmax.xlane.f32.xlu1 %v455_v24 }
 0x251   : > { %474 = vrot.lane.b32.xlu1 %v270_v10, %s805_s27 }
 0x2c9   : > { %v454_v25 = vpop.xlane.xlu1 %453 }
 0x2ca   : > { %v458_v26 = vsub.f32 %v449_v17, %v454_v25 }
 0x2cc   : > { %v460_v27 = vmul.f32 1.442695, %v458_v26 }
 0x2cd   : > { %v457_v28 = vpop.xlane.xlu1 %456 }
 0x2ce   : > { %786 = vpow2.f32 %v460_v27  ;;  %v459_v29 = vsub.f32 %v450_v23, %v457_v28 }
 0x2d0   : > { %v462_v30 = vmul.f32 1.442695, %v459_v29 }
 0x2d1   : > { %v475_v31 = vpop.permute.xlu1 %474 }
 0x2d2   : > { %788 = vpow2.f32 %v462_v30  ;;  %757 = vmatpush3.msra.mxu0 %v475_v31 }
 0x2d8   : > { %v787_v32 = vpop.eup %786 }
 0x2d9   : > { %v464_v33 = vsel %vm451_vm2, %v787_v32, 0.0 }
 0x2da   : > { %465 = vadd.xlane.f32.xlu0 %v464_v33 }
 0x2dc   : > { %v789_v34 = vpop.eup %788 }
 0x2dd   : > { %v467_v35 = vsel %vm451_vm2, %v789_v34, 0.0 }
 0x2de   : > { %468 = vadd.xlane.f32.xlu1 %v467_v35 }
 0x2ef   : > { %550 = vrot.lane.b32.xlu1 %v745_v9, %s805_s27 }
 0x367   : > { %v466_v36 = vpop.xlane.xlu0 %465 }
 0x368   : > { %790 = vrcp.f32 %v466_v36 }
 0x36b   : > { %v469_v37 = vpop.xlane.xlu1 %468 }
 0x36c   : > { %792 = vrcp.f32 %v469_v37 }
 0x36f   : > { %v551_v38 = vpop.permute.xlu1 %550 }
 0x370   : > { %762 = vmatpush3.msra.mxu1 %v551_v38 }
 0x372   : > { %v791_v39 = vpop.eup %790 }
 0x373   : > { %v471_v40 = vmul.f32 %v791_v39, %v787_v32 }
 0x375   : > { %759 = vmatmul.mubr.msk.f32.vlgmr.msra.gmra.mrb[2].mxu0 %vm451_vm2, %v471_v40 }
 0x376   : > { %v793_v41 = vpop.eup %792 }
 0x377   : > { %v473_v42 = vmul.f32 %v793_v41, %v789_v34 }
 0x379   : > { %764 = vmatmul.mubr.msk.f32.vlgmr.msra.gmra.mrb[4].mxu1 %vm451_vm2, %v473_v42 }
 0x448   : > { %v546_v43 = vpop.f32.mrb[2].mxu0 }
 0x449   : > { %626 = vst.msk [vmem:[%s190_s30] sm:$0xff] %vm197_vm0, %v546_v43  ;;  %v760_v44 = vpop.f32.mrb[3].mxu0 }
 0x44c   : > { %v622_v45 = vpop.f32.mrb[4].mxu1 }
 0x44d   : > { %627 = vst.msk [vmem:[%s190_s30 + $0x8] sm:$0xff] %vm197_vm0, %v622_v45  ;;  %v765_v46 = vpop.f32.mrb[5].mxu1 }
 0x44e PF: > { %s13_s12 = sadd.s32 1, %s800_s12  }
 0x44f   : > { %p10_p4 = scmp.ge.s32.totalorder %s13_s12, 5  }
 0x451   :  { %12 = sbr.rel (!%p10_p4) target bundleno = 1 (0x1), region = 65 }

// kernel: audio_visual_text_encoder.8
= control target key start
LH: loop header
LB: loop body
LE: loop exit
PB: predicated region body
PF: predicated region fallthrough
CT: control target
= control target key end

     0   :  { %s1138_s0 = inlined_call_operand.vmem [shape: s32[6], index: 0, kind: input, shape index: {}]   ;;  %s1139_s2 = inlined_call_operand.vmem [shape: f32[3,2,8,32], index: 2, kind: input, shape index: {}, may-alias: {2,3}]   ;;  %s1140_s3 = inlined_call_operand.vmem [shape: f32[3,2,8,32], index: 3, kind: input, shape index: {}, may-alias: {2,3}]   ;;  %s1141_s4 = inlined_call_operand.vmem [shape: f32[6,32,32], index: 4, kind: input, shape index: {}]   ;;  %s1142_s5 = inlined_call_operand.vmem [shape: f32[6,32,64], index: 5, kind: input, shape index: {}]   ;;  %s1143_s6 = inlined_call_operand.vmem [shape: f32[6,2,8,32], index: 6, kind: output, shape index: {}]   ;;  %s1144_s1 = inlined_call_operand.vmem [shape: s32[6], index: 1, kind: input, shape index: {}]  }
   0x1   :  { %s11_s23 = sshll.u32 %s1138_s0, 4  ;;  %s15_s26 = sshll.u32 %s1144_s1, 4  ;;  %s12_s23 = int_to_ptr.vmem [resolvable:$true] %s11_s23  ;;  %s16_s26 = int_to_ptr.vmem [resolvable:$true] %s15_s26 }
   0x2   :  { %s1012_s27 = scalar_lea.vmem %s12_s23, 16  ;;  %p1017_p1 = scmp.lt.s32.totalorder %s12_s23, %s12_s23 }
   0x3   :  { %p1013_p0 = scmp.ne.s32.totalorder %s12_s23, %s1012_s27  ;;  %p1018_p2 = scmp.lt.s32.totalorder %s1012_s27, %s1012_s27 }
   0x5   :  { %p1019_p3 = por %p1018_p2, %p1017_p1 }
   0x7   :  { %p1020_p4 = pnand %p1019_p3, %p1013_p0 }
   0x9   :  { %1023 = shalt.err (!%p1020_p4)  }
   0xa   :  { %s1046_s28 = smov [#allocation3]   ;;  %s1024_s29 = scalar_lea.vmem %s16_s26, 16 }
   0xb   :  { %14 = dma.vmem_to_smem %s12_s23, 16, %s1046_s28, [#allocation2] }
   0xc   :  { %p1025_p5 = scmp.ne.s32.totalorder %s16_s26, %s1024_s29  ;;  %p1029_p6 = scmp.lt.s32.totalorder %s16_s26, %s16_s26 }
   0xd   :  { %p1030_p7 = scmp.lt.s32.totalorder %s1024_s29, %s1024_s29 }
   0xf   :  { %p1031_p8 = por %p1030_p7, %p1029_p6 }
  0x11   :  { %p1032_p9 = pnand %p1031_p8, %p1025_p5 }
  0x13   :  { %1035 = shalt.err (!%p1032_p9)  }
  0x14   :  { %s1047_s0 = smov [#allocation4]  }
  0x15   :  { %18 = dma.vmem_to_smem %s16_s26, 16, %s1047_s0, [#allocation2] }
  0x16   :  { %1040 = dma.done.wait [#allocation2], 32 }
  0x17   :  { %1041 = vsyncadd [#allocation2], 4294967264 }
  0x18   :  { %20 = sfence }
  0x19   :  { %s1092_s1 = smov 0  }
  0x1a LB: > { %s881_s30 = sadd.s32 4294967295, %s1044_s1   ;;  %p885_p10 = scmp.ge.s32.totalorder %s1044_s1, 1  ;;  %s1044_s1 = sphi %s1092_s1, %s26_s1  }
  0x1b   : > { %p212_p11 = scmp.lt.s32.totalorder %s1044_s1, 7 }
  0x1d   : > { %p213_p12 = pnand %p885_p10, %p212_p11 }
  0x1e   : > { %p269_p13 = scmp.lt.s32.totalorder (!%p213_p12), %s881_s30, 5  ;;  %s262_s7 = sld [smem:[#allocation4 + %s881_s30]] (!%p213_p12)  ;;  %vm292_vm0 = vcmask (!%p213_p12), 261120   ;;  %v1048_v16 = vmov (!%p213_p12), 0.0   ;;  %vm1049_vm1 = vmmov (!%p213_p12), 0   ;;  %vm613_vm2 = vcmask (!%p213_p12), 64512  }
  0x1f   : > { %216 = sbr.rel (%p213_p12) target bundleno = 1017 (0x3f9), region = 36  ;;  %s255_s8 = sld [smem:[#allocation3 + %s881_s30]] (!%p213_p12) }
  0x20   : > { %s1050_s24 = smov (!%p213_p12), 96  }
  0x24   : > { %p263_p0 = scmp.lt.s32.totalorder (!%p213_p12), %s262_s7, 2 }
  0x25   : > { %p256_p1 = scmp.lt.s32.totalorder (!%p213_p12), %s255_s8, 2 }
  0x26   : > { %s1146_s30 = smov (!%p269_p13, %s881_s30), 5  ;;  %s1148_s7 = smov (!%p263_p0, %s262_s7), 2 }
  0x27   : > { %s910_s9 = sshll.u32 %s1146_s30, 5  ;;  %s1150_s8 = smov (!%p256_p1, %s255_s8), 2 }
  0x28   : > { %s278_s12 = scalar_lea.vmem %s1142_s5, %s910_s9  ;;  %s273_s15 = scalar_lea.vmem %s1141_s4, %s910_s9 }
  0x29   : > { %v374_v0 = vld [vmem:[%s278_s12] sm:$0xff]  ;;  %v375_v1 = vld [vmem:[%s278_s12 + $0x8] sm:$0xff]  ;;  %v376_v5 = vld [vmem:[%s278_s12 + $0x10] sm:$0xff]  ;;  %s909_s16 = sshll.u32 %s1148_s7, 4  ;;  %s908_s20 = sshll.u32 %s1150_s8, 4 }
  0x2a   : > { %v288_v2 = vld [vmem:[%s273_s15] sm:$0xff]  ;;  %v983_v3 = vpack.c.bf16 %v375_v1, %v374_v0  ;;  %v289_v4 = vld [vmem:[%s273_s15 + $0x8] sm:$0xff]  ;;  %v377_v6 = vld [vmem:[%s278_s12 + $0x18] sm:$0xff]  ;;  %s267_s19 = scalar_lea.vmem %s1140_s3, %s909_s16  ;;  %s260_s23 = scalar_lea.vmem %s1139_s2, %s908_s20 }
  0x2b   : > { %v975_v7 = vpack.c.bf16 %v289_v4, %v288_v2  ;;  %v987_v8 = vpack.c.bf16 %v377_v6, %v376_v5  ;;  %v290_v9 = vld [vmem:[%s273_s15 + $0x10] sm:$0xff]  ;;  %v291_v10 = vld [vmem:[%s273_s15 + $0x18] sm:$0xff]  ;;  %v286_v12 = vld [vmem:[%s267_s19] sm:$0xff]  ;;  %s912_s25 = sshll.u32 %s1146_s30, 4 }
  0x2c   : > { %984 = vmatprep.subr.bf16.mxu1 %v983_v3  ;;  %v979_v11 = vpack.c.bf16 %v291_v10, %v290_v9  ;;  %952 = vmatprep.mubr.msk.f32.mxu1 %vm292_vm0, %v286_v12  ;;  %v284_v13 = vld [vmem:[%s260_s23] sm:$0xff]  ;;  %v287_v14 = vld [vmem:[%s267_s19 + $0x8] sm:$0xff]  ;;  %s283_s28 = scalar_lea.vmem %s1143_s6, %s912_s25 }
  0x2d   : > { %986 = vmatpush3.bf16.msra.mxu1 %v983_v3  ;;  %976 = vmatprep.subr.bf16.mxu0 %v975_v7  ;;  %v285_v15 = vld [vmem:[%s260_s23 + $0x8] sm:$0xff] }
  0x2e   : > { %978 = vmatpush3.bf16.msra.mxu0 %v975_v7  ;;  %988 = vmatprep.subr.bf16.mxu1 %v987_v8 }
  0x2f   : > { %980 = vmatprep.subr.bf16.mxu0 %v979_v11  ;;  %941 = vmatprep.mubr.msk.f32.mxu0 %vm292_vm0, %v284_v13 }
  0x31   : > { %990 = vmatpush3.bf16.msra.mxu1 %v987_v8 }
  0x32   : > { %982 = vmatpush3.bf16.msra.mxu0 %v979_v11  ;;  %960 = vmatprep.subr.mxu1 %v1048_v16 }
  0x33   : > { %955 = vmatprep.subr.mxu0 %v1048_v16 }
  0x34   : > { %953 = vmatmul.mubr.msk.f32.vlgmr.msra.gmra.mrb[0].mxu1 %vm292_vm0, %v287_v14 }
  0x35   : > { %942 = vmatmul.mubr.msk.f32.vlgmr.msra.gmra.mrb[0].mxu0 %vm292_vm0, %v285_v15  ;;  %962 = vmatprep.mubr.msk.f32.mxu1 %vm1049_vm1, %v1048_v16 }
  0x36   : > { %957 = vmatprep.mubr.msk.f32.mxu0 %vm1049_vm1, %v1048_v16 }
 0x107   : > { %v954_v17 = vpop.f32.mrb[0].mxu1 }
 0x108   : > { %v450_v18 = vpop.f32.mrb[1].mxu1  ;;  %961 = vmatpush3.xpose.msk.msra.mxu1 %vm292_vm0, %v954_v17  ;;  %v943_v19 = vpop.f32.mrb[0].mxu0 }
 0x109   : > { %956 = vmatpush3.xpose.msk.msra.mxu0 %vm292_vm0, %v450_v18  ;;  %v365_v20 = vpop.f32.mrb[1].mxu0  ;;  %970 = vmatprep.subr.mxu1 %v1048_v16 }
 0x10a   : > { %965 = vmatprep.subr.mxu0 %v1048_v16 }
 0x10b   : > { %963 = vmatmul.mubr.msk.f32.vlgmr.msra.gmra.mrb[2].mxu1 %vm292_vm0, %v943_v19 }
 0x10c   : > { %958 = vmatmul.mubr.msk.f32.vlgmr.msra.gmra.mrb[2].mxu0 %vm292_vm0, %v365_v20  ;;  %972 = vmatprep.mubr.msk.f32.mxu1 %vm1049_vm1, %v1048_v16 }
 0x10d   : > { %967 = vmatprep.mubr.msk.f32.mxu0 %vm1049_vm1, %v1048_v16 }
 0x1de   : > { %v607_v21 = vpop.f32.mrb[2].mxu1 }
 0x1df   : > { %v531_v22 = vpop.f32.mrb[2].mxu0  ;;  %v964_v23 = vpop.f32.mrb[3].mxu1  ;;  %v612_v26 = vmul.f32 0.17677669, %v607_v21 }
 0x1e0   : > { %v611_v24 = vmul.f32 0.17677669, %v531_v22  ;;  %v959_v25 = vpop.f32.mrb[3].mxu0 }
 0x1e1   : > { %v617_v28 = vsel %vm613_vm2, %v612_v26, -inf }
 0x1e2   : > { %v614_v27 = vsel %vm613_vm2, %v611_v24, -inf }
 0x1e3   : > { %615 = vmax.xlane.f32.xlu0 %v614_v27 }
 0x1e7   : > { %618 = vmax.xlane.f32.xlu0 %v617_v28 }
 0x1fd   : > { %636 = vrot.lane.b32.xlu0 %v450_v18, %s1050_s24 }
 0x270   : > { %v616_v29 = vpop.xlane.xlu0 %615 }
 0x271   : > { %v620_v30 = vsub.f32 %v611_v24, %v616_v29 }
 0x273   : > { %v622_v33 = vmul.f32 1.442695, %v620_v30 }
 0x274   : > { %v619_v31 = vpop.xlane.xlu0 %618 }
 0x275   : > { %v621_v32 = vsub.f32 %v612_v26, %v619_v31 }
 0x277   : > { %v624_v34 = vmul.f32 1.442695, %v621_v32 }
 0x278   : > { %v637_v35 = vpop.permute.xlu0 %636 }
 0x279   : > { %1004 = vpow2.f32 %v624_v34  ;;  %966 = vmatpush3.msra.mxu0 %v637_v35 }
 0x27a   : > { %1006 = vpow2.f32 %v622_v33 }
 0x283   : > { %v1005_v36 = vpop.eup %1004 }
 0x284   : > { %v629_v37 = vsel %vm613_vm2, %v1005_v36, 0.0  ;;  %v1007_v38 = vpop.eup %1006 }
 0x285   : > { %630 = vadd.xlane.f32.xlu1 %v629_v37  ;;  %v626_v39 = vsel %vm613_vm2, %v1007_v38, 0.0 }
 0x289   : > { %627 = vadd.xlane.f32.xlu1 %v626_v39 }
 0x29a   : > { %712 = vrot.lane.b32.xlu1 %v954_v17, %s1050_s24 }
 0x312   : > { %v631_v40 = vpop.xlane.xlu1 %630 }
 0x313   : > { %1008 = vrcp.f32 %v631_v40 }
 0x316   : > { %v628_v41 = vpop.xlane.xlu1 %627 }
 0x317   : > { %1010 = vrcp.f32 %v628_v41 }
 0x31a   : > { %v713_v42 = vpop.permute.xlu1 %712 }
 0x31b   : > { %971 = vmatpush3.msra.mxu1 %v713_v42 }
 0x31d   : > { %v1009_v43 = vpop.eup %1008 }
 0x31e   : > { %v635_v44 = vmul.f32 %v1009_v43, %v1005_v36 }
 0x320   : > { %973 = vmatmul.mubr.msk.f32.vlgmr.msra.gmra.mrb[4].mxu1 %vm613_vm2, %v635_v44 }
 0x321   : > { %v1011_v45 = vpop.eup %1010 }
 0x322   : > { %v633_v46 = vmul.f32 %v1011_v45, %v1007_v38 }
 0x324   : > { %968 = vmatmul.mubr.msk.f32.vlgmr.msra.gmra.mrb[4].mxu0 %vm613_vm2, %v633_v46 }
 0x3f3   : > { %v784_v47 = vpop.f32.mrb[4].mxu1 }
 0x3f4   : > { %789 = vst.msk [vmem:[%s283_s28 + $0x8] sm:$0xff] %vm292_vm0, %v784_v47  ;;  %v974_v48 = vpop.f32.mrb[5].mxu1 }
 0x3f7   : > { %v708_v49 = vpop.f32.mrb[4].mxu0 }
 0x3f8   : > { %788 = vst.msk [vmem:[%s283_s28] sm:$0xff] %vm292_vm0, %v708_v49  ;;  %v969_v50 = vpop.f32.mrb[5].mxu0 }
 0x3f9 PF: > { %s26_s1 = sadd.s32 1, %s1044_s1  }
 0x3fa   : > { %p23_p2 = scmp.ge.s32.totalorder %s26_s1, 8  }
 0x3fc   :  { %25 = sbr.rel (!%p23_p2) target bundleno = 26 (0x1a), region = 75 }

// kernel: audio_visual_text_encoder.6
= control target key start
LH: loop header
LB: loop body
LE: loop exit
PB: predicated region body
PF: predicated region fallthrough
CT: control target
= control target key end

     0   :  { %s1762_s12 = smov 0   ;;  %s2043_s0 = inlined_call_operand.vmem [shape: f32[3,8,2,256], index: 0, kind: input, shape index: {}]   ;;  %s2044_s1 = inlined_call_operand.vmem [shape: f32[3,64,256], index: 1, kind: input, shape index: {}]   ;;  %s2045_s2 = inlined_call_operand.vmem [shape: f32[8,2,64], index: 2, kind: input, shape index: {}]   ;;  %s2046_s3 = inlined_call_operand.vmem [shape: f32[3,8,2,64], index: 3, kind: output, shape index: {}]  }
   0x1 LB: > { %s1475_s13 = sadd.s32 4294967295, %s1737_s12   ;;  %p1479_p0 = scmp.ge.s32.totalorder %s1737_s12, 1  ;;  %s1737_s12 = sphi %s1762_s12, %s13_s12  }
   0x2   : > { %p147_p1 = scmp.lt.s32.totalorder %s1737_s12, 4 }
   0x4   : > { %p148_p2 = pnand %p1479_p0, %p147_p1 }
   0x5   : > { %p176_p3 = scmp.lt.s32.totalorder (!%p148_p2), %s1475_s13, 2  ;;  %vm191_vm0 = vcmask (!%p148_p2), 517120   ;;  %v1739_v0 = vmov (!%p148_p2), 0.0   ;;  %vm214_vm1 = vcmask (!%p148_p2), 523264   ;;  %v1740_v26 = vmov (!%p148_p2), 1983009808  }
   0x6   : > { %151 = sbr.rel (%p148_p2) target bundleno = 4852 (0x12f4), region = 32  ;;  %192 = vst.msk [vmem:[#allocation2] sm:$0x3] (!%p148_p2), %vm191_vm0, %v1739_v0  ;;  %193 = vst.msk [vmem:[#allocation3] sm:$0x3] (!%p148_p2), %vm191_vm0, %v1739_v0  ;;  %282 = vmatprep.mubr.f32.mxu0 (!%p148_p2), %v1739_v0  ;;  %431 = vmatprep.mubr.f32.mxu1 (!%p148_p2), %v1739_v0  ;;  %v293_v27 = vunpack.c.l.s4 (!%p148_p2), %v1740_v26  ;;  %v295_v28 = vlaneseq (!%p148_p2)  ;;  %s1741_s22 = smov (!%p148_p2), 64  }
   0x7   : > { %v211_v54 = vld [vmem:[%s2045_s2] sm:$0x3] (!%p148_p2) }
   0x8   : > { %v294_v29 = vunpack.c.0.s8 (!%p148_p2), %v293_v27  ;;  %v296_v30 = vshrl.u32 (!%p148_p2), %v295_v28, 7  ;;  %vm340_vm2 = vcmp.gt.f32.partialorder (!%p148_p2), %v211_v54, 0.5 }
   0xa   : > { %v1848_v32 = vsub.s32 (!%p148_p2), %v294_v29, %v296_v30  ;;  %v1489_v30 = vld [vmem:[%s2045_s2 + $0x2] sm:$0x3] (!%p148_p2) }
   0xb   : > { %vm489_vm3 = vcmp.gt.f32.partialorder (!%p148_p2), %v1489_v30, 0.5 }
   0xd   : > { %s2048_s13 = smov (!%p176_p3, %s1475_s13), 2  ;;  %v1831_v25 = vld [vmem:[#allocation2] sm:$0x3]  ;;  %v213_v37 = vld [vmem:[#allocation3] sm:$0x3] }
   0xe   : > { %s1526_s14 = sshll.u32 %s2048_s13, 7  ;;  %s1525_s18 = sshll.u32 %s2048_s13, 5  ;;  %v320_v39 = vrot.slane %v213_v37, %v1848_v32 }
   0xf   : > { %s1782_s17 = scalar_lea.vmem %s2044_s1, %s1526_s14  ;;  %s1853_s21 = scalar_lea.vmem %s2043_s0, %s1525_s18 }
  0x10   : > { %v195_v1 = vld [vmem:[%s1782_s17 + $0x8] sm:$0xff]  ;;  %v197_v2 = vld [vmem:[%s1782_s17 + $0x18] sm:$0xff]  ;;  %v194_v3 = vld [vmem:[%s1782_s17] sm:$0xff]  ;;  %s1527_s25 = sshll.u32 %s2048_s13, 4 }
  0x11   : > { %v1787_v4 = vpack.c.bf16 %v197_v2, %v195_v1  ;;  %v196_v5 = vld [vmem:[%s1782_s17 + $0x10] sm:$0xff]  ;;  %v199_v6 = vld [vmem:[%s1782_s17 + $0x28] sm:$0xff]  ;;  %v201_v7 = vld [vmem:[%s1782_s17 + $0x38] sm:$0xff]  ;;  %s1871_s28 = scalar_lea.vmem %s2046_s3, %s1527_s25 }
  0x12   : > { %v1792_v8 = vpack.c.bf16 %v196_v5, %v194_v3  ;;  %v1794_v9 = vpack.c.bf16 %v201_v7, %v199_v6  ;;  %v198_v10 = vld [vmem:[%s1782_s17 + $0x20] sm:$0xff]  ;;  %v200_v11 = vld [vmem:[%s1782_s17 + $0x30] sm:$0xff]  ;;  %v203_v12 = vld [vmem:[%s1782_s17 + $0x48] sm:$0xff] }
  0x13   : > { %1529 = vmatprep.subr.bf16.mxu0 %v1787_v4  ;;  %v205_v13 = vld [vmem:[%s1782_s17 + $0x58] sm:$0xff]  ;;  %1545 = vmatprep.subr.bf16.mxu1 %v1787_v4  ;;  %v1803_v14 = vpack.c.bf16 %v200_v11, %v198_v10  ;;  %v202_v16 = vld [vmem:[%s1782_s17 + $0x40] sm:$0xff]  ;;  %v204_v17 = vld [vmem:[%s1782_s17 + $0x50] sm:$0xff] }
  0x14   : > { %1531 = vmatpush1.bf16.msra.mxu0 %v1792_v8  ;;  %1547 = vmatpush1.bf16.msra.mxu1 %v1792_v8  ;;  %v1807_v15 = vpack.c.bf16 %v205_v13, %v203_v12  ;;  %v207_v18 = vld [vmem:[%s1782_s17 + $0x68] sm:$0xff]  ;;  %v209_v19 = vld [vmem:[%s1782_s17 + $0x78] sm:$0xff]  ;;  %v1815_v20 = vpack.c.bf16 %v204_v17, %v202_v16  ;;  %v206_v22 = vld [vmem:[%s1782_s17 + $0x60] sm:$0xff] }
  0x15   : > { %1533 = vmatprep.subr.bf16.mxu0 %v1794_v9  ;;  %1549 = vmatprep.subr.bf16.mxu1 %v1794_v9  ;;  %v1819_v21 = vpack.c.bf16 %v209_v19, %v207_v18  ;;  %v208_v23 = vld [vmem:[%s1782_s17 + $0x70] sm:$0xff]  ;;  %v210_v35 = vld [vmem:[%s1853_s21] sm:$0xf]  ;;  %v1488_v3 = vld [vmem:[%s1853_s21 + $0x4] sm:$0xf] }
  0x16   : > { %v1825_v24 = vpack.c.bf16 %v208_v23, %v206_v22 }
  0x18   : > { %1535 = vmatpush1.bf16.msra.mxu0 %v1803_v14  ;;  %1551 = vmatpush1.bf16.msra.mxu1 %v1803_v14 }
  0x19   : > { %1537 = vmatprep.subr.bf16.mxu0 %v1807_v15  ;;  %1553 = vmatprep.subr.bf16.mxu1 %v1807_v15 }
  0x1c   : > { %1539 = vmatpush1.bf16.msra.mxu0 %v1815_v20  ;;  %1555 = vmatpush1.bf16.msra.mxu1 %v1815_v20 }
  0x1d   : > { %1541 = vmatprep.subr.bf16.mxu0 %v1819_v21  ;;  %1557 = vmatprep.subr.bf16.mxu1 %v1819_v21 }
  0x20   : > { %1543 = vmatpush1.bf16.msra.mxu0 %v1825_v24  ;;  %1559 = vmatpush1.bf16.msra.mxu1 %v1825_v24 }
  0x21   : > { %1561 = vmatprep.subr.bf16.mxu0 %v1787_v4  ;;  %1577 = vmatprep.subr.bf16.mxu1 %v1787_v4 }
  0x23   : > { %1486 = vmatmul.mubr.msk.f32.vlgmr.msra.gmra.mrb[0].mxu0 %vm214_vm1, %v1831_v25 }
  0x24   : > { %1563 = vmatpush1.bf16.msra.mxu0 %v1792_v8  ;;  %581 = vmatprep.mubr.f32.mxu0 %v1739_v0 }
  0x25   : > { %1565 = vmatprep.subr.bf16.mxu0 %v1794_v9 }
  0x28   : > { %1567 = vmatpush1.bf16.msra.mxu0 %v1803_v14 }
  0x29   : > { %1569 = vmatprep.subr.bf16.mxu0 %v1807_v15 }
  0x2c   : > { %1571 = vmatpush1.bf16.msra.mxu0 %v1815_v20 }
  0x2d   : > { %1573 = vmatprep.subr.bf16.mxu0 %v1819_v21 }
  0x30   : > { %1575 = vmatpush1.bf16.msra.mxu0 %v1825_v24 }
  0x31   : > { %1593 = vmatprep.subr.bf16.mxu0 %v1787_v4 }
  0xf6   : > { %v284_v31 = vpop.f32.mrb[0].mxu0 }
  0xf7   : > { %v286_v33 = vpop.f32.mrb[1].mxu0 }
  0xf8   : > { %v291_v34 = vcombine.low %v284_v31, %v286_v33 }
  0xfa   : > { %v298_v36 = vrot.slane %v291_v34, %v1848_v32 }
  0xfc   : > { %v300_v38 = vadd.f32 %v298_v36, %v210_v35 }
  0xfe   : > { %308 = vrot.lane.b32.xlu0 %v300_v38, %s1741_s22  ;;  %v1487_v40 = vmul.f32 -1.442695, %v300_v38 }
 0x100   : > { %1667 = vpow2.f32 %v1487_v40 }
 0x102   : > { %321 = vrot.lane.b32.xlu0 %v320_v39, %s1741_s22 }
 0x10a   : > { %v1668_v41 = vpop.eup %1667 }
 0x10b   : > { %v304_v42 = vadd.f32 1.0, %v1668_v41 }
 0x10d   : > { %1669 = vrcp.f32 %v304_v42 }
 0x117   : > { %v1670_v45 = vpop.eup %1669 }
 0x118   : > { %v333_v55 = vrot.slane %v1670_v45, 2 }
 0x170   : > { %v309_v43 = vpop.permute.xlu0 %308 }
 0x171   : > { %v310_v44 = vrot.slane %v309_v43, 2  ;;  %v1493_v43 = vld [vmem:[%s1853_s21 + $0x8] sm:$0xf] }
 0x173   : > { %1671 = vtanh.f32 %v310_v44 }
 0x174   : > { %v322_v48 = vpop.permute.xlu0 %321 }
 0x175   : > { %v324_v49 = vmul.f32 %v1670_v45, %v322_v48 }
 0x17d   : > { %v1672_v46 = vpop.eup %1671 }
 0x17e   : > { %v325_v47 = vmul.f32 %v1672_v46, %v1670_v45 }
 0x180   : > { %327 = vrot.lane.b32.xlu1 %v325_v47, %s1741_s22 }
 0x1f2   : > { %v328_v50 = vpop.permute.xlu1 %327 }
 0x1f3   : > { %v330_v51 = vadd.f32 %v328_v50, %v324_v49 }
 0x1f5   : > { %1673 = vtanh.f32 %v330_v51  ;;  %v350_v53 = vrot.slane %v330_v51, %v1848_v32 }
 0x1ff   : > { %v1674_v52 = vpop.eup %1673 }
 0x200   : > { %336 = vrot.lane.b32.xlu1 %v1674_v52, %s1741_s22 }
 0x204   : > { %351 = vrot.lane.b32.xlu1 %v350_v53, %s1741_s22 }
 0x272   : > { %v337_v56 = vpop.permute.xlu1 %336 }
 0x273   : > { %v339_v57 = vmul.f32 %v337_v56, %v333_v55 }
 0x275   : > { %v341_v58 = vsel %vm340_vm2, %v339_v57, %v1831_v25  ;;  %v356_v59 = vsel %vm340_vm2, %v339_v57, 0.0 }
 0x276   : > { %342 = vst.msk [vmem:[#allocation2] sm:$0x3] %vm191_vm0, %v341_v58  ;;  %357 = vst.msk [vmem:[%s1871_s28] sm:$0x3] %vm191_vm0, %v356_v59  ;;  %v352_v60 = vpop.permute.xlu1 %351 }
 0x277   : > { %v354_v61 = vsel %vm340_vm2, %v352_v60, %v213_v37 }
 0x278   : > { %355 = vst.msk [vmem:[#allocation3] sm:$0x3] %vm191_vm0, %v354_v61 }
 0x27d   : > { %v362_v62 = vld [vmem:[#allocation2] sm:$0x3] }
 0x27e   : > { %1490 = vmatmul.mubr.msk.f32.vlgmr.msra.gmra.mrb[0].mxu1 %vm214_vm1, %v362_v62 }
 0x27f   : > { %1579 = vmatpush1.bf16.msra.mxu1 %v1792_v8  ;;  %731 = vmatprep.mubr.f32.mxu1 %v1739_v0  ;;  %v363_v7 = vld [vmem:[#allocation3] sm:$0x3] }
 0x280   : > { %1581 = vmatprep.subr.bf16.mxu1 %v1794_v9  ;;  %v469_v10 = vrot.slane %v363_v7, %v1848_v32 }
 0x283   : > { %1583 = vmatpush1.bf16.msra.mxu1 %v1803_v14 }
 0x284   : > { %1585 = vmatprep.subr.bf16.mxu1 %v1807_v15 }
 0x287   : > { %1587 = vmatpush1.bf16.msra.mxu1 %v1815_v20 }
 0x288   : > { %1589 = vmatprep.subr.bf16.mxu1 %v1819_v21 }
 0x28b   : > { %1591 = vmatpush1.bf16.msra.mxu1 %v1825_v24 }
 0x28c   : > { %1609 = vmatprep.subr.bf16.mxu1 %v1787_v4 }
 0x351   : > { %v433_v63 = vpop.f32.mrb[0].mxu1 }
 0x352   : > { %v435_v1 = vpop.f32.mrb[1].mxu1 }
 0x353   : > { %v440_v2 = vcombine.low %v433_v63, %v435_v1 }
 0x355   : > { %v447_v5 = vrot.slane %v440_v2, %v1848_v32 }
 0x357   : > { %v449_v6 = vadd.f32 %v1488_v3, %v447_v5 }
 0x359   : > { %457 = vrot.lane.b32.xlu0 %v449_v6, %s1741_s22  ;;  %v1491_v11 = vmul.f32 -1.442695, %v449_v6 }
 0x35b   : > { %1675 = vpow2.f32 %v1491_v11 }
 0x35d   : > { %470 = vrot.lane.b32.xlu0 %v469_v10, %s1741_s22 }
 0x365   : > { %v1676_v12 = vpop.eup %1675 }
 0x366   : > { %v453_v13 = vadd.f32 1.0, %v1676_v12 }
 0x368   : > { %1677 = vrcp.f32 %v453_v13 }
 0x372   : > { %v1678_v18 = vpop.eup %1677 }
 0x373   : > { %v482_v31 = vrot.slane %v1678_v18, 2 }
 0x3cb   : > { %v458_v16 = vpop.permute.xlu0 %457 }
 0x3cc   : > { %v459_v17 = vrot.slane %v458_v16, 2  ;;  %v1498_v16 = vld [vmem:[%s1853_s21 + $0xc] sm:$0xf] }
 0x3ce   : > { %1679 = vtanh.f32 %v459_v17 }
 0x3cf   : > { %v471_v23 = vpop.permute.xlu0 %470 }
 0x3d0   : > { %v473_v25 = vmul.f32 %v1678_v18, %v471_v23 }
 0x3d8   : > { %v1680_v19 = vpop.eup %1679 }
 0x3d9   : > { %v474_v22 = vmul.f32 %v1680_v19, %v1678_v18 }
 0x3db   : > { %476 = vrot.lane.b32.xlu1 %v474_v22, %s1741_s22 }
 0x44d   : > { %v477_v26 = vpop.permute.xlu1 %476 }
 0x44e   : > { %v479_v27 = vadd.f32 %v477_v26, %v473_v25 }
 0x450   : > { %1681 = vtanh.f32 %v479_v27  ;;  %v499_v29 = vrot.slane %v479_v27, %v1848_v32 }
 0x45a   : > { %v1682_v28 = vpop.eup %1681 }
 0x45b   : > { %485 = vrot.lane.b32.xlu0 %v1682_v28, %s1741_s22 }
 0x45f   : > { %500 = vrot.lane.b32.xlu0 %v499_v29, %s1741_s22 }
 0x4cd   : > { %v486_v33 = vpop.permute.xlu0 %485 }
 0x4ce   : > { %v488_v34 = vmul.f32 %v486_v33, %v482_v31 }
 0x4d0   : > { %v490_v35 = vsel %vm489_vm3, %v488_v34, %v362_v62  ;;  %v505_v36 = vsel %vm489_vm3, %v488_v34, 0.0  ;;  %v1494_v62 = vld [vmem:[%s2045_s2 + $0x4] sm:$0x3] }
 0x4d1   : > { %491 = vst.msk [vmem:[#allocation2] sm:$0x3] %vm191_vm0, %v490_v35  ;;  %1492 = vst.msk [vmem:[%s1871_s28 + $0x2] sm:$0x3] %vm191_vm0, %v505_v36  ;;  %v501_v37 = vpop.permute.xlu0 %500  ;;  %vm639_vm4 = vcmp.gt.f32.partialorder %v1494_v62, 0.5 }
 0x4d2   : > { %v503_v38 = vsel %vm489_vm3, %v501_v37, %v363_v7 }
 0x4d3   : > { %504 = vst.msk [vmem:[#allocation3] sm:$0x3] %vm191_vm0, %v503_v38  ;;  %v1499_v38 = vld [vmem:[%s2045_s2 + $0x6] sm:$0x3] }
 0x4d4   : > { %vm789_vm5 = vcmp.gt.f32.partialorder %v1499_v38, 0.5 }
 0x4d8   : > { %v512_v39 = vld [vmem:[#allocation2] sm:$0x3] }
 0x4d9   : > { %1495 = vmatmul.mubr.msk.f32.vlgmr.msra.gmra.mrb[2].mxu0 %vm214_vm1, %v512_v39 }
 0x4da   : > { %1595 = vmatpush1.bf16.msra.mxu0 %v1792_v8  ;;  %881 = vmatprep.mubr.f32.mxu0 %v1739_v0  ;;  %v513_v46 = vld [vmem:[#allocation3] sm:$0x3] }
 0x4db   : > { %1597 = vmatprep.subr.bf16.mxu0 %v1794_v9  ;;  %v619_v47 = vrot.slane %v513_v46, %v1848_v32 }
 0x4de   : > { %1599 = vmatpush1.bf16.msra.mxu0 %v1803_v14 }
 0x4df   : > { %1601 = vmatprep.subr.bf16.mxu0 %v1807_v15 }
 0x4e2   : > { %1603 = vmatpush1.bf16.msra.mxu0 %v1815_v20 }
 0x4e3   : > { %1605 = vmatprep.subr.bf16.mxu0 %v1819_v21 }
 0x4e6   : > { %1607 = vmatpush1.bf16.msra.mxu0 %v1825_v24 }
 0x4e7   : > { %1625 = vmatprep.subr.bf16.mxu0 %v1787_v4 }
 0x5ac   : > { %v583_v40 = vpop.f32.mrb[2].mxu0 }
 0x5ad   : > { %v585_v41 = vpop.f32.mrb[3].mxu0 }
 0x5ae   : > { %v590_v42 = vcombine.low %v583_v40, %v585_v41 }
 0x5b0   : > { %v597_v44 = vrot.slane %v590_v42, %v1848_v32 }
 0x5b2   : > { %v599_v45 = vadd.f32 %v1493_v43, %v597_v44 }
 0x5b4   : > { %607 = vrot.lane.b32.xlu1 %v599_v45, %s1741_s22  ;;  %v1496_v48 = vmul.f32 -1.442695, %v599_v45 }
 0x5b6   : > { %1683 = vpow2.f32 %v1496_v48 }
 0x5b8   : > { %620 = vrot.lane.b32.xlu1 %v619_v47, %s1741_s22 }
 0x5c0   : > { %v1684_v49 = vpop.eup %1683 }
 0x5c1   : > { %v603_v50 = vadd.f32 1.0, %v1684_v49 }
 0x5c3   : > { %1685 = vrcp.f32 %v603_v50  ;;  %v1503_v50 = vld [vmem:[%s1853_s21 + $0x10] sm:$0xf] }
 0x5cd   : > { %v1686_v53 = vpop.eup %1685 }
 0x5ce   : > { %v632_v63 = vrot.slane %v1686_v53, 2 }
 0x626   : > { %v608_v51 = vpop.permute.xlu1 %607 }
 0x627   : > { %v609_v52 = vrot.slane %v608_v51, 2 }
 0x629   : > { %1687 = vtanh.f32 %v609_v52 }
 0x62a   : > { %v621_v56 = vpop.permute.xlu1 %620 }
 0x62b   : > { %v623_v57 = vmul.f32 %v1686_v53, %v621_v56 }
 0x633   : > { %v1688_v54 = vpop.eup %1687 }
 0x634   : > { %v624_v55 = vmul.f32 %v1688_v54, %v1686_v53 }
 0x636   : > { %626 = vrot.lane.b32.xlu0 %v624_v55, %s1741_s22 }
 0x6a8   : > { %v627_v58 = vpop.permute.xlu0 %626 }
 0x6a9   : > { %v629_v59 = vadd.f32 %v627_v58, %v623_v57 }
 0x6ab   : > { %1689 = vtanh.f32 %v629_v59  ;;  %v649_v61 = vrot.slane %v629_v59, %v1848_v32 }
 0x6b5   : > { %v1690_v60 = vpop.eup %1689 }
 0x6b6   : > { %635 = vrot.lane.b32.xlu1 %v1690_v60, %s1741_s22 }
 0x6ba   : > { %650 = vrot.lane.b32.xlu1 %v649_v61, %s1741_s22 }
 0x728   : > { %v636_v1 = vpop.permute.xlu1 %635 }
 0x729   : > { %v638_v2 = vmul.f32 %v636_v1, %v632_v63 }
 0x72b   : > { %v640_v3 = vsel %vm639_vm4, %v638_v2, %v512_v39  ;;  %v655_v5 = vsel %vm639_vm4, %v638_v2, 0.0 }
 0x72c   : > { %641 = vst.msk [vmem:[#allocation2] sm:$0x3] %vm191_vm0, %v640_v3  ;;  %1497 = vst.msk [vmem:[%s1871_s28 + $0x4] sm:$0x3] %vm191_vm0, %v655_v5  ;;  %v651_v6 = vpop.permute.xlu1 %650 }
 0x72d   : > { %v653_v7 = vsel %vm639_vm4, %v651_v6, %v513_v46 }
 0x72e   : > { %654 = vst.msk [vmem:[#allocation3] sm:$0x3] %vm191_vm0, %v653_v7  ;;  %v1504_v7 = vld [vmem:[%s2045_s2 + $0x8] sm:$0x3] }
 0x72f   : > { %vm939_vm6 = vcmp.gt.f32.partialorder %v1504_v7, 0.5 }
 0x733   : > { %v662_v10 = vld [vmem:[#allocation2] sm:$0x3] }
 0x734   : > { %1500 = vmatmul.mubr.msk.f32.vlgmr.msra.gmra.mrb[2].mxu1 %vm214_vm1, %v662_v10 }
 0x735   : > { %1611 = vmatpush1.bf16.msra.mxu1 %v1792_v8  ;;  %1031 = vmatprep.mubr.f32.mxu1 %v1739_v0  ;;  %v663_v19 = vld [vmem:[#allocation3] sm:$0x3] }
 0x736   : > { %1613 = vmatprep.subr.bf16.mxu1 %v1794_v9  ;;  %v769_v22 = vrot.slane %v663_v19, %v1848_v32 }
 0x739   : > { %1615 = vmatpush1.bf16.msra.mxu1 %v1803_v14 }
 0x73a   : > { %1617 = vmatprep.subr.bf16.mxu1 %v1807_v15 }
 0x73d   : > { %1619 = vmatpush1.bf16.msra.mxu1 %v1815_v20 }
 0x73e   : > { %1621 = vmatprep.subr.bf16.mxu1 %v1819_v21 }
 0x741   : > { %1623 = vmatpush1.bf16.msra.mxu1 %v1825_v24 }
 0x742   : > { %1641 = vmatprep.subr.bf16.mxu1 %v1787_v4 }
 0x807   : > { %v733_v11 = vpop.f32.mrb[2].mxu1 }
 0x808   : > { %v735_v12 = vpop.f32.mrb[3].mxu1 }
 0x809   : > { %v740_v13 = vcombine.low %v733_v11, %v735_v12 }
 0x80b   : > { %v747_v17 = vrot.slane %v740_v13, %v1848_v32 }
 0x80d   : > { %v749_v18 = vadd.f32 %v1498_v16, %v747_v17 }
 0x80f   : > { %757 = vrot.lane.b32.xlu0 %v749_v18, %s1741_s22  ;;  %v1501_v23 = vmul.f32 -1.442695, %v749_v18 }
 0x811   : > { %1691 = vpow2.f32 %v1501_v23 }
 0x813   : > { %770 = vrot.lane.b32.xlu0 %v769_v22, %s1741_s22 }
 0x81b   : > { %v1692_v25 = vpop.eup %1691 }
 0x81c   : > { %v753_v26 = vadd.f32 1.0, %v1692_v25 }
 0x81e   : > { %1693 = vrcp.f32 %v753_v26  ;;  %v1508_v26 = vld [vmem:[%s1853_s21 + $0x14] sm:$0xf] }
 0x828   : > { %v1694_v28 = vpop.eup %1693 }
 0x829   : > { %v782_v39 = vrot.slane %v1694_v28, 2 }
 0x881   : > { %v758_v27 = vpop.permute.xlu0 %757 }
 0x882   : > { %v759_v4 = vrot.slane %v758_v27, 2 }
 0x884   : > { %1695 = vtanh.f32 %v759_v4 }
 0x885   : > { %v771_v31 = vpop.permute.xlu0 %770 }
 0x886   : > { %v773_v33 = vmul.f32 %v1694_v28, %v771_v31 }
 0x88e   : > { %v1696_v29 = vpop.eup %1695 }
 0x88f   : > { %v774_v30 = vmul.f32 %v1696_v29, %v1694_v28 }
 0x891   : > { %776 = vrot.lane.b32.xlu1 %v774_v30, %s1741_s22 }
 0x903   : > { %v777_v34 = vpop.permute.xlu1 %776 }
 0x904   : > { %v779_v35 = vadd.f32 %v777_v34, %v773_v33 }
 0x906   : > { %1697 = vtanh.f32 %v779_v35  ;;  %v799_v37 = vrot.slane %v779_v35, %v1848_v32 }
 0x910   : > { %v1698_v36 = vpop.eup %1697 }
 0x911   : > { %785 = vrot.lane.b32.xlu0 %v1698_v36, %s1741_s22 }
 0x915   : > { %800 = vrot.lane.b32.xlu0 %v799_v37, %s1741_s22  ;;  %v1509_v37 = vld [vmem:[%s2045_s2 + $0xa] sm:$0x3] }
 0x916   : > { %vm1089_vm7 = vcmp.gt.f32.partialorder %v1509_v37, 0.5 }
 0x983   : > { %v786_v40 = vpop.permute.xlu0 %785 }
 0x984   : > { %v788_v41 = vmul.f32 %v786_v40, %v782_v39 }
 0x986   : > { %v790_v42 = vsel %vm789_vm5, %v788_v41, %v662_v10  ;;  %v805_v43 = vsel %vm789_vm5, %v788_v41, 0.0 }
 0x987   : > { %791 = vst.msk [vmem:[#allocation2] sm:$0x3] %vm191_vm0, %v790_v42  ;;  %1502 = vst.msk [vmem:[%s1871_s28 + $0x6] sm:$0x3] %vm191_vm0, %v805_v43  ;;  %v801_v44 = vpop.permute.xlu0 %800 }
 0x988   : > { %v803_v45 = vsel %vm789_vm5, %v801_v44, %v663_v19 }
 0x989   : > { %804 = vst.msk [vmem:[#allocation3] sm:$0x3] %vm191_vm0, %v803_v45 }
 0x98e   : > { %v812_v46 = vld [vmem:[#allocation2] sm:$0x3] }
 0x98f   : > { %1505 = vmatmul.mubr.msk.f32.vlgmr.msra.gmra.mrb[4].mxu0 %vm214_vm1, %v812_v46 }
 0x990   : > { %1627 = vmatpush1.bf16.msra.mxu0 %v1792_v8  ;;  %1181 = vmatprep.mubr.f32.mxu0 %v1739_v0  ;;  %v813_v53 = vld [vmem:[#allocation3] sm:$0x3] }
 0x991   : > { %1629 = vmatprep.subr.bf16.mxu0 %v1794_v9  ;;  %v919_v54 = vrot.slane %v813_v53, %v1848_v32 }
 0x994   : > { %1631 = vmatpush1.bf16.msra.mxu0 %v1803_v14 }
 0x995   : > { %1633 = vmatprep.subr.bf16.mxu0 %v1807_v15 }
 0x998   : > { %1635 = vmatpush1.bf16.msra.mxu0 %v1815_v20 }
 0x999   : > { %1637 = vmatprep.subr.bf16.mxu0 %v1819_v21 }
 0x99c   : > { %1639 = vmatpush1.bf16.msra.mxu0 %v1825_v24 }
 0xa62   : > { %v883_v47 = vpop.f32.mrb[4].mxu0 }
 0xa63   : > { %v885_v48 = vpop.f32.mrb[5].mxu0 }
 0xa64   : > { %v890_v49 = vcombine.low %v883_v47, %v885_v48 }
 0xa66   : > { %v897_v51 = vrot.slane %v890_v49, %v1848_v32  ;;  %v1513_v49 = vld [vmem:[%s1853_s21 + $0x18] sm:$0xf] }
 0xa68   : > { %v899_v52 = vadd.f32 %v1503_v50, %v897_v51 }
 0xa6a   : > { %907 = vrot.lane.b32.xlu1 %v899_v52, %s1741_s22  ;;  %v1506_v55 = vmul.f32 -1.442695, %v899_v52 }
 0xa6c   : > { %1699 = vpow2.f32 %v1506_v55 }
 0xa6e   : > { %920 = vrot.lane.b32.xlu1 %v919_v54, %s1741_s22 }
 0xa76   : > { %v1700_v56 = vpop.eup %1699 }
 0xa77   : > { %v903_v57 = vadd.f32 1.0, %v1700_v56 }
 0xa79   : > { %1701 = vrcp.f32 %v903_v57 }
 0xa83   : > { %v1702_v60 = vpop.eup %1701 }
 0xa84   : > { %v932_v10 = vrot.slane %v1702_v60, 2 }
 0xadc   : > { %v908_v58 = vpop.permute.xlu1 %907 }
 0xadd   : > { %v909_v59 = vrot.slane %v908_v58, 2 }
 0xadf   : > { %1703 = vtanh.f32 %v909_v59 }
 0xae0   : > { %v921_v63 = vpop.permute.xlu1 %920 }
 0xae1   : > { %v923_v1 = vmul.f32 %v1702_v60, %v921_v63 }
 0xae9   : > { %v1704_v61 = vpop.eup %1703 }
 0xaea   : > { %v924_v62 = vmul.f32 %v1704_v61, %v1702_v60 }
 0xaec   : > { %926 = vrot.lane.b32.xlu0 %v924_v62, %s1741_s22 }
 0xb5e   : > { %v927_v2 = vpop.permute.xlu0 %926 }
 0xb5f   : > { %v929_v3 = vadd.f32 %v927_v2, %v923_v1 }
 0xb61   : > { %1705 = vtanh.f32 %v929_v3  ;;  %v949_v6 = vrot.slane %v929_v3, %v1848_v32 }
 0xb6b   : > { %v1706_v5 = vpop.eup %1705 }
 0xb6c   : > { %935 = vrot.lane.b32.xlu1 %v1706_v5, %s1741_s22 }
 0xb70   : > { %950 = vrot.lane.b32.xlu1 %v949_v6, %s1741_s22  ;;  %v1514_v6 = vld [vmem:[%s2045_s2 + $0xc] sm:$0x3] }
 0xb71   : > { %vm1239_vm8 = vcmp.gt.f32.partialorder %v1514_v6, 0.5 }
 0xbde   : > { %v936_v11 = vpop.permute.xlu1 %935 }
 0xbdf   : > { %v938_v12 = vmul.f32 %v936_v11, %v932_v10 }
 0xbe1   : > { %v940_v13 = vsel %vm939_vm6, %v938_v12, %v812_v46  ;;  %v955_v16 = vsel %vm939_vm6, %v938_v12, 0.0 }
 0xbe2   : > { %941 = vst.msk [vmem:[#allocation2] sm:$0x3] %vm191_vm0, %v940_v13  ;;  %1507 = vst.msk [vmem:[%s1871_s28 + $0x8] sm:$0x3] %vm191_vm0, %v955_v16  ;;  %v951_v17 = vpop.permute.xlu1 %950 }
 0xbe3   : > { %v953_v18 = vsel %vm939_vm6, %v951_v17, %v813_v53 }
 0xbe4   : > { %954 = vst.msk [vmem:[#allocation3] sm:$0x3] %vm191_vm0, %v953_v18 }
 0xbe9   : > { %v962_v19 = vld [vmem:[#allocation2] sm:$0x3] }
 0xbea   : > { %1510 = vmatmul.mubr.msk.f32.vlgmr.msra.gmra.mrb[4].mxu1 %vm214_vm1, %v962_v19 }
 0xbeb   : > { %1643 = vmatpush1.bf16.msra.mxu1 %v1792_v8  ;;  %1331 = vmatprep.mubr.f32.mxu1 %v1739_v0  ;;  %v963_v0 = vld [vmem:[#allocation3] sm:$0x3] }
 0xbec   : > { %1645 = vmatprep.subr.bf16.mxu1 %v1794_v9  ;;  %v1069_v9 = vrot.slane %v963_v0, %v1848_v32 }
 0xbef   : > { %1647 = vmatpush1.bf16.msra.mxu1 %v1803_v14 }
 0xbf0   : > { %1649 = vmatprep.subr.bf16.mxu1 %v1807_v15 }
 0xbf3   : > { %1651 = vmatpush1.bf16.msra.mxu1 %v1815_v20 }
 0xbf4   : > { %1653 = vmatprep.subr.bf16.mxu1 %v1819_v21 }
 0xbf7   : > { %1655 = vmatpush1.bf16.msra.mxu1 %v1825_v24 }
 0xcbd   : > { %v1033_v22 = vpop.f32.mrb[4].mxu1 }
 0xcbe   : > { %v1035_v23 = vpop.f32.mrb[5].mxu1 }
 0xcbf   : > { %v1040_v25 = vcombine.low %v1033_v22, %v1035_v23 }
 0xcc1   : > { %v1047_v8 = vrot.slane %v1040_v25, %v1848_v32  ;;  %v1518_v25 = vld [vmem:[%s1853_s21 + $0x1c] sm:$0xf] }
 0xcc3   : > { %v1049_v27 = vadd.f32 %v1508_v26, %v1047_v8 }
 0xcc5   : > { %1057 = vrot.lane.b32.xlu0 %v1049_v27, %s1741_s22  ;;  %v1511_v14 = vmul.f32 -1.442695, %v1049_v27 }
 0xcc7   : > { %1707 = vpow2.f32 %v1511_v14 }
 0xcc9   : > { %1070 = vrot.lane.b32.xlu0 %v1069_v9, %s1741_s22 }
 0xcd1   : > { %v1708_v15 = vpop.eup %1707 }
 0xcd2   : > { %v1053_v20 = vadd.f32 1.0, %v1708_v15 }
 0xcd4   : > { %1709 = vrcp.f32 %v1053_v20 }
 0xcde   : > { %v1710_v4 = vpop.eup %1709 }
 0xcdf   : > { %v1082_v38 = vrot.slane %v1710_v4, 2 }
 0xd37   : > { %v1058_v21 = vpop.permute.xlu0 %1057 }
 0xd38   : > { %v1059_v24 = vrot.slane %v1058_v21, 2 }
 0xd3a   : > { %1711 = vtanh.f32 %v1059_v24 }
 0xd3b   : > { %v1071_v30 = vpop.permute.xlu0 %1070 }
 0xd3c   : > { %v1073_v31 = vmul.f32 %v1710_v4, %v1071_v30 }
 0xd44   : > { %v1712_v28 = vpop.eup %1711 }
 0xd45   : > { %v1074_v29 = vmul.f32 %v1712_v28, %v1710_v4 }
 0xd47   : > { %1076 = vrot.lane.b32.xlu1 %v1074_v29, %s1741_s22 }
 0xdb9   : > { %v1077_v33 = vpop.permute.xlu1 %1076 }
 0xdba   : > { %v1079_v34 = vadd.f32 %v1077_v33, %v1073_v31 }
 0xdbc   : > { %1713 = vtanh.f32 %v1079_v34  ;;  %v1099_v36 = vrot.slane %v1079_v34, %v1848_v32 }
 0xdc6   : > { %v1714_v35 = vpop.eup %1713 }
 0xdc7   : > { %1085 = vrot.lane.b32.xlu0 %v1714_v35, %s1741_s22 }
 0xdcb   : > { %1100 = vrot.lane.b32.xlu0 %v1099_v36, %s1741_s22  ;;  %v1519_v36 = vld [vmem:[%s2045_s2 + $0xe] sm:$0x3] }
 0xdcc   : > { %vm1389_vm9 = vcmp.gt.f32.partialorder %v1519_v36, 0.5 }
 0xe39   : > { %v1086_v39 = vpop.permute.xlu0 %1085 }
 0xe3a   : > { %v1088_v40 = vmul.f32 %v1086_v39, %v1082_v38 }
 0xe3c   : > { %v1090_v41 = vsel %vm1089_vm7, %v1088_v40, %v962_v19  ;;  %v1105_v42 = vsel %vm1089_vm7, %v1088_v40, 0.0 }
 0xe3d   : > { %1091 = vst.msk [vmem:[#allocation2] sm:$0x3] %vm191_vm0, %v1090_v41  ;;  %1512 = vst.msk [vmem:[%s1871_s28 + $0xa] sm:$0x3] %vm191_vm0, %v1105_v42  ;;  %v1101_v43 = vpop.permute.xlu0 %1100 }
 0xe3e   : > { %v1103_v44 = vsel %vm1089_vm7, %v1101_v43, %v963_v0 }
 0xe3f   : > { %1104 = vst.msk [vmem:[#allocation3] sm:$0x3] %vm191_vm0, %v1103_v44 }
 0xe44   : > { %v1112_v45 = vld [vmem:[#allocation2] sm:$0x3] }
 0xe45   : > { %1515 = vmatmul.mubr.msk.f32.vlgmr.msra.gmra.mrb[6].mxu0 %vm214_vm1, %v1112_v45 }
 0xe46   : > { %v1113_v52 = vld [vmem:[#allocation3] sm:$0x3] }
 0xe47   : > { %v1219_v53 = vrot.slane %v1113_v52, %v1848_v32 }
 0xf18   : > { %v1183_v46 = vpop.f32.mrb[6].mxu0 }
 0xf19   : > { %v1185_v47 = vpop.f32.mrb[7].mxu0 }
 0xf1a   : > { %v1190_v48 = vcombine.low %v1183_v46, %v1185_v47 }
 0xf1c   : > { %v1197_v50 = vrot.slane %v1190_v48, %v1848_v32 }
 0xf1e   : > { %v1199_v51 = vadd.f32 %v1513_v49, %v1197_v50 }
 0xf20   : > { %1207 = vrot.lane.b32.xlu1 %v1199_v51, %s1741_s22  ;;  %v1516_v54 = vmul.f32 -1.442695, %v1199_v51 }
 0xf22   : > { %1715 = vpow2.f32 %v1516_v54 }
 0xf24   : > { %1220 = vrot.lane.b32.xlu1 %v1219_v53, %s1741_s22 }
 0xf2c   : > { %v1716_v55 = vpop.eup %1715 }
 0xf2d   : > { %v1203_v56 = vadd.f32 1.0, %v1716_v55 }
 0xf2f   : > { %1717 = vrcp.f32 %v1203_v56 }
 0xf39   : > { %v1718_v59 = vpop.eup %1717 }
 0xf3a   : > { %v1232_v7 = vrot.slane %v1718_v59, 2 }
 0xf92   : > { %v1208_v57 = vpop.permute.xlu1 %1207 }
 0xf93   : > { %v1209_v58 = vrot.slane %v1208_v57, 2 }
 0xf95   : > { %1719 = vtanh.f32 %v1209_v58 }
 0xf96   : > { %v1221_v62 = vpop.permute.xlu1 %1220 }
 0xf97   : > { %v1223_v63 = vmul.f32 %v1718_v59, %v1221_v62 }
 0xf9f   : > { %v1720_v60 = vpop.eup %1719 }
 0xfa0   : > { %v1224_v61 = vmul.f32 %v1720_v60, %v1718_v59 }
 0xfa2   : > { %1226 = vrot.lane.b32.xlu0 %v1224_v61, %s1741_s22 }
0x1014   : > { %v1227_v1 = vpop.permute.xlu0 %1226 }
0x1015   : > { %v1229_v2 = vadd.f32 %v1227_v1, %v1223_v63 }
0x1017   : > { %1721 = vtanh.f32 %v1229_v2  ;;  %v1249_v5 = vrot.slane %v1229_v2, %v1848_v32 }
0x1021   : > { %v1722_v3 = vpop.eup %1721 }
0x1022   : > { %1235 = vrot.lane.b32.xlu1 %v1722_v3, %s1741_s22 }
0x1026   : > { %1250 = vrot.lane.b32.xlu1 %v1249_v5, %s1741_s22 }
0x1094   : > { %v1236_v10 = vpop.permute.xlu1 %1235 }
0x1095   : > { %v1238_v11 = vmul.f32 %v1236_v10, %v1232_v7 }
0x1097   : > { %v1240_v12 = vsel %vm1239_vm8, %v1238_v11, %v1112_v45  ;;  %v1255_v13 = vsel %vm1239_vm8, %v1238_v11, 0.0 }
0x1098   : > { %1241 = vst.msk [vmem:[#allocation2] sm:$0x3] %vm191_vm0, %v1240_v12  ;;  %1517 = vst.msk [vmem:[%s1871_s28 + $0xc] sm:$0x3] %vm191_vm0, %v1255_v13  ;;  %v1251_v16 = vpop.permute.xlu1 %1250 }
0x1099   : > { %v1253_v17 = vsel %vm1239_vm8, %v1251_v16, %v1113_v52 }
0x109a   : > { %1254 = vst.msk [vmem:[#allocation3] sm:$0x3] %vm191_vm0, %v1253_v17 }
0x109f   : > { %v1262_v18 = vld [vmem:[#allocation2] sm:$0x3] }
0x10a0   : > { %1520 = vmatmul.mubr.msk.f32.vlgmr.msra.gmra.mrb[6].mxu1 %vm214_vm1, %v1262_v18 }
0x10a1   : > { %v1263_v27 = vld [vmem:[#allocation3] sm:$0x3] }
0x10a2   : > { %v1369_v0 = vrot.slane %v1263_v27, %v1848_v32 }
0x1173   : > { %v1333_v19 = vpop.f32.mrb[6].mxu1 }
0x1174   : > { %v1335_v22 = vpop.f32.mrb[7].mxu1 }
0x1175   : > { %v1340_v23 = vcombine.low %v1333_v19, %v1335_v22 }
0x1177   : > { %v1347_v26 = vrot.slane %v1340_v23, %v1848_v32 }
0x1179   : > { %v1349_v8 = vadd.f32 %v1518_v25, %v1347_v26 }
0x117b   : > { %1357 = vrot.lane.b32.xlu0 %v1349_v8, %s1741_s22  ;;  %v1521_v9 = vmul.f32 -1.442695, %v1349_v8 }
0x117d   : > { %1723 = vpow2.f32 %v1521_v9 }
0x117f   : > { %1370 = vrot.lane.b32.xlu0 %v1369_v0, %s1741_s22 }
0x1187   : > { %v1724_v14 = vpop.eup %1723 }
0x1188   : > { %v1353_v15 = vadd.f32 1.0, %v1724_v14 }
0x118a   : > { %1725 = vrcp.f32 %v1353_v15 }
0x1194   : > { %v1726_v24 = vpop.eup %1725 }
0x1195   : > { %v1382_v39 = vrot.slane %v1726_v24, 2 }
0x11ed   : > { %v1358_v20 = vpop.permute.xlu0 %1357 }
0x11ee   : > { %v1359_v21 = vrot.slane %v1358_v20, 2 }
0x11f0   : > { %1727 = vtanh.f32 %v1359_v21 }
0x11f1   : > { %v1371_v29 = vpop.permute.xlu0 %1370 }
0x11f2   : > { %v1373_v30 = vmul.f32 %v1726_v24, %v1371_v29 }
0x11fa   : > { %v1728_v4 = vpop.eup %1727 }
0x11fb   : > { %v1374_v28 = vmul.f32 %v1728_v4, %v1726_v24 }
0x11fd   : > { %1376 = vrot.lane.b32.xlu1 %v1374_v28, %s1741_s22 }
0x126f   : > { %v1377_v31 = vpop.permute.xlu1 %1376 }
0x1270   : > { %v1379_v33 = vadd.f32 %v1377_v31, %v1373_v30 }
0x1272   : > { %1729 = vtanh.f32 %v1379_v33  ;;  %v1399_v34 = vrot.slane %v1379_v33, %v1848_v32 }
0x1274   : > { %1400 = vrot.lane.b32.xlu1 %v1399_v34, %s1741_s22 }
0x127c   : > { %v1730_v35 = vpop.eup %1729 }
0x127d   : > { %1385 = vrot.lane.b32.xlu0 %v1730_v35, %s1741_s22 }
0x12e6   : > { %v1401_v37 = vpop.permute.xlu1 %1400 }
0x12e7   : > { %v1403_v38 = vsel %vm1389_vm9, %v1401_v37, %v1263_v27 }
0x12e8   : > { %1404 = vst.msk [vmem:[#allocation3] sm:$0x3] %vm191_vm0, %v1403_v38 }
0x12ef   : > { %v1386_v40 = vpop.permute.xlu0 %1385 }
0x12f0   : > { %v1388_v41 = vmul.f32 %v1386_v40, %v1382_v39 }
0x12f2   : > { %v1390_v42 = vsel %vm1389_vm9, %v1388_v41, %v1262_v18  ;;  %v1405_v43 = vsel %vm1389_vm9, %v1388_v41, 0.0 }
0x12f3   : > { %1391 = vst.msk [vmem:[#allocation2] sm:$0x3] %vm191_vm0, %v1390_v42  ;;  %1522 = vst.msk [vmem:[%s1871_s28 + $0xe] sm:$0x3] %vm191_vm0, %v1405_v43 }
0x12f4 PF: > { %s13_s12 = sadd.s32 1, %s1737_s12  }
0x12f5   : > { %p10_p4 = scmp.ge.s32.totalorder %s13_s12, 5  }
0x12f7   :  { %12 = sbr.rel (!%p10_p4) target bundleno = 1 (0x1), region = 86 }

// kernel: audio_visual_text_encoder.9
= control target key start
LH: loop header
LB: loop body
LE: loop exit
PB: predicated region body
PF: predicated region fallthrough
CT: control target
= control target key end

     0   :  { %vm69_vm0 = vcmask 261120   ;;  %v688_v16 = vmov 0.0   ;;  %vm689_vm1 = vmmov 0   ;;  %vm390_vm2 = vcmask 64512   ;;  %s794_s5 = inlined_call_operand.vmem [shape: f32[1,32,64], index: 5, kind: input, shape index: {}]   ;;  %s795_s4 = inlined_call_operand.vmem [shape: f32[1,32,32], index: 4, kind: input, shape index: {}]   ;;  %s796_s1 = inlined_call_operand.<no memory space> [shape: s32[1], index: 1, kind: input, shape index: {}, may-alias: {0,1}]   ;;  %s797_s0 = inlined_call_operand.<no memory space> [shape: s32[1], index: 0, kind: input, shape index: {}, may-alias: {0,1}]   ;;  %s798_s3 = inlined_call_operand.vmem [shape: f32[1,2,8,32], index: 3, kind: input, shape index: {}]   ;;  %s799_s2 = inlined_call_operand.vmem [shape: f32[1,2,8,32], index: 2, kind: input, shape index: {}]   ;;  %s800_s6 = inlined_call_operand.vmem [shape: f32[1,2,8,32], index: 6, kind: output, shape index: {}]  }
   0x1   :  { %v151_v0 = vld [vmem:[%s794_s5] sm:$0xff]  ;;  %v152_v1 = vld [vmem:[%s794_s5 + $0x8] sm:$0xff]  ;;  %p55_p0 = scmp.lt.s32.totalorder %s796_s1, 0  ;;  %p48_p1 = scmp.lt.s32.totalorder %s797_s0, 0  ;;  %v153_v5 = vld [vmem:[%s794_s5 + $0x10] sm:$0xff] }
   0x2   :  { %v65_v2 = vld [vmem:[%s795_s4] sm:$0xff]  ;;  %v669_v3 = vpack.c.bf16 %v152_v1, %v151_v0  ;;  %v66_v4 = vld [vmem:[%s795_s4 + $0x8] sm:$0xff]  ;;  %v154_v6 = vld [vmem:[%s794_s5 + $0x18] sm:$0xff] }
   0x3   :  { %v661_v7 = vpack.c.bf16 %v66_v4, %v65_v2  ;;  %v673_v8 = vpack.c.bf16 %v154_v6, %v153_v5  ;;  %v67_v9 = vld [vmem:[%s795_s4 + $0x10] sm:$0xff]  ;;  %v68_v10 = vld [vmem:[%s795_s4 + $0x18] sm:$0xff]  ;;  %s802_s1 = smov (!%p55_p0, %s796_s1), 0  ;;  %s804_s0 = smov (!%p48_p1, %s797_s0), 0 }
   0x4   :  { %670 = vmatprep.subr.bf16.mxu1 %v669_v3  ;;  %v665_v11 = vpack.c.bf16 %v68_v10, %v67_v9  ;;  %s598_s22 = sshll.u32 %s802_s1, 4  ;;  %s597_s25 = sshll.u32 %s804_s0, 4 }
   0x5   :  { %672 = vmatpush3.bf16.msra.mxu1 %v669_v3  ;;  %662 = vmatprep.subr.bf16.mxu0 %v661_v7  ;;  %s59_s24 = scalar_lea.vmem %s798_s3, %s598_s22  ;;  %s52_s28 = scalar_lea.vmem %s799_s2, %s597_s25 }
   0x6   :  { %664 = vmatpush3.bf16.msra.mxu0 %v661_v7  ;;  %674 = vmatprep.subr.bf16.mxu1 %v673_v8  ;;  %v63_v12 = vld [vmem:[%s59_s24] sm:$0xff]  ;;  %v64_v14 = vld [vmem:[%s59_s24 + $0x8] sm:$0xff]  ;;  %s690_s0 = smov 96  }
   0x7   :  { %666 = vmatprep.subr.bf16.mxu0 %v665_v11  ;;  %638 = vmatprep.mubr.msk.f32.mxu1 %vm69_vm0, %v63_v12  ;;  %v61_v13 = vld [vmem:[%s52_s28] sm:$0xff]  ;;  %v62_v15 = vld [vmem:[%s52_s28 + $0x8] sm:$0xff] }
   0x8   :  { %627 = vmatprep.mubr.msk.f32.mxu0 %vm69_vm0, %v61_v13 }
   0x9   :  { %676 = vmatpush3.bf16.msra.mxu1 %v673_v8 }
   0xa   :  { %668 = vmatpush3.bf16.msra.mxu0 %v665_v11  ;;  %646 = vmatprep.subr.mxu1 %v688_v16 }
   0xb   :  { %641 = vmatprep.subr.mxu0 %v688_v16 }
   0xc   :  { %639 = vmatmul.mubr.msk.f32.vlgmr.msra.gmra.mrb[0].mxu1 %vm69_vm0, %v64_v14 }
   0xd   :  { %628 = vmatmul.mubr.msk.f32.vlgmr.msra.gmra.mrb[0].mxu0 %vm69_vm0, %v62_v15  ;;  %648 = vmatprep.mubr.msk.f32.mxu1 %vm689_vm1, %v688_v16 }
   0xe   :  { %643 = vmatprep.mubr.msk.f32.mxu0 %vm689_vm1, %v688_v16 }
  0xdf   :  { %v640_v17 = vpop.f32.mrb[0].mxu1 }
  0xe0   :  { %v227_v18 = vpop.f32.mrb[1].mxu1  ;;  %647 = vmatpush3.xpose.msk.msra.mxu1 %vm69_vm0, %v640_v17  ;;  %v629_v19 = vpop.f32.mrb[0].mxu0 }
  0xe1   :  { %642 = vmatpush3.xpose.msk.msra.mxu0 %vm69_vm0, %v227_v18  ;;  %v142_v20 = vpop.f32.mrb[1].mxu0  ;;  %656 = vmatprep.subr.mxu1 %v688_v16 }
  0xe2   :  { %651 = vmatprep.subr.mxu0 %v688_v16 }
  0xe3   :  { %649 = vmatmul.mubr.msk.f32.vlgmr.msra.gmra.mrb[2].mxu1 %vm69_vm0, %v629_v19 }
  0xe4   :  { %644 = vmatmul.mubr.msk.f32.vlgmr.msra.gmra.mrb[2].mxu0 %vm69_vm0, %v142_v20  ;;  %658 = vmatprep.mubr.msk.f32.mxu1 %vm689_vm1, %v688_v16 }
  0xe5   :  { %653 = vmatprep.mubr.msk.f32.mxu0 %vm689_vm1, %v688_v16 }
 0x1b6   :  { %v384_v21 = vpop.f32.mrb[2].mxu1 }
 0x1b7   :  { %v308_v22 = vpop.f32.mrb[2].mxu0  ;;  %v650_v23 = vpop.f32.mrb[3].mxu1  ;;  %v389_v26 = vmul.f32 0.17677669, %v384_v21 }
 0x1b8   :  { %v388_v24 = vmul.f32 0.17677669, %v308_v22  ;;  %v645_v25 = vpop.f32.mrb[3].mxu0 }
 0x1b9   :  { %v394_v28 = vsel %vm390_vm2, %v389_v26, -inf }
 0x1ba   :  { %v391_v27 = vsel %vm390_vm2, %v388_v24, -inf }
 0x1bb   :  { %392 = vmax.xlane.f32.xlu0 %v391_v27 }
 0x1bf   :  { %395 = vmax.xlane.f32.xlu0 %v394_v28 }
 0x1d5   :  { %413 = vrot.lane.b32.xlu0 %v227_v18, %s690_s0 }
 0x248   :  { %v393_v29 = vpop.xlane.xlu0 %392 }
 0x249   :  { %v397_v30 = vsub.f32 %v388_v24, %v393_v29 }
 0x24b   :  { %v399_v33 = vmul.f32 1.442695, %v397_v30 }
 0x24c   :  { %v396_v31 = vpop.xlane.xlu0 %395 }
 0x24d   :  { %v398_v32 = vsub.f32 %v389_v26, %v396_v31 }
 0x24f   :  { %v401_v34 = vmul.f32 1.442695, %v398_v32 }
 0x250   :  { %v414_v35 = vpop.permute.xlu0 %413 }
 0x251   :  { %680 = vpow2.f32 %v401_v34  ;;  %652 = vmatpush3.msra.mxu0 %v414_v35 }
 0x252   :  { %682 = vpow2.f32 %v399_v33 }
 0x25b   :  { %v681_v36 = vpop.eup %680 }
 0x25c   :  { %v406_v37 = vsel %vm390_vm2, %v681_v36, 0.0  ;;  %v683_v38 = vpop.eup %682 }
 0x25d   :  { %407 = vadd.xlane.f32.xlu1 %v406_v37  ;;  %v403_v39 = vsel %vm390_vm2, %v683_v38, 0.0 }
 0x261   :  { %404 = vadd.xlane.f32.xlu1 %v403_v39 }
 0x272   :  { %489 = vrot.lane.b32.xlu1 %v640_v17, %s690_s0 }
 0x2ea   :  { %v408_v40 = vpop.xlane.xlu1 %407 }
 0x2eb   :  { %684 = vrcp.f32 %v408_v40 }
 0x2ee   :  { %v405_v41 = vpop.xlane.xlu1 %404 }
 0x2ef   :  { %686 = vrcp.f32 %v405_v41 }
 0x2f2   :  { %v490_v42 = vpop.permute.xlu1 %489 }
 0x2f3   :  { %657 = vmatpush3.msra.mxu1 %v490_v42 }
 0x2f5   :  { %v685_v43 = vpop.eup %684 }
 0x2f6   :  { %v412_v44 = vmul.f32 %v685_v43, %v681_v36 }
 0x2f8   :  { %659 = vmatmul.mubr.msk.f32.vlgmr.msra.gmra.mrb[4].mxu1 %vm390_vm2, %v412_v44 }
 0x2f9   :  { %v687_v45 = vpop.eup %686 }
 0x2fa   :  { %v410_v46 = vmul.f32 %v687_v45, %v683_v38 }
 0x2fc   :  { %654 = vmatmul.mubr.msk.f32.vlgmr.msra.gmra.mrb[4].mxu0 %vm390_vm2, %v410_v46 }
 0x3cb   :  { %v561_v47 = vpop.f32.mrb[4].mxu1 }
 0x3cc   :  { %566 = vst.msk [vmem:[%s800_s6 + $0x8] sm:$0xff] %vm69_vm0, %v561_v47  ;;  %v660_v48 = vpop.f32.mrb[5].mxu1 }
 0x3cf   :  { %v485_v49 = vpop.f32.mrb[4].mxu0 }
 0x3d0   :  { %565 = vst.msk [vmem:[%s800_s6] sm:$0xff] %vm69_vm0, %v485_v49  ;;  %v655_v50 = vpop.f32.mrb[5].mxu0 }

// kernel: audio_visual_text_encoder.11
= control target key start
LH: loop header
LB: loop body
LE: loop exit
PB: predicated region body
PF: predicated region fallthrough
CT: control target
= control target key end

     0   :  { %v528_v3 = vmov 0.0   ;;  %vm32_vm0 = vcmask 523264   ;;  %vm529_vm1 = vmmov 0   ;;  %vm288_vm2 = vcmask 64512   ;;  %s645_s1 = inlined_call_operand.vmem [shape: f32[1,64,192], index: 1, kind: input, shape index: {}]   ;;  %s646_s0 = inlined_call_operand.vmem [shape: f32[1,2,8,64], index: 0, kind: input, shape index: {}]   ;;  %s647_s2 = inlined_call_operand.vmem [shape: f32[2,1,8], index: 2, kind: input, shape index: {}]   ;;  %s648_s3 = inlined_call_operand.vmem [shape: f32[1,2,8,64], index: 3, kind: output, shape index: {}]  }
   0x1   :  { %v17_v0 = vld [vmem:[%s645_s1 + $0x8] sm:$0xff]  ;;  %v19_v1 = vld [vmem:[%s645_s1 + $0x18] sm:$0xff]  ;;  %v16_v2 = vld [vmem:[%s645_s1] sm:$0xff]  ;;  %103 = vmatprep.mubr.f32.mxu0 %v528_v3  ;;  %481 = vmatprep.subr.mxu1 %v528_v3 }
   0x2   :  { %v501_v4 = vpack.c.bf16 %v19_v1, %v17_v0  ;;  %v18_v5 = vld [vmem:[%s645_s1 + $0x10] sm:$0xff]  ;;  %v21_v6 = vld [vmem:[%s645_s1 + $0x28] sm:$0xff]  ;;  %v23_v7 = vld [vmem:[%s645_s1 + $0x38] sm:$0xff]  ;;  %483 = vmatprep.mubr.msk.f32.mxu1 %vm529_vm1, %v528_v3 }
   0x3   :  { %v503_v8 = vpack.c.bf16 %v18_v5, %v16_v2  ;;  %v505_v9 = vpack.c.bf16 %v23_v7, %v21_v6  ;;  %v20_v10 = vld [vmem:[%s645_s1 + $0x20] sm:$0xff]  ;;  %v22_v11 = vld [vmem:[%s645_s1 + $0x30] sm:$0xff]  ;;  %v25_v12 = vld [vmem:[%s645_s1 + $0x48] sm:$0xff] }
   0x4   :  { %502 = vmatprep.subr.bf16.mxu0 %v501_v4  ;;  %v27_v13 = vld [vmem:[%s645_s1 + $0x58] sm:$0xff]  ;;  %v507_v14 = vpack.c.bf16 %v22_v11, %v20_v10  ;;  %v24_v16 = vld [vmem:[%s645_s1 + $0x40] sm:$0xff]  ;;  %v26_v17 = vld [vmem:[%s645_s1 + $0x50] sm:$0xff] }
   0x5   :  { %504 = vmatpush1.bf16.msra.mxu0 %v503_v8  ;;  %v509_v15 = vpack.c.bf16 %v27_v13, %v25_v12  ;;  %v29_v18 = vld [vmem:[%s645_s1 + $0x68] sm:$0xff]  ;;  %v31_v19 = vld [vmem:[%s645_s1 + $0x78] sm:$0xff]  ;;  %v511_v20 = vpack.c.bf16 %v26_v17, %v24_v16  ;;  %v28_v22 = vld [vmem:[%s645_s1 + $0x60] sm:$0xff] }
   0x6   :  { %506 = vmatprep.subr.bf16.mxu0 %v505_v9  ;;  %v513_v21 = vpack.c.bf16 %v31_v19, %v29_v18  ;;  %v30_v23 = vld [vmem:[%s645_s1 + $0x70] sm:$0xff]  ;;  %v14_v25 = vld [vmem:[%s646_s0] sm:$0xff]  ;;  %v15_v26 = vld [vmem:[%s646_s0 + $0x8] sm:$0xff]  ;;  %s530_s1 = smov 64  }
   0x7   :  { %v515_v24 = vpack.c.bf16 %v30_v23, %v28_v22  ;;  %v469_v34 = vld [vmem:[%s647_s2] ss:$0 sm:$0xff]  ;;  %v470_v39 = vld [vmem:[%s647_s2 + $0x1] ss:$0 sm:$0xff] }
   0x9   :  { %508 = vmatpush1.bf16.msra.mxu0 %v507_v14 }
   0xa   :  { %510 = vmatprep.subr.bf16.mxu0 %v509_v15 }
   0xd   :  { %512 = vmatpush1.bf16.msra.mxu0 %v511_v20 }
   0xe   :  { %514 = vmatprep.subr.bf16.mxu0 %v513_v21 }
  0x11   :  { %516 = vmatpush1.bf16.msra.mxu0 %v515_v24 }
  0x14   :  { %463 = vmatmul.mubr.msk.f32.vlgmr.msra.gmra.mrb[0].mxu0 %vm32_vm0, %v14_v25 }
  0x15   :  { %109 = vmatprep.mubr.f32.mxu0 %v528_v3 }
  0x18   :  { %464 = vmatmul.mubr.msk.f32.gmra.mrb[2].mxu0 %vm32_vm0, %v15_v26 }
  0xe7   :  { %v105_v27 = vpop.f32.mrb[0].mxu0 }
  0xe8   :  { %117 = vrot.lane.b32.xlu0 %v105_v27, %s530_s1  ;;  %v107_v28 = vpop.f32.mrb[1].mxu0  ;;  %482 = vmatpush3.xpose.msk.msra.mxu1 %vm32_vm0, %v105_v27 }
  0xe9   :  { %486 = vmatprep.subr.mxu1 %v528_v3 }
  0xeb   :  { %v111_v29 = vpop.f32.mrb[2].mxu0 }
  0xec   :  { %194 = vrot.lane.b32.xlu0 %v111_v29, %s530_s1  ;;  %v113_v30 = vpop.f32.mrb[3].mxu0 }
 0x15a   :  { %v118_v31 = vpop.permute.xlu0 %117 }
 0x15b   :  { %484 = vmatmul.mubr.msk.f32.vlgmr.msra.gmra.mrb[0].mxu1 %vm32_vm0, %v118_v31 }
 0x15c   :  { %487 = vmatpush3.xpose.msk.msra.mxu1 %vm32_vm0, %v111_v29  ;;  %488 = vmatprep.mubr.msk.f32.mxu1 %vm529_vm1, %v528_v3 }
 0x15d   :  { %491 = vmatprep.subr.mxu1 %v528_v3 }
 0x15e   :  { %v195_v32 = vpop.permute.xlu0 %194 }
 0x15f   :  { %489 = vmatmul.mubr.msk.f32.vlgmr.msra.gmra.mrb[2].mxu1 %vm32_vm0, %v195_v32 }
 0x160   :  { %492 = vmatpush3.msra.mxu1 %v107_v28  ;;  %493 = vmatprep.mubr.msk.f32.mxu1 %vm529_vm1, %v528_v3 }
 0x161   :  { %496 = vmatprep.subr.mxu1 %v528_v3 }
 0x22e   :  { %v189_v33 = vpop.f32.mrb[0].mxu1 }
 0x22f   :  { %v270_v35 = vmul.f32 0.125, %v189_v33  ;;  %v485_v36 = vpop.f32.mrb[1].mxu1 }
 0x231   :  { %v286_v37 = vadd.f32 %v469_v34, %v270_v35 }
 0x232   :  { %v266_v38 = vpop.f32.mrb[2].mxu1 }
 0x233   :  { %v271_v40 = vmul.f32 0.125, %v266_v38  ;;  %v490_v41 = vpop.f32.mrb[3].mxu1  ;;  %v289_v42 = vsel %vm288_vm2, %v286_v37, -inf }
 0x234   :  { %290 = vmax.xlane.f32.xlu1 %v289_v42 }
 0x235   :  { %v287_v43 = vadd.f32 %v470_v39, %v271_v40 }
 0x237   :  { %v292_v44 = vsel %vm288_vm2, %v287_v43, -inf }
 0x238   :  { %293 = vmax.xlane.f32.xlu1 %v292_v44 }
 0x2c1   :  { %v291_v45 = vpop.xlane.xlu1 %290 }
 0x2c2   :  { %v295_v46 = vsub.f32 %v286_v37, %v291_v45 }
 0x2c4   :  { %v297_v47 = vmul.f32 1.442695, %v295_v46 }
 0x2c5   :  { %v294_v48 = vpop.xlane.xlu1 %293 }
 0x2c6   :  { %520 = vpow2.f32 %v297_v47  ;;  %v296_v49 = vsub.f32 %v287_v43, %v294_v48 }
 0x2c8   :  { %v299_v50 = vmul.f32 1.442695, %v296_v49 }
 0x2ca   :  { %522 = vpow2.f32 %v299_v50 }
 0x2d0   :  { %v521_v51 = vpop.eup %520 }
 0x2d1   :  { %v301_v52 = vsel %vm288_vm2, %v521_v51, 0.0 }
 0x2d2   :  { %302 = vadd.xlane.f32.xlu0 %v301_v52 }
 0x2d4   :  { %v523_v53 = vpop.eup %522 }
 0x2d5   :  { %v304_v54 = vsel %vm288_vm2, %v523_v53, 0.0 }
 0x2d6   :  { %305 = vadd.xlane.f32.xlu1 %v304_v54 }
 0x35f   :  { %v303_v55 = vpop.xlane.xlu0 %302 }
 0x360   :  { %524 = vrcp.f32 %v303_v55 }
 0x363   :  { %v306_v56 = vpop.xlane.xlu1 %305 }
 0x364   :  { %526 = vrcp.f32 %v306_v56 }
 0x36a   :  { %v525_v57 = vpop.eup %524 }
 0x36b   :  { %v308_v58 = vmul.f32 %v525_v57, %v521_v51 }
 0x36d   :  { %494 = vmatmul.mubr.msk.f32.vlgmr.msra.gmra.mrb[4].mxu1 %vm288_vm2, %v308_v58 }
 0x36e   :  { %v527_v59 = vpop.eup %526  ;;  %497 = vmatpush3.msra.mxu1 %v113_v30  ;;  %498 = vmatprep.mubr.msk.f32.mxu1 %vm529_vm1, %v528_v3 }
 0x36f   :  { %v310_v60 = vmul.f32 %v527_v59, %v523_v53 }
 0x371   :  { %499 = vmatmul.mubr.msk.f32.vlgmr.msra.gmra.mrb[6].mxu1 %vm288_vm2, %v310_v60 }
 0x440   :  { %v380_v61 = vpop.f32.mrb[4].mxu1 }
 0x441   :  { %457 = vst.msk [vmem:[%s648_s3] sm:$0xff] %vm32_vm0, %v380_v61  ;;  %v495_v62 = vpop.f32.mrb[5].mxu1 }
 0x444   :  { %v453_v63 = vpop.f32.mrb[6].mxu1 }
 0x445   :  { %458 = vst.msk [vmem:[%s648_s3 + $0x8] sm:$0xff] %vm32_vm0, %v453_v63  ;;  %v500_v0 = vpop.f32.mrb[7].mxu1 }

// kernel: audio_visual_text_encoder.10
= control target key start
LH: loop header
LB: loop body
LE: loop exit
PB: predicated region body
PF: predicated region fallthrough
CT: control target
= control target key end

     0   :  { %vm14_vm0 = vcmask 517120   ;;  %v1467_v3 = vmov 0.0   ;;  %vm37_vm1 = vcmask 523264   ;;  %v1468_v26 = vmov 1983009808   ;;  %s1469_s18 = smov 64   ;;  %s1800_s1 = inlined_call_operand.vmem [shape: f32[1,64,256], index: 1, kind: input, shape index: {}]   ;;  %s1801_s0 = inlined_call_operand.vmem [shape: f32[1,8,2,256], index: 0, kind: input, shape index: {}]   ;;  %s1802_s2 = inlined_call_operand.vmem [shape: f32[8,2,64], index: 2, kind: input, shape index: {}]   ;;  %s1803_s3 = inlined_call_operand.vmem [shape: f32[1,8,2,64], index: 3, kind: output, shape index: {}]  }
   0x1   :  { %v18_v0 = vld [vmem:[%s1800_s1 + $0x8] sm:$0xff]  ;;  %v20_v1 = vld [vmem:[%s1800_s1 + $0x18] sm:$0xff]  ;;  %v17_v2 = vld [vmem:[%s1800_s1] sm:$0xff]  ;;  %15 = vst.msk [vmem:[#allocation2] sm:$0x3] %vm14_vm0, %v1467_v3  ;;  %105 = vmatprep.mubr.f32.mxu0 %v1467_v3  ;;  %254 = vmatprep.mubr.f32.mxu1 %v1467_v3  ;;  %v116_v27 = vunpack.c.l.s4 %v1468_v26  ;;  %v118_v28 = vlaneseq }
   0x2   :  { %16 = vst.msk [vmem:[#allocation3] sm:$0x3] %vm14_vm0, %v1467_v3  ;;  %v1505_v4 = vpack.c.bf16 %v20_v1, %v18_v0  ;;  %v19_v5 = vld [vmem:[%s1800_s1 + $0x10] sm:$0xff]  ;;  %v22_v6 = vld [vmem:[%s1800_s1 + $0x28] sm:$0xff]  ;;  %v24_v7 = vld [vmem:[%s1800_s1 + $0x38] sm:$0xff] }
   0x3   :  { %v1516_v8 = vpack.c.bf16 %v19_v5, %v17_v2  ;;  %v1518_v9 = vpack.c.bf16 %v24_v7, %v22_v6  ;;  %v21_v10 = vld [vmem:[%s1800_s1 + $0x20] sm:$0xff]  ;;  %v23_v11 = vld [vmem:[%s1800_s1 + $0x30] sm:$0xff]  ;;  %v26_v12 = vld [vmem:[%s1800_s1 + $0x48] sm:$0xff]  ;;  %v117_v29 = vunpack.c.0.s8 %v116_v27  ;;  %v119_v30 = vshrl.u32 %v118_v28, 7 }
   0x4   :  { %1273 = vmatprep.subr.bf16.mxu0 %v1505_v4  ;;  %v28_v13 = vld [vmem:[%s1800_s1 + $0x58] sm:$0xff]  ;;  %1289 = vmatprep.subr.bf16.mxu1 %v1505_v4  ;;  %v1535_v14 = vpack.c.bf16 %v23_v11, %v21_v10  ;;  %v25_v16 = vld [vmem:[%s1800_s1 + $0x40] sm:$0xff]  ;;  %v27_v17 = vld [vmem:[%s1800_s1 + $0x50] sm:$0xff] }
   0x5   :  { %1275 = vmatpush1.bf16.msra.mxu0 %v1516_v8  ;;  %1291 = vmatpush1.bf16.msra.mxu1 %v1516_v8  ;;  %v1539_v15 = vpack.c.bf16 %v28_v13, %v26_v12  ;;  %v30_v18 = vld [vmem:[%s1800_s1 + $0x68] sm:$0xff]  ;;  %v32_v19 = vld [vmem:[%s1800_s1 + $0x78] sm:$0xff]  ;;  %v1555_v20 = vpack.c.bf16 %v27_v17, %v25_v16  ;;  %v29_v22 = vld [vmem:[%s1800_s1 + $0x60] sm:$0xff]  ;;  %v1588_v32 = vsub.s32 %v117_v29, %v119_v30 }
   0x6   :  { %1277 = vmatprep.subr.bf16.mxu0 %v1518_v9  ;;  %1293 = vmatprep.subr.bf16.mxu1 %v1518_v9  ;;  %v1559_v21 = vpack.c.bf16 %v32_v19, %v30_v18  ;;  %v31_v23 = vld [vmem:[%s1800_s1 + $0x70] sm:$0xff]  ;;  %v33_v35 = vld [vmem:[%s1801_s0] sm:$0xf]  ;;  %v1237_v2 = vld [vmem:[%s1801_s0 + $0x4] sm:$0xf] }
   0x7   :  { %v1569_v24 = vpack.c.bf16 %v31_v23, %v29_v22  ;;  %v34_v54 = vld [vmem:[%s1802_s2] sm:$0x3]  ;;  %v1238_v30 = vld [vmem:[%s1802_s2 + $0x2] sm:$0x3] }
   0x8   :  { %v35_v25 = vld [vmem:[#allocation2] sm:$0x3]  ;;  %vm163_vm2 = vcmp.gt.f32.partialorder %v34_v54, 0.5  ;;  %vm312_vm3 = vcmp.gt.f32.partialorder %v1238_v30, 0.5 }
   0x9   :  { %1279 = vmatpush1.bf16.msra.mxu0 %v1535_v14  ;;  %1295 = vmatpush1.bf16.msra.mxu1 %v1535_v14  ;;  %v36_v37 = vld [vmem:[#allocation3] sm:$0x3] }
   0xa   :  { %1281 = vmatprep.subr.bf16.mxu0 %v1539_v15  ;;  %1297 = vmatprep.subr.bf16.mxu1 %v1539_v15  ;;  %v143_v39 = vrot.slane %v36_v37, %v1588_v32 }
   0xd   :  { %1283 = vmatpush1.bf16.msra.mxu0 %v1555_v20  ;;  %1299 = vmatpush1.bf16.msra.mxu1 %v1555_v20 }
   0xe   :  { %1285 = vmatprep.subr.bf16.mxu0 %v1559_v21  ;;  %1301 = vmatprep.subr.bf16.mxu1 %v1559_v21 }
  0x11   :  { %1287 = vmatpush1.bf16.msra.mxu0 %v1569_v24  ;;  %1303 = vmatpush1.bf16.msra.mxu1 %v1569_v24 }
  0x12   :  { %1305 = vmatprep.subr.bf16.mxu0 %v1505_v4  ;;  %1321 = vmatprep.subr.bf16.mxu1 %v1505_v4 }
  0x14   :  { %1235 = vmatmul.mubr.msk.f32.vlgmr.msra.gmra.mrb[0].mxu0 %vm37_vm1, %v35_v25 }
  0x15   :  { %1307 = vmatpush1.bf16.msra.mxu0 %v1516_v8  ;;  %404 = vmatprep.mubr.f32.mxu0 %v1467_v3 }
  0x16   :  { %1309 = vmatprep.subr.bf16.mxu0 %v1518_v9 }
  0x19   :  { %1311 = vmatpush1.bf16.msra.mxu0 %v1535_v14 }
  0x1a   :  { %1313 = vmatprep.subr.bf16.mxu0 %v1539_v15 }
  0x1d   :  { %1315 = vmatpush1.bf16.msra.mxu0 %v1555_v20 }
  0x1e   :  { %1317 = vmatprep.subr.bf16.mxu0 %v1559_v21 }
  0x21   :  { %1319 = vmatpush1.bf16.msra.mxu0 %v1569_v24 }
  0x22   :  { %1337 = vmatprep.subr.bf16.mxu0 %v1505_v4 }
  0xe7   :  { %v107_v31 = vpop.f32.mrb[0].mxu0 }
  0xe8   :  { %v109_v33 = vpop.f32.mrb[1].mxu0 }
  0xe9   :  { %v114_v34 = vcombine.low %v107_v31, %v109_v33 }
  0xeb   :  { %v121_v36 = vrot.slane %v114_v34, %v1588_v32 }
  0xed   :  { %v123_v38 = vadd.f32 %v121_v36, %v33_v35 }
  0xef   :  { %131 = vrot.lane.b32.xlu0 %v123_v38, %s1469_s18  ;;  %v1236_v40 = vmul.f32 -1.442695, %v123_v38 }
  0xf1   :  { %1403 = vpow2.f32 %v1236_v40 }
  0xf3   :  { %144 = vrot.lane.b32.xlu0 %v143_v39, %s1469_s18 }
  0xfb   :  { %v1404_v41 = vpop.eup %1403 }
  0xfc   :  { %v127_v42 = vadd.f32 1.0, %v1404_v41 }
  0xfe   :  { %1405 = vrcp.f32 %v127_v42 }
 0x108   :  { %v1406_v45 = vpop.eup %1405 }
 0x109   :  { %v156_v55 = vrot.slane %v1406_v45, 2 }
 0x161   :  { %v132_v43 = vpop.permute.xlu0 %131 }
 0x162   :  { %v133_v44 = vrot.slane %v132_v43, 2  ;;  %v1242_v43 = vld [vmem:[%s1801_s0 + $0x8] sm:$0xf] }
 0x164   :  { %1407 = vtanh.f32 %v133_v44 }
 0x165   :  { %v145_v48 = vpop.permute.xlu0 %144 }
 0x166   :  { %v147_v49 = vmul.f32 %v1406_v45, %v145_v48 }
 0x16e   :  { %v1408_v46 = vpop.eup %1407 }
 0x16f   :  { %v148_v47 = vmul.f32 %v1408_v46, %v1406_v45 }
 0x171   :  { %150 = vrot.lane.b32.xlu1 %v148_v47, %s1469_s18 }
 0x1e3   :  { %v151_v50 = vpop.permute.xlu1 %150 }
 0x1e4   :  { %v153_v51 = vadd.f32 %v151_v50, %v147_v49 }
 0x1e6   :  { %1409 = vtanh.f32 %v153_v51  ;;  %v173_v53 = vrot.slane %v153_v51, %v1588_v32 }
 0x1f0   :  { %v1410_v52 = vpop.eup %1409 }
 0x1f1   :  { %159 = vrot.lane.b32.xlu1 %v1410_v52, %s1469_s18 }
 0x1f5   :  { %174 = vrot.lane.b32.xlu1 %v173_v53, %s1469_s18 }
 0x263   :  { %v160_v56 = vpop.permute.xlu1 %159 }
 0x264   :  { %v162_v57 = vmul.f32 %v160_v56, %v156_v55 }
 0x266   :  { %v164_v58 = vsel %vm163_vm2, %v162_v57, %v35_v25  ;;  %v179_v59 = vsel %vm163_vm2, %v162_v57, 0.0 }
 0x267   :  { %165 = vst.msk [vmem:[#allocation2] sm:$0x3] %vm14_vm0, %v164_v58  ;;  %180 = vst.msk [vmem:[%s1803_s3] sm:$0x3] %vm14_vm0, %v179_v59  ;;  %v175_v60 = vpop.permute.xlu1 %174 }
 0x268   :  { %v177_v61 = vsel %vm163_vm2, %v175_v60, %v36_v37 }
 0x269   :  { %178 = vst.msk [vmem:[#allocation3] sm:$0x3] %vm14_vm0, %v177_v61 }
 0x26e   :  { %v185_v62 = vld [vmem:[#allocation2] sm:$0x3] }
 0x26f   :  { %1239 = vmatmul.mubr.msk.f32.vlgmr.msra.gmra.mrb[0].mxu1 %vm37_vm1, %v185_v62 }
 0x270   :  { %1323 = vmatpush1.bf16.msra.mxu1 %v1516_v8  ;;  %554 = vmatprep.mubr.f32.mxu1 %v1467_v3  ;;  %v186_v7 = vld [vmem:[#allocation3] sm:$0x3] }
 0x271   :  { %1325 = vmatprep.subr.bf16.mxu1 %v1518_v9  ;;  %v292_v10 = vrot.slane %v186_v7, %v1588_v32 }
 0x274   :  { %1327 = vmatpush1.bf16.msra.mxu1 %v1535_v14 }
 0x275   :  { %1329 = vmatprep.subr.bf16.mxu1 %v1539_v15 }
 0x278   :  { %1331 = vmatpush1.bf16.msra.mxu1 %v1555_v20 }
 0x279   :  { %1333 = vmatprep.subr.bf16.mxu1 %v1559_v21 }
 0x27c   :  { %1335 = vmatpush1.bf16.msra.mxu1 %v1569_v24 }
 0x27d   :  { %1353 = vmatprep.subr.bf16.mxu1 %v1505_v4 }
 0x342   :  { %v256_v63 = vpop.f32.mrb[0].mxu1 }
 0x343   :  { %v258_v0 = vpop.f32.mrb[1].mxu1 }
 0x344   :  { %v263_v1 = vcombine.low %v256_v63, %v258_v0 }
 0x346   :  { %v270_v5 = vrot.slane %v263_v1, %v1588_v32 }
 0x348   :  { %v272_v6 = vadd.f32 %v1237_v2, %v270_v5 }
 0x34a   :  { %280 = vrot.lane.b32.xlu0 %v272_v6, %s1469_s18  ;;  %v1240_v11 = vmul.f32 -1.442695, %v272_v6 }
 0x34c   :  { %1411 = vpow2.f32 %v1240_v11 }
 0x34e   :  { %293 = vrot.lane.b32.xlu0 %v292_v10, %s1469_s18 }
 0x356   :  { %v1412_v12 = vpop.eup %1411 }
 0x357   :  { %v276_v13 = vadd.f32 1.0, %v1412_v12 }
 0x359   :  { %1413 = vrcp.f32 %v276_v13 }
 0x363   :  { %v1414_v18 = vpop.eup %1413 }
 0x364   :  { %v305_v31 = vrot.slane %v1414_v18, 2 }
 0x3bc   :  { %v281_v16 = vpop.permute.xlu0 %280 }
 0x3bd   :  { %v282_v17 = vrot.slane %v281_v16, 2  ;;  %v1247_v16 = vld [vmem:[%s1801_s0 + $0xc] sm:$0xf] }
 0x3bf   :  { %1415 = vtanh.f32 %v282_v17 }
 0x3c0   :  { %v294_v23 = vpop.permute.xlu0 %293 }
 0x3c1   :  { %v296_v25 = vmul.f32 %v1414_v18, %v294_v23 }
 0x3c9   :  { %v1416_v19 = vpop.eup %1415 }
 0x3ca   :  { %v297_v22 = vmul.f32 %v1416_v19, %v1414_v18 }
 0x3cc   :  { %299 = vrot.lane.b32.xlu1 %v297_v22, %s1469_s18 }
 0x43e   :  { %v300_v26 = vpop.permute.xlu1 %299 }
 0x43f   :  { %v302_v27 = vadd.f32 %v300_v26, %v296_v25 }
 0x441   :  { %1417 = vtanh.f32 %v302_v27  ;;  %v322_v29 = vrot.slane %v302_v27, %v1588_v32 }
 0x44b   :  { %v1418_v28 = vpop.eup %1417 }
 0x44c   :  { %308 = vrot.lane.b32.xlu0 %v1418_v28, %s1469_s18 }
 0x450   :  { %323 = vrot.lane.b32.xlu0 %v322_v29, %s1469_s18 }
 0x4be   :  { %v309_v33 = vpop.permute.xlu0 %308 }
 0x4bf   :  { %v311_v34 = vmul.f32 %v309_v33, %v305_v31 }
 0x4c1   :  { %v313_v35 = vsel %vm312_vm3, %v311_v34, %v185_v62  ;;  %v328_v36 = vsel %vm312_vm3, %v311_v34, 0.0  ;;  %v1243_v62 = vld [vmem:[%s1802_s2 + $0x4] sm:$0x3] }
 0x4c2   :  { %314 = vst.msk [vmem:[#allocation2] sm:$0x3] %vm14_vm0, %v313_v35  ;;  %1241 = vst.msk [vmem:[%s1803_s3 + $0x2] sm:$0x3] %vm14_vm0, %v328_v36  ;;  %v324_v37 = vpop.permute.xlu0 %323  ;;  %vm462_vm4 = vcmp.gt.f32.partialorder %v1243_v62, 0.5 }
 0x4c3   :  { %v326_v38 = vsel %vm312_vm3, %v324_v37, %v186_v7 }
 0x4c4   :  { %327 = vst.msk [vmem:[#allocation3] sm:$0x3] %vm14_vm0, %v326_v38  ;;  %v1248_v38 = vld [vmem:[%s1802_s2 + $0x6] sm:$0x3] }
 0x4c5   :  { %vm612_vm5 = vcmp.gt.f32.partialorder %v1248_v38, 0.5 }
 0x4c9   :  { %v335_v39 = vld [vmem:[#allocation2] sm:$0x3] }
 0x4ca   :  { %1244 = vmatmul.mubr.msk.f32.vlgmr.msra.gmra.mrb[2].mxu0 %vm37_vm1, %v335_v39 }
 0x4cb   :  { %1339 = vmatpush1.bf16.msra.mxu0 %v1516_v8  ;;  %704 = vmatprep.mubr.f32.mxu0 %v1467_v3  ;;  %v336_v46 = vld [vmem:[#allocation3] sm:$0x3] }
 0x4cc   :  { %1341 = vmatprep.subr.bf16.mxu0 %v1518_v9  ;;  %v442_v47 = vrot.slane %v336_v46, %v1588_v32 }
 0x4cf   :  { %1343 = vmatpush1.bf16.msra.mxu0 %v1535_v14 }
 0x4d0   :  { %1345 = vmatprep.subr.bf16.mxu0 %v1539_v15 }
 0x4d3   :  { %1347 = vmatpush1.bf16.msra.mxu0 %v1555_v20 }
 0x4d4   :  { %1349 = vmatprep.subr.bf16.mxu0 %v1559_v21 }
 0x4d7   :  { %1351 = vmatpush1.bf16.msra.mxu0 %v1569_v24 }
 0x4d8   :  { %1369 = vmatprep.subr.bf16.mxu0 %v1505_v4 }
 0x59d   :  { %v406_v40 = vpop.f32.mrb[2].mxu0 }
 0x59e   :  { %v408_v41 = vpop.f32.mrb[3].mxu0 }
 0x59f   :  { %v413_v42 = vcombine.low %v406_v40, %v408_v41 }
 0x5a1   :  { %v420_v44 = vrot.slane %v413_v42, %v1588_v32 }
 0x5a3   :  { %v422_v45 = vadd.f32 %v1242_v43, %v420_v44 }
 0x5a5   :  { %430 = vrot.lane.b32.xlu1 %v422_v45, %s1469_s18  ;;  %v1245_v48 = vmul.f32 -1.442695, %v422_v45 }
 0x5a7   :  { %1419 = vpow2.f32 %v1245_v48 }
 0x5a9   :  { %443 = vrot.lane.b32.xlu1 %v442_v47, %s1469_s18 }
 0x5b1   :  { %v1420_v49 = vpop.eup %1419 }
 0x5b2   :  { %v426_v50 = vadd.f32 1.0, %v1420_v49 }
 0x5b4   :  { %1421 = vrcp.f32 %v426_v50  ;;  %v1252_v50 = vld [vmem:[%s1801_s0 + $0x10] sm:$0xf] }
 0x5be   :  { %v1422_v53 = vpop.eup %1421 }
 0x5bf   :  { %v455_v63 = vrot.slane %v1422_v53, 2 }
 0x617   :  { %v431_v51 = vpop.permute.xlu1 %430 }
 0x618   :  { %v432_v52 = vrot.slane %v431_v51, 2 }
 0x61a   :  { %1423 = vtanh.f32 %v432_v52 }
 0x61b   :  { %v444_v56 = vpop.permute.xlu1 %443 }
 0x61c   :  { %v446_v57 = vmul.f32 %v1422_v53, %v444_v56 }
 0x624   :  { %v1424_v54 = vpop.eup %1423 }
 0x625   :  { %v447_v55 = vmul.f32 %v1424_v54, %v1422_v53 }
 0x627   :  { %449 = vrot.lane.b32.xlu0 %v447_v55, %s1469_s18 }
 0x699   :  { %v450_v58 = vpop.permute.xlu0 %449 }
 0x69a   :  { %v452_v59 = vadd.f32 %v450_v58, %v446_v57 }
 0x69c   :  { %1425 = vtanh.f32 %v452_v59  ;;  %v472_v61 = vrot.slane %v452_v59, %v1588_v32 }
 0x6a6   :  { %v1426_v60 = vpop.eup %1425 }
 0x6a7   :  { %458 = vrot.lane.b32.xlu1 %v1426_v60, %s1469_s18 }
 0x6ab   :  { %473 = vrot.lane.b32.xlu1 %v472_v61, %s1469_s18 }
 0x719   :  { %v459_v0 = vpop.permute.xlu1 %458 }
 0x71a   :  { %v461_v1 = vmul.f32 %v459_v0, %v455_v63 }
 0x71c   :  { %v463_v2 = vsel %vm462_vm4, %v461_v1, %v335_v39  ;;  %v478_v5 = vsel %vm462_vm4, %v461_v1, 0.0 }
 0x71d   :  { %464 = vst.msk [vmem:[#allocation2] sm:$0x3] %vm14_vm0, %v463_v2  ;;  %1246 = vst.msk [vmem:[%s1803_s3 + $0x4] sm:$0x3] %vm14_vm0, %v478_v5  ;;  %v474_v6 = vpop.permute.xlu1 %473 }
 0x71e   :  { %v476_v7 = vsel %vm462_vm4, %v474_v6, %v336_v46 }
 0x71f   :  { %477 = vst.msk [vmem:[#allocation3] sm:$0x3] %vm14_vm0, %v476_v7  ;;  %v1253_v7 = vld [vmem:[%s1802_s2 + $0x8] sm:$0x3] }
 0x720   :  { %vm762_vm6 = vcmp.gt.f32.partialorder %v1253_v7, 0.5 }
 0x724   :  { %v485_v10 = vld [vmem:[#allocation2] sm:$0x3] }
 0x725   :  { %1249 = vmatmul.mubr.msk.f32.vlgmr.msra.gmra.mrb[2].mxu1 %vm37_vm1, %v485_v10 }
 0x726   :  { %1355 = vmatpush1.bf16.msra.mxu1 %v1516_v8  ;;  %854 = vmatprep.mubr.f32.mxu1 %v1467_v3  ;;  %v486_v19 = vld [vmem:[#allocation3] sm:$0x3] }
 0x727   :  { %1357 = vmatprep.subr.bf16.mxu1 %v1518_v9  ;;  %v592_v22 = vrot.slane %v486_v19, %v1588_v32 }
 0x72a   :  { %1359 = vmatpush1.bf16.msra.mxu1 %v1535_v14 }
 0x72b   :  { %1361 = vmatprep.subr.bf16.mxu1 %v1539_v15 }
 0x72e   :  { %1363 = vmatpush1.bf16.msra.mxu1 %v1555_v20 }
 0x72f   :  { %1365 = vmatprep.subr.bf16.mxu1 %v1559_v21 }
 0x732   :  { %1367 = vmatpush1.bf16.msra.mxu1 %v1569_v24 }
 0x733   :  { %1385 = vmatprep.subr.bf16.mxu1 %v1505_v4 }
 0x7f8   :  { %v556_v11 = vpop.f32.mrb[2].mxu1 }
 0x7f9   :  { %v558_v12 = vpop.f32.mrb[3].mxu1 }
 0x7fa   :  { %v563_v13 = vcombine.low %v556_v11, %v558_v12 }
 0x7fc   :  { %v570_v17 = vrot.slane %v563_v13, %v1588_v32 }
 0x7fe   :  { %v572_v18 = vadd.f32 %v1247_v16, %v570_v17 }
 0x800   :  { %580 = vrot.lane.b32.xlu0 %v572_v18, %s1469_s18  ;;  %v1250_v23 = vmul.f32 -1.442695, %v572_v18 }
 0x802   :  { %1427 = vpow2.f32 %v1250_v23 }
 0x804   :  { %593 = vrot.lane.b32.xlu0 %v592_v22, %s1469_s18 }
 0x80c   :  { %v1428_v4 = vpop.eup %1427 }
 0x80d   :  { %v576_v25 = vadd.f32 1.0, %v1428_v4 }
 0x80f   :  { %1429 = vrcp.f32 %v576_v25 }
 0x819   :  { %v1430_v28 = vpop.eup %1429 }
 0x81a   :  { %v605_v39 = vrot.slane %v1430_v28, 2 }
 0x872   :  { %v581_v26 = vpop.permute.xlu0 %580 }
 0x873   :  { %v582_v27 = vrot.slane %v581_v26, 2 }
 0x875   :  { %1431 = vtanh.f32 %v582_v27 }
 0x876   :  { %v594_v31 = vpop.permute.xlu0 %593 }
 0x877   :  { %v596_v33 = vmul.f32 %v1430_v28, %v594_v31 }
 0x87f   :  { %v1432_v29 = vpop.eup %1431 }
 0x880   :  { %v597_v30 = vmul.f32 %v1432_v29, %v1430_v28 }
 0x882   :  { %599 = vrot.lane.b32.xlu1 %v597_v30, %s1469_s18 }
 0x8f4   :  { %v600_v34 = vpop.permute.xlu1 %599 }
 0x8f5   :  { %v602_v35 = vadd.f32 %v600_v34, %v596_v33 }
 0x8f7   :  { %1433 = vtanh.f32 %v602_v35  ;;  %v622_v37 = vrot.slane %v602_v35, %v1588_v32 }
 0x901   :  { %v1434_v36 = vpop.eup %1433 }
 0x902   :  { %608 = vrot.lane.b32.xlu0 %v1434_v36, %s1469_s18 }
 0x906   :  { %623 = vrot.lane.b32.xlu0 %v622_v37, %s1469_s18  ;;  %v1258_v37 = vld [vmem:[%s1802_s2 + $0xa] sm:$0x3] }
 0x907   :  { %vm912_vm7 = vcmp.gt.f32.partialorder %v1258_v37, 0.5 }
 0x974   :  { %v609_v40 = vpop.permute.xlu0 %608 }
 0x975   :  { %v611_v41 = vmul.f32 %v609_v40, %v605_v39 }
 0x977   :  { %v613_v42 = vsel %vm612_vm5, %v611_v41, %v485_v10  ;;  %v628_v43 = vsel %vm612_vm5, %v611_v41, 0.0 }
 0x978   :  { %614 = vst.msk [vmem:[#allocation2] sm:$0x3] %vm14_vm0, %v613_v42  ;;  %1251 = vst.msk [vmem:[%s1803_s3 + $0x6] sm:$0x3] %vm14_vm0, %v628_v43  ;;  %v624_v44 = vpop.permute.xlu0 %623 }
 0x979   :  { %v626_v45 = vsel %vm612_vm5, %v624_v44, %v486_v19 }
 0x97a   :  { %627 = vst.msk [vmem:[#allocation3] sm:$0x3] %vm14_vm0, %v626_v45 }
 0x97f   :  { %v635_v46 = vld [vmem:[#allocation2] sm:$0x3] }
 0x980   :  { %1254 = vmatmul.mubr.msk.f32.vlgmr.msra.gmra.mrb[4].mxu0 %vm37_vm1, %v635_v46 }
 0x981   :  { %1371 = vmatpush1.bf16.msra.mxu0 %v1516_v8  ;;  %1004 = vmatprep.mubr.f32.mxu0 %v1467_v3  ;;  %v636_v53 = vld [vmem:[#allocation3] sm:$0x3] }
 0x982   :  { %1373 = vmatprep.subr.bf16.mxu0 %v1518_v9  ;;  %v742_v54 = vrot.slane %v636_v53, %v1588_v32 }
 0x985   :  { %1375 = vmatpush1.bf16.msra.mxu0 %v1535_v14 }
 0x986   :  { %1377 = vmatprep.subr.bf16.mxu0 %v1539_v15 }
 0x989   :  { %1379 = vmatpush1.bf16.msra.mxu0 %v1555_v20 }
 0x98a   :  { %1381 = vmatprep.subr.bf16.mxu0 %v1559_v21 }
 0x98d   :  { %1383 = vmatpush1.bf16.msra.mxu0 %v1569_v24 }
 0xa53   :  { %v706_v47 = vpop.f32.mrb[4].mxu0 }
 0xa54   :  { %v708_v48 = vpop.f32.mrb[5].mxu0 }
 0xa55   :  { %v713_v49 = vcombine.low %v706_v47, %v708_v48 }
 0xa57   :  { %v720_v51 = vrot.slane %v713_v49, %v1588_v32  ;;  %v1262_v49 = vld [vmem:[%s1801_s0 + $0x18] sm:$0xf] }
 0xa59   :  { %v722_v52 = vadd.f32 %v1252_v50, %v720_v51 }
 0xa5b   :  { %730 = vrot.lane.b32.xlu1 %v722_v52, %s1469_s18  ;;  %v1255_v55 = vmul.f32 -1.442695, %v722_v52 }
 0xa5d   :  { %1435 = vpow2.f32 %v1255_v55 }
 0xa5f   :  { %743 = vrot.lane.b32.xlu1 %v742_v54, %s1469_s18 }
 0xa67   :  { %v1436_v56 = vpop.eup %1435 }
 0xa68   :  { %v726_v57 = vadd.f32 1.0, %v1436_v56 }
 0xa6a   :  { %1437 = vrcp.f32 %v726_v57 }
 0xa74   :  { %v1438_v60 = vpop.eup %1437 }
 0xa75   :  { %v755_v10 = vrot.slane %v1438_v60, 2 }
 0xacd   :  { %v731_v58 = vpop.permute.xlu1 %730 }
 0xace   :  { %v732_v59 = vrot.slane %v731_v58, 2 }
 0xad0   :  { %1439 = vtanh.f32 %v732_v59 }
 0xad1   :  { %v744_v63 = vpop.permute.xlu1 %743 }
 0xad2   :  { %v746_v0 = vmul.f32 %v1438_v60, %v744_v63 }
 0xada   :  { %v1440_v61 = vpop.eup %1439 }
 0xadb   :  { %v747_v62 = vmul.f32 %v1440_v61, %v1438_v60 }
 0xadd   :  { %749 = vrot.lane.b32.xlu0 %v747_v62, %s1469_s18 }
 0xb4f   :  { %v750_v1 = vpop.permute.xlu0 %749 }
 0xb50   :  { %v752_v2 = vadd.f32 %v750_v1, %v746_v0 }
 0xb52   :  { %1441 = vtanh.f32 %v752_v2  ;;  %v772_v6 = vrot.slane %v752_v2, %v1588_v32 }
 0xb5c   :  { %v1442_v5 = vpop.eup %1441 }
 0xb5d   :  { %758 = vrot.lane.b32.xlu1 %v1442_v5, %s1469_s18 }
 0xb61   :  { %773 = vrot.lane.b32.xlu1 %v772_v6, %s1469_s18  ;;  %v1263_v6 = vld [vmem:[%s1802_s2 + $0xc] sm:$0x3] }
 0xb62   :  { %vm1062_vm8 = vcmp.gt.f32.partialorder %v1263_v6, 0.5 }
 0xbcf   :  { %v759_v11 = vpop.permute.xlu1 %758 }
 0xbd0   :  { %v761_v12 = vmul.f32 %v759_v11, %v755_v10 }
 0xbd2   :  { %v763_v13 = vsel %vm762_vm6, %v761_v12, %v635_v46  ;;  %v778_v16 = vsel %vm762_vm6, %v761_v12, 0.0 }
 0xbd3   :  { %764 = vst.msk [vmem:[#allocation2] sm:$0x3] %vm14_vm0, %v763_v13  ;;  %1256 = vst.msk [vmem:[%s1803_s3 + $0x8] sm:$0x3] %vm14_vm0, %v778_v16  ;;  %v774_v17 = vpop.permute.xlu1 %773 }
 0xbd4   :  { %v776_v18 = vsel %vm762_vm6, %v774_v17, %v636_v53 }
 0xbd5   :  { %777 = vst.msk [vmem:[#allocation3] sm:$0x3] %vm14_vm0, %v776_v18 }
 0xbda   :  { %v785_v19 = vld [vmem:[#allocation2] sm:$0x3] }
 0xbdb   :  { %1259 = vmatmul.mubr.msk.f32.vlgmr.msra.gmra.mrb[4].mxu1 %vm37_vm1, %v785_v19 }
 0xbdc   :  { %1387 = vmatpush1.bf16.msra.mxu1 %v1516_v8  ;;  %1154 = vmatprep.mubr.f32.mxu1 %v1467_v3  ;;  %v1257_v8 = vld [vmem:[%s1801_s0 + $0x14] sm:$0xf]  ;;  %v786_v25 = vld [vmem:[#allocation3] sm:$0x3] }
 0xbdd   :  { %1389 = vmatprep.subr.bf16.mxu1 %v1518_v9 }
 0xbe0   :  { %1391 = vmatpush1.bf16.msra.mxu1 %v1535_v14  ;;  %v892_v14 = vrot.slane %v786_v25, %v1588_v32 }
 0xbe1   :  { %1393 = vmatprep.subr.bf16.mxu1 %v1539_v15 }
 0xbe4   :  { %1395 = vmatpush1.bf16.msra.mxu1 %v1555_v20 }
 0xbe5   :  { %1397 = vmatprep.subr.bf16.mxu1 %v1559_v21 }
 0xbe8   :  { %1399 = vmatpush1.bf16.msra.mxu1 %v1569_v24 }
 0xcae   :  { %v856_v22 = vpop.f32.mrb[4].mxu1 }
 0xcaf   :  { %v858_v23 = vpop.f32.mrb[5].mxu1 }
 0xcb0   :  { %v863_v4 = vcombine.low %v856_v22, %v858_v23 }
 0xcb2   :  { %v870_v3 = vrot.slane %v863_v4, %v1588_v32  ;;  %v1267_v4 = vld [vmem:[%s1801_s0 + $0x1c] sm:$0xf] }
 0xcb4   :  { %v872_v9 = vadd.f32 %v1257_v8, %v870_v3 }
 0xcb6   :  { %880 = vrot.lane.b32.xlu0 %v872_v9, %s1469_s18  ;;  %v1260_v15 = vmul.f32 -1.442695, %v872_v9 }
 0xcb8   :  { %1443 = vpow2.f32 %v1260_v15 }
 0xcba   :  { %893 = vrot.lane.b32.xlu0 %v892_v14, %s1469_s18 }
 0xcc2   :  { %v1444_v20 = vpop.eup %1443 }
 0xcc3   :  { %v876_v21 = vadd.f32 1.0, %v1444_v20 }
 0xcc5   :  { %1445 = vrcp.f32 %v876_v21 }
 0xccf   :  { %v1446_v27 = vpop.eup %1445 }
 0xcd0   :  { %v905_v38 = vrot.slane %v1446_v27, 2 }
 0xd28   :  { %v881_v24 = vpop.permute.xlu0 %880 }
 0xd29   :  { %v882_v26 = vrot.slane %v881_v24, 2 }
 0xd2b   :  { %1447 = vtanh.f32 %v882_v26 }
 0xd2c   :  { %v894_v30 = vpop.permute.xlu0 %893 }
 0xd2d   :  { %v896_v31 = vmul.f32 %v1446_v27, %v894_v30 }
 0xd35   :  { %v1448_v28 = vpop.eup %1447 }
 0xd36   :  { %v897_v29 = vmul.f32 %v1448_v28, %v1446_v27 }
 0xd38   :  { %899 = vrot.lane.b32.xlu1 %v897_v29, %s1469_s18 }
 0xdaa   :  { %v900_v33 = vpop.permute.xlu1 %899 }
 0xdab   :  { %v902_v34 = vadd.f32 %v900_v33, %v896_v31 }
 0xdad   :  { %1449 = vtanh.f32 %v902_v34  ;;  %v922_v36 = vrot.slane %v902_v34, %v1588_v32 }
 0xdb7   :  { %v1450_v35 = vpop.eup %1449 }
 0xdb8   :  { %908 = vrot.lane.b32.xlu0 %v1450_v35, %s1469_s18 }
 0xdbc   :  { %923 = vrot.lane.b32.xlu0 %v922_v36, %s1469_s18  ;;  %v1268_v36 = vld [vmem:[%s1802_s2 + $0xe] sm:$0x3] }
 0xdbd   :  { %vm1212_vm9 = vcmp.gt.f32.partialorder %v1268_v36, 0.5 }
 0xe2a   :  { %v909_v39 = vpop.permute.xlu0 %908 }
 0xe2b   :  { %v911_v40 = vmul.f32 %v909_v39, %v905_v38 }
 0xe2d   :  { %v913_v41 = vsel %vm912_vm7, %v911_v40, %v785_v19  ;;  %v928_v42 = vsel %vm912_vm7, %v911_v40, 0.0 }
 0xe2e   :  { %914 = vst.msk [vmem:[#allocation2] sm:$0x3] %vm14_vm0, %v913_v41  ;;  %1261 = vst.msk [vmem:[%s1803_s3 + $0xa] sm:$0x3] %vm14_vm0, %v928_v42  ;;  %v924_v43 = vpop.permute.xlu0 %923 }
 0xe2f   :  { %v926_v44 = vsel %vm912_vm7, %v924_v43, %v786_v25 }
 0xe30   :  { %927 = vst.msk [vmem:[#allocation3] sm:$0x3] %vm14_vm0, %v926_v44 }
 0xe35   :  { %v935_v45 = vld [vmem:[#allocation2] sm:$0x3] }
 0xe36   :  { %1264 = vmatmul.mubr.msk.f32.vlgmr.msra.gmra.mrb[6].mxu0 %vm37_vm1, %v935_v45 }
 0xe37   :  { %v936_v52 = vld [vmem:[#allocation3] sm:$0x3] }
 0xe38   :  { %v1042_v53 = vrot.slane %v936_v52, %v1588_v32 }
 0xf09   :  { %v1006_v46 = vpop.f32.mrb[6].mxu0 }
 0xf0a   :  { %v1008_v47 = vpop.f32.mrb[7].mxu0 }
 0xf0b   :  { %v1013_v48 = vcombine.low %v1006_v46, %v1008_v47 }
 0xf0d   :  { %v1020_v50 = vrot.slane %v1013_v48, %v1588_v32 }
 0xf0f   :  { %v1022_v51 = vadd.f32 %v1262_v49, %v1020_v50 }
 0xf11   :  { %1030 = vrot.lane.b32.xlu1 %v1022_v51, %s1469_s18  ;;  %v1265_v54 = vmul.f32 -1.442695, %v1022_v51 }
 0xf13   :  { %1451 = vpow2.f32 %v1265_v54 }
 0xf15   :  { %1043 = vrot.lane.b32.xlu1 %v1042_v53, %s1469_s18 }
 0xf1d   :  { %v1452_v55 = vpop.eup %1451 }
 0xf1e   :  { %v1026_v56 = vadd.f32 1.0, %v1452_v55 }
 0xf20   :  { %1453 = vrcp.f32 %v1026_v56 }
 0xf2a   :  { %v1454_v59 = vpop.eup %1453 }
 0xf2b   :  { %v1055_v7 = vrot.slane %v1454_v59, 2 }
 0xf83   :  { %v1031_v57 = vpop.permute.xlu1 %1030 }
 0xf84   :  { %v1032_v58 = vrot.slane %v1031_v57, 2 }
 0xf86   :  { %1455 = vtanh.f32 %v1032_v58 }
 0xf87   :  { %v1044_v62 = vpop.permute.xlu1 %1043 }
 0xf88   :  { %v1046_v63 = vmul.f32 %v1454_v59, %v1044_v62 }
 0xf90   :  { %v1456_v60 = vpop.eup %1455 }
 0xf91   :  { %v1047_v61 = vmul.f32 %v1456_v60, %v1454_v59 }
 0xf93   :  { %1049 = vrot.lane.b32.xlu0 %v1047_v61, %s1469_s18 }
0x1005   :  { %v1050_v0 = vpop.permute.xlu0 %1049 }
0x1006   :  { %v1052_v1 = vadd.f32 %v1050_v0, %v1046_v63 }
0x1008   :  { %1457 = vtanh.f32 %v1052_v1  ;;  %v1072_v5 = vrot.slane %v1052_v1, %v1588_v32 }
0x1012   :  { %v1458_v2 = vpop.eup %1457 }
0x1013   :  { %1058 = vrot.lane.b32.xlu1 %v1458_v2, %s1469_s18 }
0x1017   :  { %1073 = vrot.lane.b32.xlu1 %v1072_v5, %s1469_s18 }
0x1085   :  { %v1059_v10 = vpop.permute.xlu1 %1058 }
0x1086   :  { %v1061_v11 = vmul.f32 %v1059_v10, %v1055_v7 }
0x1088   :  { %v1063_v12 = vsel %vm1062_vm8, %v1061_v11, %v935_v45  ;;  %v1078_v13 = vsel %vm1062_vm8, %v1061_v11, 0.0 }
0x1089   :  { %1064 = vst.msk [vmem:[#allocation2] sm:$0x3] %vm14_vm0, %v1063_v12  ;;  %1266 = vst.msk [vmem:[%s1803_s3 + $0xc] sm:$0x3] %vm14_vm0, %v1078_v13  ;;  %v1074_v16 = vpop.permute.xlu1 %1073 }
0x108a   :  { %v1076_v17 = vsel %vm1062_vm8, %v1074_v16, %v936_v52 }
0x108b   :  { %1077 = vst.msk [vmem:[#allocation3] sm:$0x3] %vm14_vm0, %v1076_v17 }
0x1090   :  { %v1085_v18 = vld [vmem:[#allocation2] sm:$0x3] }
0x1091   :  { %1269 = vmatmul.mubr.msk.f32.vlgmr.msra.gmra.mrb[6].mxu1 %vm37_vm1, %v1085_v18 }
0x1092   :  { %v1086_v9 = vld [vmem:[#allocation3] sm:$0x3] }
0x1093   :  { %v1192_v25 = vrot.slane %v1086_v9, %v1588_v32 }
0x1164   :  { %v1156_v19 = vpop.f32.mrb[6].mxu1 }
0x1165   :  { %v1158_v22 = vpop.f32.mrb[7].mxu1 }
0x1166   :  { %v1163_v23 = vcombine.low %v1156_v19, %v1158_v22 }
0x1168   :  { %v1170_v8 = vrot.slane %v1163_v23, %v1588_v32 }
0x116a   :  { %v1172_v3 = vadd.f32 %v1267_v4, %v1170_v8 }
0x116c   :  { %1180 = vrot.lane.b32.xlu0 %v1172_v3, %s1469_s18  ;;  %v1270_v14 = vmul.f32 -1.442695, %v1172_v3 }
0x116e   :  { %1459 = vpow2.f32 %v1270_v14 }
0x1170   :  { %1193 = vrot.lane.b32.xlu0 %v1192_v25, %s1469_s18 }
0x1178   :  { %v1460_v15 = vpop.eup %1459 }
0x1179   :  { %v1176_v20 = vadd.f32 1.0, %v1460_v15 }
0x117b   :  { %1461 = vrcp.f32 %v1176_v20 }
0x1185   :  { %v1462_v26 = vpop.eup %1461 }
0x1186   :  { %v1205_v39 = vrot.slane %v1462_v26, 2 }
0x11de   :  { %v1181_v21 = vpop.permute.xlu0 %1180 }
0x11df   :  { %v1182_v24 = vrot.slane %v1181_v21, 2 }
0x11e1   :  { %1463 = vtanh.f32 %v1182_v24 }
0x11e2   :  { %v1194_v29 = vpop.permute.xlu0 %1193 }
0x11e3   :  { %v1196_v30 = vmul.f32 %v1462_v26, %v1194_v29 }
0x11eb   :  { %v1464_v27 = vpop.eup %1463 }
0x11ec   :  { %v1197_v28 = vmul.f32 %v1464_v27, %v1462_v26 }
0x11ee   :  { %1199 = vrot.lane.b32.xlu1 %v1197_v28, %s1469_s18 }
0x1260   :  { %v1200_v31 = vpop.permute.xlu1 %1199 }
0x1261   :  { %v1202_v33 = vadd.f32 %v1200_v31, %v1196_v30 }
0x1263   :  { %1465 = vtanh.f32 %v1202_v33  ;;  %v1222_v34 = vrot.slane %v1202_v33, %v1588_v32 }
0x1265   :  { %1223 = vrot.lane.b32.xlu1 %v1222_v34, %s1469_s18 }
0x126d   :  { %v1466_v35 = vpop.eup %1465 }
0x126e   :  { %1208 = vrot.lane.b32.xlu0 %v1466_v35, %s1469_s18 }
0x12d7   :  { %v1224_v37 = vpop.permute.xlu1 %1223 }
0x12d8   :  { %v1226_v38 = vsel %vm1212_vm9, %v1224_v37, %v1086_v9 }
0x12d9   :  { %1227 = vst.msk [vmem:[#allocation3] sm:$0x3] %vm14_vm0, %v1226_v38 }
0x12e0   :  { %v1209_v40 = vpop.permute.xlu0 %1208 }
0x12e1   :  { %v1211_v41 = vmul.f32 %v1209_v40, %v1205_v39 }
0x12e3   :  { %v1213_v42 = vsel %vm1212_vm9, %v1211_v41, %v1085_v18  ;;  %v1228_v43 = vsel %vm1212_vm9, %v1211_v41, 0.0 }
0x12e4   :  { %1214 = vst.msk [vmem:[#allocation2] sm:$0x3] %vm14_vm0, %v1213_v42  ;;  %1271 = vst.msk [vmem:[%s1803_s3 + $0xe] sm:$0x3] %vm14_vm0, %v1228_v43 }

</bundles_post_ra>
